<compile_context>
chip_gen: v7x
topology: tpu7x:2x2x1
jax: 0.10.0
libtpu: 0.0.40
codegen_flags: <defaults>
</compile_context>

<pallas_src>
import functools

import jax
import jax.numpy as jnp
import numpy as np
from jax.experimental import pallas as pl
from jax.experimental.pallas import tpu as pltpu

BN_EPS = 1e-5


# ----------------------------------------------------------------------------
# Tiling helpers
# ----------------------------------------------------------------------------
def _pick_tile(dim, candidates):
    """Largest candidate that evenly divides `dim`, else the full dim (allowed by Mosaic)."""
    for c in candidates:
        if dim >= c and dim % c == 0:
            return c
    return dim


def _vmem_limit(buffer_bytes):
    """Scoped-VMEM budget: double-buffered sum + headroom, clamped for v7x (64 MiB phys)."""
    total = int(2 * buffer_bytes * 1.5) + (8 << 20)
    return max(16 << 20, min(total, 64 << 20))


# ----------------------------------------------------------------------------
# Pallas kernels (hot paths)
# ----------------------------------------------------------------------------
def _matmul_kernel(x_ref, w_ref, b_ref, *rest, relu, has_res):
    # Tiled (tm, tk) @ (tk, tn) on the MXU (bf16 in, f32 accumulate in VMEM scratch).
    # Epilogue (bias [+ residual] [+ ReLU]) applied once on the last K step.
    if has_res:
        res_ref, o_ref, acc_ref = rest
    else:
        o_ref, acc_ref = rest

    k = pl.program_id(2)

    @pl.when(k == 0)
    def _():
        acc_ref[...] = jnp.zeros_like(acc_ref)

    acc_ref[...] += jnp.dot(
        x_ref[...], w_ref[...], preferred_element_type=jnp.float32
    )

    @pl.when(k == pl.num_programs(2) - 1)
    def _():
        out = acc_ref[...] + b_ref[...]          # bias is f32
        if has_res:
            out = out + res_ref[...].astype(jnp.float32)
        if relu:
            out = jnp.maximum(out, 0.0)
        o_ref[...] = out.astype(o_ref.dtype)


def matmul_bias_act(x, w, b, *, relu, residual=None, out_dtype=jnp.bfloat16):
    """(M, K) @ (K, N) + bias [+ residual] [+ ReLU], tiled over (M, N, K)."""
    M, K = x.shape
    _, N = w.shape

    tm = _pick_tile(M, (512, 256, 128))
    tn = _pick_tile(N, (256, 128))               # lane-dense multiples of 128 where possible
    tk = _pick_tile(K, (768, 512, 384, 256, 128))
    grid = (M // tm, N // tn, K // tk)

    x = x.astype(jnp.bfloat16)
    w = w.astype(jnp.bfloat16)
    b2 = b.reshape(1, N).astype(jnp.float32)

    in_specs = [
        pl.BlockSpec((tm, tk), lambda i, j, k: (i, k)),
        pl.BlockSpec((tk, tn), lambda i, j, k: (k, j)),
        pl.BlockSpec((1, tn), lambda i, j, k: (0, j)),
    ]
    args = [x, w, b2]

    has_res = residual is not None
    if has_res:
        in_specs.append(pl.BlockSpec((tm, tn), lambda i, j, k: (i, j)))
        args.append(residual.astype(jnp.bfloat16))

    # double-buffered bf16 tiles + f32 accumulator + out tile
    buf_bytes = (tm * tk + tk * tn + tn + (tm * tn if has_res else 0) + tm * tn) * 2 \
                + tm * tn * 4

    kernel = functools.partial(_matmul_kernel, relu=relu, has_res=has_res)
    return pl.pallas_call(
        kernel,
        grid=grid,
        in_specs=in_specs,
        out_specs=pl.BlockSpec((tm, tn), lambda i, j, k: (i, j)),
        out_shape=jax.ShapeDtypeStruct((M, N), out_dtype),
        scratch_shapes=[pltpu.VMEM((tm, tn), jnp.float32)],
        compiler_params=pltpu.CompilerParams(
            dimension_semantics=("parallel", "parallel", "arbitrary"),
            vmem_limit_bytes=_vmem_limit(buf_bytes),
        ),
    )(*args)


def _maxpool9_kernel(*refs):
    # 9 tap inputs (tm, C) -> elementwise max (epilogue in f32 for v5e compatibility).
    o_ref = refs[-1]
    acc = refs[0][...].astype(jnp.float32)
    for r in refs[1:-1]:
        acc = jnp.maximum(acc, r[...].astype(jnp.float32))
    o_ref[...] = acc.astype(o_ref.dtype)


def maxpool_3x3_s2_p1(x):
    """3x3 stride-2 pad-1 max pool on NHWC bf16 activations."""
    N, H, W, C = x.shape
    xp = jnp.pad(x, ((0, 0), (1, 1), (1, 1), (0, 0)), constant_values=-1e30)
    Hout = (H + 2 - 3) // 2 + 1
    Wout = (W + 2 - 3) // 2 + 1
    M = N * Hout * Wout

    taps = []
    for di in range(3):
        for dj in range(3):
            t = jax.lax.slice(
                xp,
                (0, di, dj, 0),
                (N, di + 2 * (Hout - 1) + 1, dj + 2 * (Wout - 1) + 1, C),
                (1, 2, 2, 1),
            )
            taps.append(t.reshape(M, C))

    tm = _pick_tile(M, (1024, 512, 256, 128))
    grid = (M // tm,)
    in_specs = [pl.BlockSpec((tm, C), lambda i: (i, 0)) for _ in range(9)]
    buf_bytes = (9 * tm * C + tm * C) * 2

    out = pl.pallas_call(
        _maxpool9_kernel,
        grid=grid,
        in_specs=in_specs,
        out_specs=pl.BlockSpec((tm, C), lambda i: (i, 0)),
        out_shape=jax.ShapeDtypeStruct((M, C), jnp.bfloat16),
        compiler_params=pltpu.CompilerParams(
            dimension_semantics=("parallel",),
            vmem_limit_bytes=_vmem_limit(buf_bytes),
        ),
    )(*taps)
    return out.reshape(N, Hout, Wout, C)


# ----------------------------------------------------------------------------
# Plain-JAX glue (patch extraction / reshapes / BN folding)
# ----------------------------------------------------------------------------
def im2col(x, ksize, stride, padding):
    """im2col for k>1 convs (bf16 activations -> bf16 cols)."""
    # TODO(synk): fully fuse the 3x3 im2col into the matmul (implicit GEMM with the 9 taps
    # as a K grid axis / manual DMA) to avoid the 9x cols materialization in HBM.
    N, H, W, C = x.shape
    xp = jnp.pad(x, ((0, 0), (padding, padding), (padding, padding), (0, 0)))
    Hout = (H + 2 * padding - ksize) // stride + 1
    Wout = (W + 2 * padding - ksize) // stride + 1
    taps = []
    for di in range(ksize):
        for dj in range(ksize):
            taps.append(
                jax.lax.slice(
                    xp,
                    (0, di, dj, 0),
                    (N, di + stride * (Hout - 1) + 1, dj + stride * (Wout - 1) + 1, C),
                    (1, stride, stride, 1),
                )
            )
    patches = jnp.stack(taps, axis=3)  # (N, Hout, Wout, k*k, C) -- tap-major matches w.reshape
    return patches.reshape(N * Hout * Wout, ksize * ksize * C), Hout, Wout


def conv_bn(x, w, bn, *, stride, padding, relu, residual=None):
    """Conv2d(no bias) + BatchNorm2d(eval) [+ residual] [+ ReLU] via Pallas tiled matmul.

    x: (N, H, W, Cin) NHWC bf16; w: (kh, kw, Cin, Cout) f32; bn: (gamma, beta, mean, var).
    """
    kh, kw, cin, cout = w.shape
    N = x.shape[0]

    gamma, beta, mean, var = bn
    scale = gamma / jnp.sqrt(var + BN_EPS)
    w_folded = w.reshape(kh * kw * cin, cout) * scale[None, :]   # fold BN in f32
    bias = beta - mean * scale

    if kh == 1 and kw == 1:
        # 1x1 conv: no im2col, just (strided) reshape.
        xs = x if stride == 1 else x[:, ::stride, ::stride, :]
        _, Hout, Wout, _ = xs.shape
        cols = xs.reshape(N * Hout * Wout, cin)
    else:
        cols, Hout, Wout = im2col(x, kh, stride, padding)

    res2 = None
    if residual is not None:
        res2 = residual.reshape(N * Hout * Wout, cout)

    y = matmul_bias_act(cols, w_folded, bias, relu=relu, residual=res2)
    return y.reshape(N, Hout, Wout, cout)


# ----------------------------------------------------------------------------
# Model: bottleneck blocks + full truncated forward
# ----------------------------------------------------------------------------
def bottleneck(x, p):
    if "down_w" in p:
        identity = conv_bn(x, p["down_w"], p["down_bn"],
                           stride=p["stride"], padding=0, relu=False)
    else:
        identity = x
    out = conv_bn(x, p["conv1_w"], p["bn1"], stride=1, padding=0, relu=True)
    out = conv_bn(out, p["conv2_w"], p["bn2"], stride=p["stride"], padding=1, relu=True)
    # conv3 + BN + residual add + ReLU fused into one kernel epilogue.
    out = conv_bn(out, p["conv3_w"], p["bn3"], stride=1, padding=0,
                  relu=True, residual=identity)
    return out


def feature_extractor(x_nchw, params):
    # NCHW (PyTorch convention) -> NHWC bf16 for TPU kernels.
    x = jnp.transpose(x_nchw, (0, 2, 3, 1)).astype(jnp.bfloat16)
    # Stem output is 64-wide (< 128 lanes): kept as a full-dim block; negligible at stem size.
    x = conv_bn(x, params["conv1_w"], params["bn1"], stride=2, padding=3, relu=True)
    x = maxpool_3x3_s2_p1(x)
    for blk in params["layer1"]:
        x = bottleneck(x, blk)
    for blk in params["layer2"]:
        x = bottleneck(x, blk)
    # back to NCHW / f32 to match the PyTorch module's output.
    return jnp.transpose(x, (0, 3, 1, 2)).astype(jnp.float32)


# ----------------------------------------------------------------------------
# Deterministic synthetic parameter init (shapes match wide_resnet50_2 layer1/layer2)
# ----------------------------------------------------------------------------
def _init_conv(key, kh, kw, cin, cout):
    fan_in = kh * kw * cin
    return jax.random.normal(key, (kh, kw, cin, cout), jnp.float32) / np.sqrt(fan_in)


def _init_bn(key, c):
    k1, k2, k3, k4 = jax.random.split(key, 4)
    gamma = 1.0 + 0.1 * jax.random.normal(k1, (c,), jnp.float32)
    beta = 0.1 * jax.random.normal(k2, (c,), jnp.float32)
    mean = 0.1 * jax.random.normal(k3, (c,), jnp.float32)
    var = jnp.abs(jax.random.normal(k4, (c,), jnp.float32)) + 0.5
    return (gamma, beta, mean, var)


def init_params(key):
    keys = iter(jax.random.split(key, 256))
    nk = lambda: next(keys)

    params = {
        "conv1_w": _init_conv(nk(), 7, 7, 3, 64),
        "bn1": _init_bn(nk(), 64),
    }

    def make_layer(inplanes, planes, blocks, stride):
        width = planes * 2          # wide_resnet50_2: width_per_group=128 -> planes * 2
        out_c = planes * 4          # Bottleneck expansion = 4
        layer = []
        for b in range(blocks):
            cin = inplanes if b == 0 else out_c
            s = stride if b == 0 else 1
            blk = {
                "stride": s,
                "conv1_w": _init_conv(nk(), 1, 1, cin, width),
                "bn1": _init_bn(nk(), width),
                "conv2_w": _init_conv(nk(), 3, 3, width, width),
                "bn2": _init_bn(nk(), width),
                "conv3_w": _init_conv(nk(), 1, 1, width, out_c),
                "bn3": _init_bn(nk(), out_c),
            }
            if b == 0:  # downsample: stride != 1 or inplanes != planes*expansion
                blk["down_w"] = _init_conv(nk(), 1, 1, cin, out_c)
                blk["down_bn"] = _init_bn(nk(), out_c)
            layer.append(blk)
        return layer

    params["layer1"] = make_layer(64, 64, 3, 1)
    params["layer2"] = make_layer(256, 128, 4, 2)
    return params


if __name__ == "__main__":
    key = jax.random.PRNGKey(0)
    pkey, xkey = jax.random.split(key)
    params = init_params(pkey)

    # Small input consistent with the module: NCHW, 3 RGB channels.
    x = jax.random.normal(xkey, (2, 3, 16, 16), jnp.float32)

    fwd = jax.jit(lambda inp: feature_extractor(inp, params))
    y = fwd(x)
    jax.block_until_ready(y)

    # 16x16 -> conv1/s2: 8x8 -> maxpool/s2: 4x4 -> layer1: 4x4x256 -> layer2/s2: 2x2x512
    assert y.shape == (2, 512, 2, 2), y.shape
    assert bool(jnp.all(jnp.isfinite(y)))
    print("KERNEL_OK")
</pallas_src>

<mosaic_0001>
module attributes {stable_mosaic.version = 11 : i64} {
  func.func @_matmul_kernel(%arg0: i32, %arg1: i32, %arg2: i32, %arg3: memref<128x147xbf16, #tpu.memory_space<vmem>>, %arg4: memref<147x64xbf16, #tpu.memory_space<vmem>>, %arg5: memref<1x64xf32, #tpu.memory_space<vmem>>, %arg6: memref<128x64xbf16, #tpu.memory_space<vmem>>, %arg7: memref<128x64xf32, #tpu.memory_space<vmem>>) attributes {dimension_semantics = [#tpu.dimension_semantics<parallel>, #tpu.dimension_semantics<parallel>, #tpu.dimension_semantics<arbitrary>], iteration_bounds = array<i64: 1, 1, 1>, scalar_prefetch = 0 : i64, scratch_operands = 1 : i64, tpu.core_type = #tpu.core_type<tc>, window_params = [{transform_indices = @transform_0, window_bounds = array<i64: 128, 147>}, {transform_indices = @transform_1, window_bounds = array<i64: 147, 64>}, {transform_indices = @transform_2, window_bounds = array<i64: 1, 64>}, {transform_indices = @transform_3, window_bounds = array<i64: 128, 64>}]} {
    %c0_i32 = arith.constant 0 : i32
    %0 = arith.cmpi eq, %arg2, %c0_i32 : i32
    %1 = arith.extui %0 : i1 to i32
    %c0_i32_0 = arith.constant 0 : i32
    %2 = arith.cmpi ne, %1, %c0_i32_0 : i32
    scf.if %2 {
      %cst_10 = arith.constant 0.000000e+00 : f32
      %12 = vector.broadcast %cst_10 : f32 to vector<128x64xf32>
      %c0_11 = arith.constant 0 : index
      %c0_12 = arith.constant 0 : index
      %13 = vector.load %arg7[%c0_11, %c0_12] : memref<128x64xf32, #tpu.memory_space<vmem>>, vector<128x64xf32>
      tpu.vector_store %arg7[%c0_11, %c0_12], %12 {strides = array<i32>} : memref<128x64xf32, #tpu.memory_space<vmem>>, vector<128x64xf32>,
    } else {
    }
    %c0 = arith.constant 0 : index
    %c0_1 = arith.constant 0 : index
    %3 = vector.load %arg7[%c0, %c0_1] : memref<128x64xf32, #tpu.memory_space<vmem>>, vector<128x64xf32>
    %c0_2 = arith.constant 0 : index
    %c0_3 = arith.constant 0 : index
    %4 = vector.load %arg3[%c0_2, %c0_3] : memref<128x147xbf16, #tpu.memory_space<vmem>>, vector<128x147xbf16>
    %c0_4 = arith.constant 0 : index
    %c0_5 = arith.constant 0 : index
    %5 = vector.load %arg4[%c0_4, %c0_5] : memref<147x64xbf16, #tpu.memory_space<vmem>>, vector<147x64xbf16>
    %cst = arith.constant dense<0.000000e+00> : vector<128x64xf32>
    %6 = tpu.matmul %4, %5, %cst {dimension_numbers = #tpu.dot_dimension_numbers<[1], [0], [0], [1], [0, 0, 1, 1], [], []>} : vector<128x147xbf16>, vector<147x64xbf16>, vector<128x64xf32> -> vector<128x64xf32>
    %7 = arith.addf %3, %6 : vector<128x64xf32>
    %c0_6 = arith.constant 0 : index
    %c0_7 = arith.constant 0 : index
    %8 = vector.load %arg7[%c0_6, %c0_7] : memref<128x64xf32, #tpu.memory_space<vmem>>, vector<128x64xf32>
    tpu.vector_store %arg7[%c0_6, %c0_7], %7 {strides = array<i32>} : memref<128x64xf32, #tpu.memory_space<vmem>>, vector<128x64xf32>,
    %c0_i32_8 = arith.constant 0 : i32
    %9 = arith.cmpi eq, %arg2, %c0_i32_8 : i32
    %10 = arith.extui %9 : i1 to i32
    %c0_i32_9 = arith.constant 0 : i32
    %11 = arith.cmpi ne, %10, %c0_i32_9 : i32
    scf.if %11 {
      %c0_10 = arith.constant 0 : index
      %c0_11 = arith.constant 0 : index
      %12 = vector.load %arg7[%c0_10, %c0_11] : memref<128x64xf32, #tpu.memory_space<vmem>>, vector<128x64xf32>
      %c0_12 = arith.constant 0 : index
      %c0_13 = arith.constant 0 : index
      %13 = vector.load %arg5[%c0_12, %c0_13] : memref<1x64xf32, #tpu.memory_space<vmem>>, vector<1x64xf32>
      %14 = vector.broadcast %13 : vector<1x64xf32> to vector<128x64xf32>
      %15 = arith.addf %12, %14 : vector<128x64xf32>
      %cst_14 = arith.constant 0.000000e+00 : f32
      %16 = vector.broadcast %cst_14 : f32 to vector<128x64xf32>
      %17 = arith.maximumf %15, %16 : vector<128x64xf32>
      %18 = arith.truncf %17 : vector<128x64xf32> to vector<128x64xbf16>
      %c0_15 = arith.constant 0 : index
      %c0_16 = arith.constant 0 : index
      %19 = vector.load %arg6[%c0_15, %c0_16] : memref<128x64xbf16, #tpu.memory_space<vmem>>, vector<128x64xbf16>
      tpu.vector_store %arg6[%c0_15, %c0_16], %18 {strides = array<i32>} : memref<128x64xbf16, #tpu.memory_space<vmem>>, vector<128x64xbf16>,
    } else {
    }
    return
  }
  func.func @transform_0(%arg0: i32, %arg1: i32, %arg2: i32) -> (i32, i32) {
    %c0_i32 = arith.constant 0 : i32
    return %arg0, %arg2 : i32, i32
  }
  func.func @transform_1(%arg0: i32, %arg1: i32, %arg2: i32) -> (i32, i32) {
    %c0_i32 = arith.constant 0 : i32
    return %arg2, %arg1 : i32, i32
  }
  func.func @transform_2(%arg0: i32, %arg1: i32, %arg2: i32) -> (i32, i32) {
    %c0_i32 = arith.constant 0 : i32
    %c0_i32_0 = arith.constant 0 : i32
    return %c0_i32, %arg1 : i32, i32
  }
  func.func @transform_3(%arg0: i32, %arg1: i32, %arg2: i32) -> (i32, i32) {
    %c0_i32 = arith.constant 0 : i32
    return %arg0, %arg1 : i32, i32
  }
}

module attributes {stable_mosaic.version = 11 : i64} {
  func.func @_maxpool9_kernel(%arg0: i32, %arg1: memref<32x64xbf16, #tpu.memory_space<vmem>>, %arg2: memref<32x64xbf16, #tpu.memory_space<vmem>>, %arg3: memref<32x64xbf16, #tpu.memory_space<vmem>>, %arg4: memref<32x64xbf16, #tpu.memory_space<vmem>>, %arg5: memref<32x64xbf16, #tpu.memory_space<vmem>>, %arg6: memref<32x64xbf16, #tpu.memory_space<vmem>>, %arg7: memref<32x64xbf16, #tpu.memory_space<vmem>>, %arg8: memref<32x64xbf16, #tpu.memory_space<vmem>>, %arg9: memref<32x64xbf16, #tpu.memory_space<vmem>>, %arg10: memref<32x64xbf16, #tpu.memory_space<vmem>>) attributes {dimension_semantics = [#tpu.dimension_semantics<parallel>], iteration_bounds = array<i64: 1>, scalar_prefetch = 0 : i64, scratch_operands = 0 : i64, tpu.core_type = #tpu.core_type<tc>, window_params = [{transform_indices = @transform_0, window_bounds = array<i64: 32, 64>}, {transform_indices = @transform_1, window_bounds = array<i64: 32, 64>}, {transform_indices = @transform_2, window_bounds = array<i64: 32, 64>}, {transform_indices = @transform_3, window_bounds = array<i64: 32, 64>}, {transform_indices = @transform_4, window_bounds = array<i64: 32, 64>}, {transform_indices = @transform_5, window_bounds = array<i64: 32, 64>}, {transform_indices = @transform_6, window_bounds = array<i64: 32, 64>}, {transform_indices = @transform_7, window_bounds = array<i64: 32, 64>}, {transform_indices = @transform_8, window_bounds = array<i64: 32, 64>}, {transform_indices = @transform_9, window_bounds = array<i64: 32, 64>}]} {
    %c0 = arith.constant 0 : index
    %c0_0 = arith.constant 0 : index
    %0 = vector.load %arg1[%c0, %c0_0] : memref<32x64xbf16, #tpu.memory_space<vmem>>, vector<32x64xbf16>
    %1 = arith.extf %0 : vector<32x64xbf16> to vector<32x64xf32>
    %c0_1 = arith.constant 0 : index
    %c0_2 = arith.constant 0 : index
    %2 = vector.load %arg2[%c0_1, %c0_2] : memref<32x64xbf16, #tpu.memory_space<vmem>>, vector<32x64xbf16>
    %3 = arith.extf %2 : vector<32x64xbf16> to vector<32x64xf32>
    %4 = arith.maximumf %1, %3 : vector<32x64xf32>
    %c0_3 = arith.constant 0 : index
    %c0_4 = arith.constant 0 : index
    %5 = vector.load %arg3[%c0_3, %c0_4] : memref<32x64xbf16, #tpu.memory_space<vmem>>, vector<32x64xbf16>
    %6 = arith.extf %5 : vector<32x64xbf16> to vector<32x64xf32>
    %7 = arith.maximumf %4, %6 : vector<32x64xf32>
    %c0_5 = arith.constant 0 : index
    %c0_6 = arith.constant 0 : index
    %8 = vector.load %arg4[%c0_5, %c0_6] : memref<32x64xbf16, #tpu.memory_space<vmem>>, vector<32x64xbf16>
    %9 = arith.extf %8 : vector<32x64xbf16> to vector<32x64xf32>
    %10 = arith.maximumf %7, %9 : vector<32x64xf32>
    %c0_7 = arith.constant 0 : index
    %c0_8 = arith.constant 0 : index
    %11 = vector.load %arg5[%c0_7, %c0_8] : memref<32x64xbf16, #tpu.memory_space<vmem>>, vector<32x64xbf16>
    %12 = arith.extf %11 : vector<32x64xbf16> to vector<32x64xf32>
    %13 = arith.maximumf %10, %12 : vector<32x64xf32>
    %c0_9 = arith.constant 0 : index
    %c0_10 = arith.constant 0 : index
    %14 = vector.load %arg6[%c0_9, %c0_10] : memref<32x64xbf16, #tpu.memory_space<vmem>>, vector<32x64xbf16>
    %15 = arith.extf %14 : vector<32x64xbf16> to vector<32x64xf32>
    %16 = arith.maximumf %13, %15 : vector<32x64xf32>
    %c0_11 = arith.constant 0 : index
    %c0_12 = arith.constant 0 : index
    %17 = vector.load %arg7[%c0_11, %c0_12] : memref<32x64xbf16, #tpu.memory_space<vmem>>, vector<32x64xbf16>
    %18 = arith.extf %17 : vector<32x64xbf16> to vector<32x64xf32>
    %19 = arith.maximumf %16, %18 : vector<32x64xf32>
    %c0_13 = arith.constant 0 : index
    %c0_14 = arith.constant 0 : index
    %20 = vector.load %arg8[%c0_13, %c0_14] : memref<32x64xbf16, #tpu.memory_space<vmem>>, vector<32x64xbf16>
    %21 = arith.extf %20 : vector<32x64xbf16> to vector<32x64xf32>
    %22 = arith.maximumf %19, %21 : vector<32x64xf32>
    %c0_15 = arith.constant 0 : index
    %c0_16 = arith.constant 0 : index
    %23 = vector.load %arg9[%c0_15, %c0_16] : memref<32x64xbf16, #tpu.memory_space<vmem>>, vector<32x64xbf16>
    %24 = arith.extf %23 : vector<32x64xbf16> to vector<32x64xf32>
    %25 = arith.maximumf %22, %24 : vector<32x64xf32>
    %26 = arith.truncf %25 : vector<32x64xf32> to vector<32x64xbf16>
    %c0_17 = arith.constant 0 : index
    %c0_18 = arith.constant 0 : index
    %27 = vector.load %arg10[%c0_17, %c0_18] : memref<32x64xbf16, #tpu.memory_space<vmem>>, vector<32x64xbf16>
    tpu.vector_store %arg10[%c0_17, %c0_18], %26 {strides = array<i32>} : memref<32x64xbf16, #tpu.memory_space<vmem>>, vector<32x64xbf16>,
    return
  }
  func.func @transform_0(%arg0: i32) -> (i32, i32) {
    %c0_i32 = arith.constant 0 : i32
    %c0_i32_0 = arith.constant 0 : i32
    return %arg0, %c0_i32 : i32, i32
  }
  func.func @transform_1(%arg0: i32) -> (i32, i32) {
    %c0_i32 = arith.constant 0 : i32
    %c0_i32_0 = arith.constant 0 : i32
    return %arg0, %c0_i32 : i32, i32
  }
  func.func @transform_2(%arg0: i32) -> (i32, i32) {
    %c0_i32 = arith.constant 0 : i32
    %c0_i32_0 = arith.constant 0 : i32
    return %arg0, %c0_i32 : i32, i32
  }
  func.func @transform_3(%arg0: i32) -> (i32, i32) {
    %c0_i32 = arith.constant 0 : i32
    %c0_i32_0 = arith.constant 0 : i32
    return %arg0, %c0_i32 : i32, i32
  }
  func.func @transform_4(%arg0: i32) -> (i32, i32) {
    %c0_i32 = arith.constant 0 : i32
    %c0_i32_0 = arith.constant 0 : i32
    return %arg0, %c0_i32 : i32, i32
  }
  func.func @transform_5(%arg0: i32) -> (i32, i32) {
    %c0_i32 = arith.constant 0 : i32
    %c0_i32_0 = arith.constant 0 : i32
    return %arg0, %c0_i32 : i32, i32
  }
  func.func @transform_6(%arg0: i32) -> (i32, i32) {
    %c0_i32 = arith.constant 0 : i32
    %c0_i32_0 = arith.constant 0 : i32
    return %arg0, %c0_i32 : i32, i32
  }
  func.func @transform_7(%arg0: i32) -> (i32, i32) {
    %c0_i32 = arith.constant 0 : i32
    %c0_i32_0 = arith.constant 0 : i32
    return %arg0, %c0_i32 : i32, i32
  }
  func.func @transform_8(%arg0: i32) -> (i32, i32) {
    %c0_i32 = arith.constant 0 : i32
    %c0_i32_0 = arith.constant 0 : i32
    return %arg0, %c0_i32 : i32, i32
  }
  func.func @transform_9(%arg0: i32) -> (i32, i32) {
    %c0_i32 = arith.constant 0 : i32
    %c0_i32_0 = arith.constant 0 : i32
    return %arg0, %c0_i32 : i32, i32
  }
}

module attributes {stable_mosaic.version = 11 : i64} {
  func.func @_matmul_kernel(%arg0: i32, %arg1: i32, %arg2: i32, %arg3: memref<32x64xbf16, #tpu.memory_space<vmem>>, %arg4: memref<64x128xbf16, #tpu.memory_space<vmem>>, %arg5: memref<1x128xf32, #tpu.memory_space<vmem>>, %arg6: memref<32x128xbf16, #tpu.memory_space<vmem>>, %arg7: memref<32x128xf32, #tpu.memory_space<vmem>>) attributes {dimension_semantics = [#tpu.dimension_semantics<parallel>, #tpu.dimension_semantics<parallel>, #tpu.dimension_semantics<arbitrary>], iteration_bounds = array<i64: 1, 1, 1>, scalar_prefetch = 0 : i64, scratch_operands = 1 : i64, tpu.core_type = #tpu.core_type<tc>, window_params = [{transform_indices = @transform_0, window_bounds = array<i64: 32, 64>}, {transform_indices = @transform_1, window_bounds = array<i64: 64, 128>}, {transform_indices = @transform_2, window_bounds = array<i64: 1, 128>}, {transform_indices = @transform_3, window_bounds = array<i64: 32, 128>}]} {
    %c0_i32 = arith.constant 0 : i32
    %0 = arith.cmpi eq, %arg2, %c0_i32 : i32
    %1 = arith.extui %0 : i1 to i32
    %c0_i32_0 = arith.constant 0 : i32
    %2 = arith.cmpi ne, %1, %c0_i32_0 : i32
    scf.if %2 {
      %cst_10 = arith.constant 0.000000e+00 : f32
      %12 = vector.broadcast %cst_10 : f32 to vector<32x128xf32>
      %c0_11 = arith.constant 0 : index
      %c0_12 = arith.constant 0 : index
      %13 = vector.load %arg7[%c0_11, %c0_12] : memref<32x128xf32, #tpu.memory_space<vmem>>, vector<32x128xf32>
      tpu.vector_store %arg7[%c0_11, %c0_12], %12 {strides = array<i32>} : memref<32x128xf32, #tpu.memory_space<vmem>>, vector<32x128xf32>,
    } else {
    }
    %c0 = arith.constant 0 : index
    %c0_1 = arith.constant 0 : index
    %3 = vector.load %arg7[%c0, %c0_1] : memref<32x128xf32, #tpu.memory_space<vmem>>, vector<32x128xf32>
    %c0_2 = arith.constant 0 : index
    %c0_3 = arith.constant 0 : index
    %4 = vector.load %arg3[%c0_2, %c0_3] : memref<32x64xbf16, #tpu.memory_space<vmem>>, vector<32x64xbf16>
    %c0_4 = arith.constant 0 : index
    %c0_5 = arith.constant 0 : index
    %5 = vector.load %arg4[%c0_4, %c0_5] : memref<64x128xbf16, #tpu.memory_space<vmem>>, vector<64x128xbf16>
    %cst = arith.constant dense<0.000000e+00> : vector<32x128xf32>
    %6 = tpu.matmul %4, %5, %cst {dimension_numbers = #tpu.dot_dimension_numbers<[1], [0], [0], [1], [0, 0, 1, 1], [], []>} : vector<32x64xbf16>, vector<64x128xbf16>, vector<32x128xf32> -> vector<32x128xf32>
    %7 = arith.addf %3, %6 : vector<32x128xf32>
    %c0_6 = arith.constant 0 : index
    %c0_7 = arith.constant 0 : index
    %8 = vector.load %arg7[%c0_6, %c0_7] : memref<32x128xf32, #tpu.memory_space<vmem>>, vector<32x128xf32>
    tpu.vector_store %arg7[%c0_6, %c0_7], %7 {strides = array<i32>} : memref<32x128xf32, #tpu.memory_space<vmem>>, vector<32x128xf32>,
    %c0_i32_8 = arith.constant 0 : i32
    %9 = arith.cmpi eq, %arg2, %c0_i32_8 : i32
    %10 = arith.extui %9 : i1 to i32
    %c0_i32_9 = arith.constant 0 : i32
    %11 = arith.cmpi ne, %10, %c0_i32_9 : i32
    scf.if %11 {
      %c0_10 = arith.constant 0 : index
      %c0_11 = arith.constant 0 : index
      %12 = vector.load %arg7[%c0_10, %c0_11] : memref<32x128xf32, #tpu.memory_space<vmem>>, vector<32x128xf32>
      %c0_12 = arith.constant 0 : index
      %c0_13 = arith.constant 0 : index
      %13 = vector.load %arg5[%c0_12, %c0_13] : memref<1x128xf32, #tpu.memory_space<vmem>>, vector<1x128xf32>
      %14 = vector.broadcast %13 : vector<1x128xf32> to vector<32x128xf32>
      %15 = arith.addf %12, %14 : vector<32x128xf32>
      %cst_14 = arith.constant 0.000000e+00 : f32
      %16 = vector.broadcast %cst_14 : f32 to vector<32x128xf32>
      %17 = arith.maximumf %15, %16 : vector<32x128xf32>
      %18 = arith.truncf %17 : vector<32x128xf32> to vector<32x128xbf16>
      %c0_15 = arith.constant 0 : index
      %c0_16 = arith.constant 0 : index
      %19 = vector.load %arg6[%c0_15, %c0_16] : memref<32x128xbf16, #tpu.memory_space<vmem>>, vector<32x128xbf16>
      tpu.vector_store %arg6[%c0_15, %c0_16], %18 {strides = array<i32>} : memref<32x128xbf16, #tpu.memory_space<vmem>>, vector<32x128xbf16>,
    } else {
    }
    return
  }
  func.func @transform_0(%arg0: i32, %arg1: i32, %arg2: i32) -> (i32, i32) {
    %c0_i32 = arith.constant 0 : i32
    return %arg0, %arg2 : i32, i32
  }
  func.func @transform_1(%arg0: i32, %arg1: i32, %arg2: i32) -> (i32, i32) {
    %c0_i32 = arith.constant 0 : i32
    return %arg2, %arg1 : i32, i32
  }
  func.func @transform_2(%arg0: i32, %arg1: i32, %arg2: i32) -> (i32, i32) {
    %c0_i32 = arith.constant 0 : i32
    %c0_i32_0 = arith.constant 0 : i32
    return %c0_i32, %arg1 : i32, i32
  }
  func.func @transform_3(%arg0: i32, %arg1: i32, %arg2: i32) -> (i32, i32) {
    %c0_i32 = arith.constant 0 : i32
    return %arg0, %arg1 : i32, i32
  }
}

module attributes {stable_mosaic.version = 11 : i64} {
  func.func @_matmul_kernel(%arg0: i32, %arg1: i32, %arg2: i32, %arg3: memref<32x384xbf16, #tpu.memory_space<vmem>>, %arg4: memref<384x128xbf16, #tpu.memory_space<vmem>>, %arg5: memref<1x128xf32, #tpu.memory_space<vmem>>, %arg6: memref<32x128xbf16, #tpu.memory_space<vmem>>, %arg7: memref<32x128xf32, #tpu.memory_space<vmem>>) attributes {dimension_semantics = [#tpu.dimension_semantics<parallel>, #tpu.dimension_semantics<parallel>, #tpu.dimension_semantics<arbitrary>], iteration_bounds = array<i64: 1, 1, 3>, scalar_prefetch = 0 : i64, scratch_operands = 1 : i64, tpu.core_type = #tpu.core_type<tc>, window_params = [{transform_indices = @transform_0, window_bounds = array<i64: 32, 384>}, {transform_indices = @transform_1, window_bounds = array<i64: 384, 128>}, {transform_indices = @transform_2, window_bounds = array<i64: 1, 128>}, {transform_indices = @transform_3, window_bounds = array<i64: 32, 128>}]} {
    %c0_i32 = arith.constant 0 : i32
    %0 = arith.cmpi eq, %arg2, %c0_i32 : i32
    %1 = arith.extui %0 : i1 to i32
    %c0_i32_0 = arith.constant 0 : i32
    %2 = arith.cmpi ne, %1, %c0_i32_0 : i32
    scf.if %2 {
      %cst_9 = arith.constant 0.000000e+00 : f32
      %12 = vector.broadcast %cst_9 : f32 to vector<32x128xf32>
      %c0_10 = arith.constant 0 : index
      %c0_11 = arith.constant 0 : index
      %13 = vector.load %arg7[%c0_10, %c0_11] : memref<32x128xf32, #tpu.memory_space<vmem>>, vector<32x128xf32>
      tpu.vector_store %arg7[%c0_10, %c0_11], %12 {strides = array<i32>} : memref<32x128xf32, #tpu.memory_space<vmem>>, vector<32x128xf32>,
    } else {
    }
    %c0 = arith.constant 0 : index
    %c0_1 = arith.constant 0 : index
    %3 = vector.load %arg7[%c0, %c0_1] : memref<32x128xf32, #tpu.memory_space<vmem>>, vector<32x128xf32>
    %c0_2 = arith.constant 0 : index
    %c0_3 = arith.constant 0 : index
    %4 = vector.load %arg3[%c0_2, %c0_3] : memref<32x384xbf16, #tpu.memory_space<vmem>>, vector<32x384xbf16>
    %c0_4 = arith.constant 0 : index
    %c0_5 = arith.constant 0 : index
    %5 = vector.load %arg4[%c0_4, %c0_5] : memref<384x128xbf16, #tpu.memory_space<vmem>>, vector<384x128xbf16>
    %cst = arith.constant dense<0.000000e+00> : vector<32x128xf32>
    %6 = tpu.matmul %4, %5, %cst {dimension_numbers = #tpu.dot_dimension_numbers<[1], [0], [0], [1], [0, 0, 1, 1], [], []>} : vector<32x384xbf16>, vector<384x128xbf16>, vector<32x128xf32> -> vector<32x128xf32>
    %7 = arith.addf %3, %6 : vector<32x128xf32>
    %c0_6 = arith.constant 0 : index
    %c0_7 = arith.constant 0 : index
    %8 = vector.load %arg7[%c0_6, %c0_7] : memref<32x128xf32, #tpu.memory_space<vmem>>, vector<32x128xf32>
    tpu.vector_store %arg7[%c0_6, %c0_7], %7 {strides = array<i32>} : memref<32x128xf32, #tpu.memory_space<vmem>>, vector<32x128xf32>,
    %c2_i32 = arith.constant 2 : i32
    %9 = arith.cmpi eq, %arg2, %c2_i32 : i32
    %10 = arith.extui %9 : i1 to i32
    %c0_i32_8 = arith.constant 0 : i32
    %11 = arith.cmpi ne, %10, %c0_i32_8 : i32
    scf.if %11 {
      %c0_9 = arith.constant 0 : index
      %c0_10 = arith.constant 0 : index
      %12 = vector.load %arg7[%c0_9, %c0_10] : memref<32x128xf32, #tpu.memory_space<vmem>>, vector<32x128xf32>
      %c0_11 = arith.constant 0 : index
      %c0_12 = arith.constant 0 : index
      %13 = vector.load %arg5[%c0_11, %c0_12] : memref<1x128xf32, #tpu.memory_space<vmem>>, vector<1x128xf32>
      %14 = vector.broadcast %13 : vector<1x128xf32> to vector<32x128xf32>
      %15 = arith.addf %12, %14 : vector<32x128xf32>
      %cst_13 = arith.constant 0.000000e+00 : f32
      %16 = vector.broadcast %cst_13 : f32 to vector<32x128xf32>
      %17 = arith.maximumf %15, %16 : vector<32x128xf32>
      %18 = arith.truncf %17 : vector<32x128xf32> to vector<32x128xbf16>
      %c0_14 = arith.constant 0 : index
      %c0_15 = arith.constant 0 : index
      %19 = vector.load %arg6[%c0_14, %c0_15] : memref<32x128xbf16, #tpu.memory_space<vmem>>, vector<32x128xbf16>
      tpu.vector_store %arg6[%c0_14, %c0_15], %18 {strides = array<i32>} : memref<32x128xbf16, #tpu.memory_space<vmem>>, vector<32x128xbf16>,
    } else {
    }
    return
  }
  func.func @transform_0(%arg0: i32, %arg1: i32, %arg2: i32) -> (i32, i32) {
    %c0_i32 = arith.constant 0 : i32
    return %arg0, %arg2 : i32, i32
  }
  func.func @transform_1(%arg0: i32, %arg1: i32, %arg2: i32) -> (i32, i32) {
    %c0_i32 = arith.constant 0 : i32
    return %arg2, %arg1 : i32, i32
  }
  func.func @transform_2(%arg0: i32, %arg1: i32, %arg2: i32) -> (i32, i32) {
    %c0_i32 = arith.constant 0 : i32
    %c0_i32_0 = arith.constant 0 : i32
    return %c0_i32, %arg1 : i32, i32
  }
  func.func @transform_3(%arg0: i32, %arg1: i32, %arg2: i32) -> (i32, i32) {
    %c0_i32 = arith.constant 0 : i32
    return %arg0, %arg1 : i32, i32
  }
}

module attributes {stable_mosaic.version = 11 : i64} {
  func.func @_matmul_kernel(%arg0: i32, %arg1: i32, %arg2: i32, %arg3: memref<32x64xbf16, #tpu.memory_space<vmem>>, %arg4: memref<64x256xbf16, #tpu.memory_space<vmem>>, %arg5: memref<1x256xf32, #tpu.memory_space<vmem>>, %arg6: memref<32x256xbf16, #tpu.memory_space<vmem>>, %arg7: memref<32x256xf32, #tpu.memory_space<vmem>>) attributes {dimension_semantics = [#tpu.dimension_semantics<parallel>, #tpu.dimension_semantics<parallel>, #tpu.dimension_semantics<arbitrary>], iteration_bounds = array<i64: 1, 1, 1>, scalar_prefetch = 0 : i64, scratch_operands = 1 : i64, tpu.core_type = #tpu.core_type<tc>, window_params = [{transform_indices = @transform_0, window_bounds = array<i64: 32, 64>}, {transform_indices = @transform_1, window_bounds = array<i64: 64, 256>}, {transform_indices = @transform_2, window_bounds = array<i64: 1, 256>}, {transform_indices = @transform_3, window_bounds = array<i64: 32, 256>}]} {
    %c0_i32 = arith.constant 0 : i32
    %0 = arith.cmpi eq, %arg2, %c0_i32 : i32
    %1 = arith.extui %0 : i1 to i32
    %c0_i32_0 = arith.constant 0 : i32
    %2 = arith.cmpi ne, %1, %c0_i32_0 : i32
    scf.if %2 {
      %cst_10 = arith.constant 0.000000e+00 : f32
      %12 = vector.broadcast %cst_10 : f32 to vector<32x256xf32>
      %c0_11 = arith.constant 0 : index
      %c0_12 = arith.constant 0 : index
      %13 = vector.load %arg7[%c0_11, %c0_12] : memref<32x256xf32, #tpu.memory_space<vmem>>, vector<32x256xf32>
      tpu.vector_store %arg7[%c0_11, %c0_12], %12 {strides = array<i32>} : memref<32x256xf32, #tpu.memory_space<vmem>>, vector<32x256xf32>,
    } else {
    }
    %c0 = arith.constant 0 : index
    %c0_1 = arith.constant 0 : index
    %3 = vector.load %arg7[%c0, %c0_1] : memref<32x256xf32, #tpu.memory_space<vmem>>, vector<32x256xf32>
    %c0_2 = arith.constant 0 : index
    %c0_3 = arith.constant 0 : index
    %4 = vector.load %arg3[%c0_2, %c0_3] : memref<32x64xbf16, #tpu.memory_space<vmem>>, vector<32x64xbf16>
    %c0_4 = arith.constant 0 : index
    %c0_5 = arith.constant 0 : index
    %5 = vector.load %arg4[%c0_4, %c0_5] : memref<64x256xbf16, #tpu.memory_space<vmem>>, vector<64x256xbf16>
    %cst = arith.constant dense<0.000000e+00> : vector<32x256xf32>
    %6 = tpu.matmul %4, %5, %cst {dimension_numbers = #tpu.dot_dimension_numbers<[1], [0], [0], [1], [0, 0, 1, 1], [], []>} : vector<32x64xbf16>, vector<64x256xbf16>, vector<32x256xf32> -> vector<32x256xf32>
    %7 = arith.addf %3, %6 : vector<32x256xf32>
    %c0_6 = arith.constant 0 : index
    %c0_7 = arith.constant 0 : index
    %8 = vector.load %arg7[%c0_6, %c0_7] : memref<32x256xf32, #tpu.memory_space<vmem>>, vector<32x256xf32>
    tpu.vector_store %arg7[%c0_6, %c0_7], %7 {strides = array<i32>} : memref<32x256xf32, #tpu.memory_space<vmem>>, vector<32x256xf32>,
    %c0_i32_8 = arith.constant 0 : i32
    %9 = arith.cmpi eq, %arg2, %c0_i32_8 : i32
    %10 = arith.extui %9 : i1 to i32
    %c0_i32_9 = arith.constant 0 : i32
    %11 = arith.cmpi ne, %10, %c0_i32_9 : i32
    scf.if %11 {
      %c0_10 = arith.constant 0 : index
      %c0_11 = arith.constant 0 : index
      %12 = vector.load %arg7[%c0_10, %c0_11] : memref<32x256xf32, #tpu.memory_space<vmem>>, vector<32x256xf32>
      %c0_12 = arith.constant 0 : index
      %c0_13 = arith.constant 0 : index
      %13 = vector.load %arg5[%c0_12, %c0_13] : memref<1x256xf32, #tpu.memory_space<vmem>>, vector<1x256xf32>
      %14 = vector.broadcast %13 : vector<1x256xf32> to vector<32x256xf32>
      %15 = arith.addf %12, %14 : vector<32x256xf32>
      %16 = arith.truncf %15 : vector<32x256xf32> to vector<32x256xbf16>
      %c0_14 = arith.constant 0 : index
      %c0_15 = arith.constant 0 : index
      %17 = vector.load %arg6[%c0_14, %c0_15] : memref<32x256xbf16, #tpu.memory_space<vmem>>, vector<32x256xbf16>
      tpu.vector_store %arg6[%c0_14, %c0_15], %16 {strides = array<i32>} : memref<32x256xbf16, #tpu.memory_space<vmem>>, vector<32x256xbf16>,
    } else {
    }
    return
  }
  func.func @transform_0(%arg0: i32, %arg1: i32, %arg2: i32) -> (i32, i32) {
    %c0_i32 = arith.constant 0 : i32
    return %arg0, %arg2 : i32, i32
  }
  func.func @transform_1(%arg0: i32, %arg1: i32, %arg2: i32) -> (i32, i32) {
    %c0_i32 = arith.constant 0 : i32
    return %arg2, %arg1 : i32, i32
  }
  func.func @transform_2(%arg0: i32, %arg1: i32, %arg2: i32) -> (i32, i32) {
    %c0_i32 = arith.constant 0 : i32
    %c0_i32_0 = arith.constant 0 : i32
    return %c0_i32, %arg1 : i32, i32
  }
  func.func @transform_3(%arg0: i32, %arg1: i32, %arg2: i32) -> (i32, i32) {
    %c0_i32 = arith.constant 0 : i32
    return %arg0, %arg1 : i32, i32
  }
}

module attributes {stable_mosaic.version = 11 : i64} {
  func.func @_matmul_kernel(%arg0: i32, %arg1: i32, %arg2: i32, %arg3: memref<32x128xbf16, #tpu.memory_space<vmem>>, %arg4: memref<128x256xbf16, #tpu.memory_space<vmem>>, %arg5: memref<1x256xf32, #tpu.memory_space<vmem>>, %arg6: memref<32x256xbf16, #tpu.memory_space<vmem>>, %arg7: memref<32x256xbf16, #tpu.memory_space<vmem>>, %arg8: memref<32x256xf32, #tpu.memory_space<vmem>>) attributes {dimension_semantics = [#tpu.dimension_semantics<parallel>, #tpu.dimension_semantics<parallel>, #tpu.dimension_semantics<arbitrary>], iteration_bounds = array<i64: 1, 1, 1>, scalar_prefetch = 0 : i64, scratch_operands = 1 : i64, tpu.core_type = #tpu.core_type<tc>, window_params = [{transform_indices = @transform_0, window_bounds = array<i64: 32, 128>}, {transform_indices = @transform_1, window_bounds = array<i64: 128, 256>}, {transform_indices = @transform_2, window_bounds = array<i64: 1, 256>}, {transform_indices = @transform_3, window_bounds = array<i64: 32, 256>}, {transform_indices = @transform_4, window_bounds = array<i64: 32, 256>}]} {
    %c0_i32 = arith.constant 0 : i32
    %0 = arith.cmpi eq, %arg2, %c0_i32 : i32
    %1 = arith.extui %0 : i1 to i32
    %c0_i32_0 = arith.constant 0 : i32
    %2 = arith.cmpi ne, %1, %c0_i32_0 : i32
    scf.if %2 {
      %cst_10 = arith.constant 0.000000e+00 : f32
      %12 = vector.broadcast %cst_10 : f32 to vector<32x256xf32>
      %c0_11 = arith.constant 0 : index
      %c0_12 = arith.constant 0 : index
      %13 = vector.load %arg8[%c0_11, %c0_12] : memref<32x256xf32, #tpu.memory_space<vmem>>, vector<32x256xf32>
      tpu.vector_store %arg8[%c0_11, %c0_12], %12 {strides = array<i32>} : memref<32x256xf32, #tpu.memory_space<vmem>>, vector<32x256xf32>,
    } else {
    }
    %c0 = arith.constant 0 : index
    %c0_1 = arith.constant 0 : index
    %3 = vector.load %arg8[%c0, %c0_1] : memref<32x256xf32, #tpu.memory_space<vmem>>, vector<32x256xf32>
    %c0_2 = arith.constant 0 : index
    %c0_3 = arith.constant 0 : index
    %4 = vector.load %arg3[%c0_2, %c0_3] : memref<32x128xbf16, #tpu.memory_space<vmem>>, vector<32x128xbf16>
    %c0_4 = arith.constant 0 : index
    %c0_5 = arith.constant 0 : index
    %5 = vector.load %arg4[%c0_4, %c0_5] : memref<128x256xbf16, #tpu.memory_space<vmem>>, vector<128x256xbf16>
    %cst = arith.constant dense<0.000000e+00> : vector<32x256xf32>
    %6 = tpu.matmul %4, %5, %cst {dimension_numbers = #tpu.dot_dimension_numbers<[1], [0], [0], [1], [0, 0, 1, 1], [], []>} : vector<32x128xbf16>, vector<128x256xbf16>, vector<32x256xf32> -> vector<32x256xf32>
    %7 = arith.addf %3, %6 : vector<32x256xf32>
    %c0_6 = arith.constant 0 : index
    %c0_7 = arith.constant 0 : index
    %8 = vector.load %arg8[%c0_6, %c0_7] : memref<32x256xf32, #tpu.memory_space<vmem>>, vector<32x256xf32>
    tpu.vector_store %arg8[%c0_6, %c0_7], %7 {strides = array<i32>} : memref<32x256xf32, #tpu.memory_space<vmem>>, vector<32x256xf32>,
    %c0_i32_8 = arith.constant 0 : i32
    %9 = arith.cmpi eq, %arg2, %c0_i32_8 : i32
    %10 = arith.extui %9 : i1 to i32
    %c0_i32_9 = arith.constant 0 : i32
    %11 = arith.cmpi ne, %10, %c0_i32_9 : i32
    scf.if %11 {
      %c0_10 = arith.constant 0 : index
      %c0_11 = arith.constant 0 : index
      %12 = vector.load %arg8[%c0_10, %c0_11] : memref<32x256xf32, #tpu.memory_space<vmem>>, vector<32x256xf32>
      %c0_12 = arith.constant 0 : index
      %c0_13 = arith.constant 0 : index
      %13 = vector.load %arg5[%c0_12, %c0_13] : memref<1x256xf32, #tpu.memory_space<vmem>>, vector<1x256xf32>
      %14 = vector.broadcast %13 : vector<1x256xf32> to vector<32x256xf32>
      %15 = arith.addf %12, %14 : vector<32x256xf32>
      %c0_14 = arith.constant 0 : index
      %c0_15 = arith.constant 0 : index
      %16 = vector.load %arg6[%c0_14, %c0_15] : memref<32x256xbf16, #tpu.memory_space<vmem>>, vector<32x256xbf16>
      %17 = arith.extf %16 : vector<32x256xbf16> to vector<32x256xf32>
      %18 = arith.addf %15, %17 : vector<32x256xf32>
      %cst_16 = arith.constant 0.000000e+00 : f32
      %19 = vector.broadcast %cst_16 : f32 to vector<32x256xf32>
      %20 = arith.maximumf %18, %19 : vector<32x256xf32>
      %21 = arith.truncf %20 : vector<32x256xf32> to vector<32x256xbf16>
      %c0_17 = arith.constant 0 : index
      %c0_18 = arith.constant 0 : index
      %22 = vector.load %arg7[%c0_17, %c0_18] : memref<32x256xbf16, #tpu.memory_space<vmem>>, vector<32x256xbf16>
      tpu.vector_store %arg7[%c0_17, %c0_18], %21 {strides = array<i32>} : memref<32x256xbf16, #tpu.memory_space<vmem>>, vector<32x256xbf16>,
    } else {
    }
    return
  }
  func.func @transform_0(%arg0: i32, %arg1: i32, %arg2: i32) -> (i32, i32) {
    %c0_i32 = arith.constant 0 : i32
    return %arg0, %arg2 : i32, i32
  }
  func.func @transform_1(%arg0: i32, %arg1: i32, %arg2: i32) -> (i32, i32) {
    %c0_i32 = arith.constant 0 : i32
    return %arg2, %arg1 : i32, i32
  }
  func.func @transform_2(%arg0: i32, %arg1: i32, %arg2: i32) -> (i32, i32) {
    %c0_i32 = arith.constant 0 : i32
    %c0_i32_0 = arith.constant 0 : i32
    return %c0_i32, %arg1 : i32, i32
  }
  func.func @transform_3(%arg0: i32, %arg1: i32, %arg2: i32) -> (i32, i32) {
    %c0_i32 = arith.constant 0 : i32
    return %arg0, %arg1 : i32, i32
  }
  func.func @transform_4(%arg0: i32, %arg1: i32, %arg2: i32) -> (i32, i32) {
    %c0_i32 = arith.constant 0 : i32
    return %arg0, %arg1 : i32, i32
  }
}

module attributes {stable_mosaic.version = 11 : i64} {
  func.func @_matmul_kernel(%arg0: i32, %arg1: i32, %arg2: i32, %arg3: memref<32x256xbf16, #tpu.memory_space<vmem>>, %arg4: memref<256x128xbf16, #tpu.memory_space<vmem>>, %arg5: memref<1x128xf32, #tpu.memory_space<vmem>>, %arg6: memref<32x128xbf16, #tpu.memory_space<vmem>>, %arg7: memref<32x128xf32, #tpu.memory_space<vmem>>) attributes {dimension_semantics = [#tpu.dimension_semantics<parallel>, #tpu.dimension_semantics<parallel>, #tpu.dimension_semantics<arbitrary>], iteration_bounds = array<i64: 1, 1, 1>, scalar_prefetch = 0 : i64, scratch_operands = 1 : i64, tpu.core_type = #tpu.core_type<tc>, window_params = [{transform_indices = @transform_0, window_bounds = array<i64: 32, 256>}, {transform_indices = @transform_1, window_bounds = array<i64: 256, 128>}, {transform_indices = @transform_2, window_bounds = array<i64: 1, 128>}, {transform_indices = @transform_3, window_bounds = array<i64: 32, 128>}]} {
    %c0_i32 = arith.constant 0 : i32
    %0 = arith.cmpi eq, %arg2, %c0_i32 : i32
    %1 = arith.extui %0 : i1 to i32
    %c0_i32_0 = arith.constant 0 : i32
    %2 = arith.cmpi ne, %1, %c0_i32_0 : i32
    scf.if %2 {
      %cst_10 = arith.constant 0.000000e+00 : f32
      %12 = vector.broadcast %cst_10 : f32 to vector<32x128xf32>
      %c0_11 = arith.constant 0 : index
      %c0_12 = arith.constant 0 : index
      %13 = vector.load %arg7[%c0_11, %c0_12] : memref<32x128xf32, #tpu.memory_space<vmem>>, vector<32x128xf32>
      tpu.vector_store %arg7[%c0_11, %c0_12], %12 {strides = array<i32>} : memref<32x128xf32, #tpu.memory_space<vmem>>, vector<32x128xf32>,
    } else {
    }
    %c0 = arith.constant 0 : index
    %c0_1 = arith.constant 0 : index
    %3 = vector.load %arg7[%c0, %c0_1] : memref<32x128xf32, #tpu.memory_space<vmem>>, vector<32x128xf32>
    %c0_2 = arith.constant 0 : index
    %c0_3 = arith.constant 0 : index
    %4 = vector.load %arg3[%c0_2, %c0_3] : memref<32x256xbf16, #tpu.memory_space<vmem>>, vector<32x256xbf16>
    %c0_4 = arith.constant 0 : index
    %c0_5 = arith.constant 0 : index
    %5 = vector.load %arg4[%c0_4, %c0_5] : memref<256x128xbf16, #tpu.memory_space<vmem>>, vector<256x128xbf16>
    %cst = arith.constant dense<0.000000e+00> : vector<32x128xf32>
    %6 = tpu.matmul %4, %5, %cst {dimension_numbers = #tpu.dot_dimension_numbers<[1], [0], [0], [1], [0, 0, 1, 1], [], []>} : vector<32x256xbf16>, vector<256x128xbf16>, vector<32x128xf32> -> vector<32x128xf32>
    %7 = arith.addf %3, %6 : vector<32x128xf32>
    %c0_6 = arith.constant 0 : index
    %c0_7 = arith.constant 0 : index
    %8 = vector.load %arg7[%c0_6, %c0_7] : memref<32x128xf32, #tpu.memory_space<vmem>>, vector<32x128xf32>
    tpu.vector_store %arg7[%c0_6, %c0_7], %7 {strides = array<i32>} : memref<32x128xf32, #tpu.memory_space<vmem>>, vector<32x128xf32>,
    %c0_i32_8 = arith.constant 0 : i32
    %9 = arith.cmpi eq, %arg2, %c0_i32_8 : i32
    %10 = arith.extui %9 : i1 to i32
    %c0_i32_9 = arith.constant 0 : i32
    %11 = arith.cmpi ne, %10, %c0_i32_9 : i32
    scf.if %11 {
      %c0_10 = arith.constant 0 : index
      %c0_11 = arith.constant 0 : index
      %12 = vector.load %arg7[%c0_10, %c0_11] : memref<32x128xf32, #tpu.memory_space<vmem>>, vector<32x128xf32>
      %c0_12 = arith.constant 0 : index
      %c0_13 = arith.constant 0 : index
      %13 = vector.load %arg5[%c0_12, %c0_13] : memref<1x128xf32, #tpu.memory_space<vmem>>, vector<1x128xf32>
      %14 = vector.broadcast %13 : vector<1x128xf32> to vector<32x128xf32>
      %15 = arith.addf %12, %14 : vector<32x128xf32>
      %cst_14 = arith.constant 0.000000e+00 : f32
      %16 = vector.broadcast %cst_14 : f32 to vector<32x128xf32>
      %17 = arith.maximumf %15, %16 : vector<32x128xf32>
      %18 = arith.truncf %17 : vector<32x128xf32> to vector<32x128xbf16>
      %c0_15 = arith.constant 0 : index
      %c0_16 = arith.constant 0 : index
      %19 = vector.load %arg6[%c0_15, %c0_16] : memref<32x128xbf16, #tpu.memory_space<vmem>>, vector<32x128xbf16>
      tpu.vector_store %arg6[%c0_15, %c0_16], %18 {strides = array<i32>} : memref<32x128xbf16, #tpu.memory_space<vmem>>, vector<32x128xbf16>,
    } else {
    }
    return
  }
  func.func @transform_0(%arg0: i32, %arg1: i32, %arg2: i32) -> (i32, i32) {
    %c0_i32 = arith.constant 0 : i32
    return %arg0, %arg2 : i32, i32
  }
  func.func @transform_1(%arg0: i32, %arg1: i32, %arg2: i32) -> (i32, i32) {
    %c0_i32 = arith.constant 0 : i32
    return %arg2, %arg1 : i32, i32
  }
  func.func @transform_2(%arg0: i32, %arg1: i32, %arg2: i32) -> (i32, i32) {
    %c0_i32 = arith.constant 0 : i32
    %c0_i32_0 = arith.constant 0 : i32
    return %c0_i32, %arg1 : i32, i32
  }
  func.func @transform_3(%arg0: i32, %arg1: i32, %arg2: i32) -> (i32, i32) {
    %c0_i32 = arith.constant 0 : i32
    return %arg0, %arg1 : i32, i32
  }
}

module attributes {stable_mosaic.version = 11 : i64} {
  func.func @_matmul_kernel(%arg0: i32, %arg1: i32, %arg2: i32, %arg3: memref<32x256xbf16, #tpu.memory_space<vmem>>, %arg4: memref<256x256xbf16, #tpu.memory_space<vmem>>, %arg5: memref<1x256xf32, #tpu.memory_space<vmem>>, %arg6: memref<32x256xbf16, #tpu.memory_space<vmem>>, %arg7: memref<32x256xf32, #tpu.memory_space<vmem>>) attributes {dimension_semantics = [#tpu.dimension_semantics<parallel>, #tpu.dimension_semantics<parallel>, #tpu.dimension_semantics<arbitrary>], iteration_bounds = array<i64: 1, 1, 1>, scalar_prefetch = 0 : i64, scratch_operands = 1 : i64, tpu.core_type = #tpu.core_type<tc>, window_params = [{transform_indices = @transform_0, window_bounds = array<i64: 32, 256>}, {transform_indices = @transform_1, window_bounds = array<i64: 256, 256>}, {transform_indices = @transform_2, window_bounds = array<i64: 1, 256>}, {transform_indices = @transform_3, window_bounds = array<i64: 32, 256>}]} {
    %c0_i32 = arith.constant 0 : i32
    %0 = arith.cmpi eq, %arg2, %c0_i32 : i32
    %1 = arith.extui %0 : i1 to i32
    %c0_i32_0 = arith.constant 0 : i32
    %2 = arith.cmpi ne, %1, %c0_i32_0 : i32
    scf.if %2 {
      %cst_10 = arith.constant 0.000000e+00 : f32
      %12 = vector.broadcast %cst_10 : f32 to vector<32x256xf32>
      %c0_11 = arith.constant 0 : index
      %c0_12 = arith.constant 0 : index
      %13 = vector.load %arg7[%c0_11, %c0_12] : memref<32x256xf32, #tpu.memory_space<vmem>>, vector<32x256xf32>
      tpu.vector_store %arg7[%c0_11, %c0_12], %12 {strides = array<i32>} : memref<32x256xf32, #tpu.memory_space<vmem>>, vector<32x256xf32>,
    } else {
    }
    %c0 = arith.constant 0 : index
    %c0_1 = arith.constant 0 : index
    %3 = vector.load %arg7[%c0, %c0_1] : memref<32x256xf32, #tpu.memory_space<vmem>>, vector<32x256xf32>
    %c0_2 = arith.constant 0 : index
    %c0_3 = arith.constant 0 : index
    %4 = vector.load %arg3[%c0_2, %c0_3] : memref<32x256xbf16, #tpu.memory_space<vmem>>, vector<32x256xbf16>
    %c0_4 = arith.constant 0 : index
    %c0_5 = arith.constant 0 : index
    %5 = vector.load %arg4[%c0_4, %c0_5] : memref<256x256xbf16, #tpu.memory_space<vmem>>, vector<256x256xbf16>
    %cst = arith.constant dense<0.000000e+00> : vector<32x256xf32>
    %6 = tpu.matmul %4, %5, %cst {dimension_numbers = #tpu.dot_dimension_numbers<[1], [0], [0], [1], [0, 0, 1, 1], [], []>} : vector<32x256xbf16>, vector<256x256xbf16>, vector<32x256xf32> -> vector<32x256xf32>
    %7 = arith.addf %3, %6 : vector<32x256xf32>
    %c0_6 = arith.constant 0 : index
    %c0_7 = arith.constant 0 : index
    %8 = vector.load %arg7[%c0_6, %c0_7] : memref<32x256xf32, #tpu.memory_space<vmem>>, vector<32x256xf32>
    tpu.vector_store %arg7[%c0_6, %c0_7], %7 {strides = array<i32>} : memref<32x256xf32, #tpu.memory_space<vmem>>, vector<32x256xf32>,
    %c0_i32_8 = arith.constant 0 : i32
    %9 = arith.cmpi eq, %arg2, %c0_i32_8 : i32
    %10 = arith.extui %9 : i1 to i32
    %c0_i32_9 = arith.constant 0 : i32
    %11 = arith.cmpi ne, %10, %c0_i32_9 : i32
    scf.if %11 {
      %c0_10 = arith.constant 0 : index
      %c0_11 = arith.constant 0 : index
      %12 = vector.load %arg7[%c0_10, %c0_11] : memref<32x256xf32, #tpu.memory_space<vmem>>, vector<32x256xf32>
      %c0_12 = arith.constant 0 : index
      %c0_13 = arith.constant 0 : index
      %13 = vector.load %arg5[%c0_12, %c0_13] : memref<1x256xf32, #tpu.memory_space<vmem>>, vector<1x256xf32>
      %14 = vector.broadcast %13 : vector<1x256xf32> to vector<32x256xf32>
      %15 = arith.addf %12, %14 : vector<32x256xf32>
      %cst_14 = arith.constant 0.000000e+00 : f32
      %16 = vector.broadcast %cst_14 : f32 to vector<32x256xf32>
      %17 = arith.maximumf %15, %16 : vector<32x256xf32>
      %18 = arith.truncf %17 : vector<32x256xf32> to vector<32x256xbf16>
      %c0_15 = arith.constant 0 : index
      %c0_16 = arith.constant 0 : index
      %19 = vector.load %arg6[%c0_15, %c0_16] : memref<32x256xbf16, #tpu.memory_space<vmem>>, vector<32x256xbf16>
      tpu.vector_store %arg6[%c0_15, %c0_16], %18 {strides = array<i32>} : memref<32x256xbf16, #tpu.memory_space<vmem>>, vector<32x256xbf16>,
    } else {
    }
    return
  }
  func.func @transform_0(%arg0: i32, %arg1: i32, %arg2: i32) -> (i32, i32) {
    %c0_i32 = arith.constant 0 : i32
    return %arg0, %arg2 : i32, i32
  }
  func.func @transform_1(%arg0: i32, %arg1: i32, %arg2: i32) -> (i32, i32) {
    %c0_i32 = arith.constant 0 : i32
    return %arg2, %arg1 : i32, i32
  }
  func.func @transform_2(%arg0: i32, %arg1: i32, %arg2: i32) -> (i32, i32) {
    %c0_i32 = arith.constant 0 : i32
    %c0_i32_0 = arith.constant 0 : i32
    return %c0_i32, %arg1 : i32, i32
  }
  func.func @transform_3(%arg0: i32, %arg1: i32, %arg2: i32) -> (i32, i32) {
    %c0_i32 = arith.constant 0 : i32
    return %arg0, %arg1 : i32, i32
  }
}

module attributes {stable_mosaic.version = 11 : i64} {
  func.func @_matmul_kernel(%arg0: i32, %arg1: i32, %arg2: i32, %arg3: memref<8x768xbf16, #tpu.memory_space<vmem>>, %arg4: memref<768x256xbf16, #tpu.memory_space<vmem>>, %arg5: memref<1x256xf32, #tpu.memory_space<vmem>>, %arg6: memref<8x256xbf16, #tpu.memory_space<vmem>>, %arg7: memref<8x256xf32, #tpu.memory_space<vmem>>) attributes {dimension_semantics = [#tpu.dimension_semantics<parallel>, #tpu.dimension_semantics<parallel>, #tpu.dimension_semantics<arbitrary>], iteration_bounds = array<i64: 1, 1, 3>, scalar_prefetch = 0 : i64, scratch_operands = 1 : i64, tpu.core_type = #tpu.core_type<tc>, window_params = [{transform_indices = @transform_0, window_bounds = array<i64: 8, 768>}, {transform_indices = @transform_1, window_bounds = array<i64: 768, 256>}, {transform_indices = @transform_2, window_bounds = array<i64: 1, 256>}, {transform_indices = @transform_3, window_bounds = array<i64: 8, 256>}]} {
    %c0_i32 = arith.constant 0 : i32
    %0 = arith.cmpi eq, %arg2, %c0_i32 : i32
    %1 = arith.extui %0 : i1 to i32
    %c0_i32_0 = arith.constant 0 : i32
    %2 = arith.cmpi ne, %1, %c0_i32_0 : i32
    scf.if %2 {
      %cst_9 = arith.constant 0.000000e+00 : f32
      %12 = vector.broadcast %cst_9 : f32 to vector<8x256xf32>
      %c0_10 = arith.constant 0 : index
      %c0_11 = arith.constant 0 : index
      %13 = vector.load %arg7[%c0_10, %c0_11] : memref<8x256xf32, #tpu.memory_space<vmem>>, vector<8x256xf32>
      tpu.vector_store %arg7[%c0_10, %c0_11], %12 {strides = array<i32>} : memref<8x256xf32, #tpu.memory_space<vmem>>, vector<8x256xf32>,
    } else {
    }
    %c0 = arith.constant 0 : index
    %c0_1 = arith.constant 0 : index
    %3 = vector.load %arg7[%c0, %c0_1] : memref<8x256xf32, #tpu.memory_space<vmem>>, vector<8x256xf32>
    %c0_2 = arith.constant 0 : index
    %c0_3 = arith.constant 0 : index
    %4 = vector.load %arg3[%c0_2, %c0_3] : memref<8x768xbf16, #tpu.memory_space<vmem>>, vector<8x768xbf16>
    %c0_4 = arith.constant 0 : index
    %c0_5 = arith.constant 0 : index
    %5 = vector.load %arg4[%c0_4, %c0_5] : memref<768x256xbf16, #tpu.memory_space<vmem>>, vector<768x256xbf16>
    %cst = arith.constant dense<0.000000e+00> : vector<8x256xf32>
    %6 = tpu.matmul %4, %5, %cst {dimension_numbers = #tpu.dot_dimension_numbers<[1], [0], [0], [1], [0, 0, 1, 1], [], []>} : vector<8x768xbf16>, vector<768x256xbf16>, vector<8x256xf32> -> vector<8x256xf32>
    %7 = arith.addf %3, %6 : vector<8x256xf32>
    %c0_6 = arith.constant 0 : index
    %c0_7 = arith.constant 0 : index
    %8 = vector.load %arg7[%c0_6, %c0_7] : memref<8x256xf32, #tpu.memory_space<vmem>>, vector<8x256xf32>
    tpu.vector_store %arg7[%c0_6, %c0_7], %7 {strides = array<i32>} : memref<8x256xf32, #tpu.memory_space<vmem>>, vector<8x256xf32>,
    %c2_i32 = arith.constant 2 : i32
    %9 = arith.cmpi eq, %arg2, %c2_i32 : i32
    %10 = arith.extui %9 : i1 to i32
    %c0_i32_8 = arith.constant 0 : i32
    %11 = arith.cmpi ne, %10, %c0_i32_8 : i32
    scf.if %11 {
      %c0_9 = arith.constant 0 : index
      %c0_10 = arith.constant 0 : index
      %12 = vector.load %arg7[%c0_9, %c0_10] : memref<8x256xf32, #tpu.memory_space<vmem>>, vector<8x256xf32>
      %c0_11 = arith.constant 0 : index
      %c0_12 = arith.constant 0 : index
      %13 = vector.load %arg5[%c0_11, %c0_12] : memref<1x256xf32, #tpu.memory_space<vmem>>, vector<1x256xf32>
      %14 = vector.broadcast %13 : vector<1x256xf32> to vector<8x256xf32>
      %15 = arith.addf %12, %14 : vector<8x256xf32>
      %cst_13 = arith.constant 0.000000e+00 : f32
      %16 = vector.broadcast %cst_13 : f32 to vector<8x256xf32>
      %17 = arith.maximumf %15, %16 : vector<8x256xf32>
      %18 = arith.truncf %17 : vector<8x256xf32> to vector<8x256xbf16>
      %c0_14 = arith.constant 0 : index
      %c0_15 = arith.constant 0 : index
      %19 = vector.load %arg6[%c0_14, %c0_15] : memref<8x256xbf16, #tpu.memory_space<vmem>>, vector<8x256xbf16>
      tpu.vector_store %arg6[%c0_14, %c0_15], %18 {strides = array<i32>} : memref<8x256xbf16, #tpu.memory_space<vmem>>, vector<8x256xbf16>,
    } else {
    }
    return
  }
  func.func @transform_0(%arg0: i32, %arg1: i32, %arg2: i32) -> (i32, i32) {
    %c0_i32 = arith.constant 0 : i32
    return %arg0, %arg2 : i32, i32
  }
  func.func @transform_1(%arg0: i32, %arg1: i32, %arg2: i32) -> (i32, i32) {
    %c0_i32 = arith.constant 0 : i32
    return %arg2, %arg1 : i32, i32
  }
  func.func @transform_2(%arg0: i32, %arg1: i32, %arg2: i32) -> (i32, i32) {
    %c0_i32 = arith.constant 0 : i32
    %c0_i32_0 = arith.constant 0 : i32
    return %c0_i32, %arg1 : i32, i32
  }
  func.func @transform_3(%arg0: i32, %arg1: i32, %arg2: i32) -> (i32, i32) {
    %c0_i32 = arith.constant 0 : i32
    return %arg0, %arg1 : i32, i32
  }
}

module attributes {stable_mosaic.version = 11 : i64} {
  func.func @_matmul_kernel(%arg0: i32, %arg1: i32, %arg2: i32, %arg3: memref<8x256xbf16, #tpu.memory_space<vmem>>, %arg4: memref<256x256xbf16, #tpu.memory_space<vmem>>, %arg5: memref<1x256xf32, #tpu.memory_space<vmem>>, %arg6: memref<8x256xbf16, #tpu.memory_space<vmem>>, %arg7: memref<8x256xbf16, #tpu.memory_space<vmem>>, %arg8: memref<8x256xf32, #tpu.memory_space<vmem>>) attributes {dimension_semantics = [#tpu.dimension_semantics<parallel>, #tpu.dimension_semantics<parallel>, #tpu.dimension_semantics<arbitrary>], iteration_bounds = array<i64: 1, 2, 1>, scalar_prefetch = 0 : i64, scratch_operands = 1 : i64, tpu.core_type = #tpu.core_type<tc>, window_params = [{transform_indices = @transform_0, window_bounds = array<i64: 8, 256>}, {transform_indices = @transform_1, window_bounds = array<i64: 256, 256>}, {transform_indices = @transform_2, window_bounds = array<i64: 1, 256>}, {transform_indices = @transform_3, window_bounds = array<i64: 8, 256>}, {transform_indices = @transform_4, window_bounds = array<i64: 8, 256>}]} {
    %c0_i32 = arith.constant 0 : i32
    %0 = arith.cmpi eq, %arg2, %c0_i32 : i32
    %1 = arith.extui %0 : i1 to i32
    %c0_i32_0 = arith.constant 0 : i32
    %2 = arith.cmpi ne, %1, %c0_i32_0 : i32
    scf.if %2 {
      %cst_10 = arith.constant 0.000000e+00 : f32
      %12 = vector.broadcast %cst_10 : f32 to vector<8x256xf32>
      %c0_11 = arith.constant 0 : index
      %c0_12 = arith.constant 0 : index
      %13 = vector.load %arg8[%c0_11, %c0_12] : memref<8x256xf32, #tpu.memory_space<vmem>>, vector<8x256xf32>
      tpu.vector_store %arg8[%c0_11, %c0_12], %12 {strides = array<i32>} : memref<8x256xf32, #tpu.memory_space<vmem>>, vector<8x256xf32>,
    } else {
    }
    %c0 = arith.constant 0 : index
    %c0_1 = arith.constant 0 : index
    %3 = vector.load %arg8[%c0, %c0_1] : memref<8x256xf32, #tpu.memory_space<vmem>>, vector<8x256xf32>
    %c0_2 = arith.constant 0 : index
    %c0_3 = arith.constant 0 : index
    %4 = vector.load %arg3[%c0_2, %c0_3] : memref<8x256xbf16, #tpu.memory_space<vmem>>, vector<8x256xbf16>
    %c0_4 = arith.constant 0 : index
    %c0_5 = arith.constant 0 : index
    %5 = vector.load %arg4[%c0_4, %c0_5] : memref<256x256xbf16, #tpu.memory_space<vmem>>, vector<256x256xbf16>
    %cst = arith.constant dense<0.000000e+00> : vector<8x256xf32>
    %6 = tpu.matmul %4, %5, %cst {dimension_numbers = #tpu.dot_dimension_numbers<[1], [0], [0], [1], [0, 0, 1, 1], [], []>} : vector<8x256xbf16>, vector<256x256xbf16>, vector<8x256xf32> -> vector<8x256xf32>
    %7 = arith.addf %3, %6 : vector<8x256xf32>
    %c0_6 = arith.constant 0 : index
    %c0_7 = arith.constant 0 : index
    %8 = vector.load %arg8[%c0_6, %c0_7] : memref<8x256xf32, #tpu.memory_space<vmem>>, vector<8x256xf32>
    tpu.vector_store %arg8[%c0_6, %c0_7], %7 {strides = array<i32>} : memref<8x256xf32, #tpu.memory_space<vmem>>, vector<8x256xf32>,
    %c0_i32_8 = arith.constant 0 : i32
    %9 = arith.cmpi eq, %arg2, %c0_i32_8 : i32
    %10 = arith.extui %9 : i1 to i32
    %c0_i32_9 = arith.constant 0 : i32
    %11 = arith.cmpi ne, %10, %c0_i32_9 : i32
    scf.if %11 {
      %c0_10 = arith.constant 0 : index
      %c0_11 = arith.constant 0 : index
      %12 = vector.load %arg8[%c0_10, %c0_11] : memref<8x256xf32, #tpu.memory_space<vmem>>, vector<8x256xf32>
      %c0_12 = arith.constant 0 : index
      %c0_13 = arith.constant 0 : index
      %13 = vector.load %arg5[%c0_12, %c0_13] : memref<1x256xf32, #tpu.memory_space<vmem>>, vector<1x256xf32>
      %14 = vector.broadcast %13 : vector<1x256xf32> to vector<8x256xf32>
      %15 = arith.addf %12, %14 : vector<8x256xf32>
      %c0_14 = arith.constant 0 : index
      %c0_15 = arith.constant 0 : index
      %16 = vector.load %arg6[%c0_14, %c0_15] : memref<8x256xbf16, #tpu.memory_space<vmem>>, vector<8x256xbf16>
      %17 = arith.extf %16 : vector<8x256xbf16> to vector<8x256xf32>
      %18 = arith.addf %15, %17 : vector<8x256xf32>
      %cst_16 = arith.constant 0.000000e+00 : f32
      %19 = vector.broadcast %cst_16 : f32 to vector<8x256xf32>
      %20 = arith.maximumf %18, %19 : vector<8x256xf32>
      %21 = arith.truncf %20 : vector<8x256xf32> to vector<8x256xbf16>
      %c0_17 = arith.constant 0 : index
      %c0_18 = arith.constant 0 : index
      %22 = vector.load %arg7[%c0_17, %c0_18] : memref<8x256xbf16, #tpu.memory_space<vmem>>, vector<8x256xbf16>
      tpu.vector_store %arg7[%c0_17, %c0_18], %21 {strides = array<i32>} : memref<8x256xbf16, #tpu.memory_space<vmem>>, vector<8x256xbf16>,
    } else {
    }
    return
  }
  func.func @transform_0(%arg0: i32, %arg1: i32, %arg2: i32) -> (i32, i32) {
    %c0_i32 = arith.constant 0 : i32
    return %arg0, %arg2 : i32, i32
  }
  func.func @transform_1(%arg0: i32, %arg1: i32, %arg2: i32) -> (i32, i32) {
    %c0_i32 = arith.constant 0 : i32
    return %arg2, %arg1 : i32, i32
  }
  func.func @transform_2(%arg0: i32, %arg1: i32, %arg2: i32) -> (i32, i32) {
    %c0_i32 = arith.constant 0 : i32
    %c0_i32_0 = arith.constant 0 : i32
    return %c0_i32, %arg1 : i32, i32
  }
  func.func @transform_3(%arg0: i32, %arg1: i32, %arg2: i32) -> (i32, i32) {
    %c0_i32 = arith.constant 0 : i32
    return %arg0, %arg1 : i32, i32
  }
  func.func @transform_4(%arg0: i32, %arg1: i32, %arg2: i32) -> (i32, i32) {
    %c0_i32 = arith.constant 0 : i32
    return %arg0, %arg1 : i32, i32
  }
}

module attributes {stable_mosaic.version = 11 : i64} {
  func.func @_matmul_kernel(%arg0: i32, %arg1: i32, %arg2: i32, %arg3: memref<8x256xbf16, #tpu.memory_space<vmem>>, %arg4: memref<256x256xbf16, #tpu.memory_space<vmem>>, %arg5: memref<1x256xf32, #tpu.memory_space<vmem>>, %arg6: memref<8x256xbf16, #tpu.memory_space<vmem>>, %arg7: memref<8x256xf32, #tpu.memory_space<vmem>>) attributes {dimension_semantics = [#tpu.dimension_semantics<parallel>, #tpu.dimension_semantics<parallel>, #tpu.dimension_semantics<arbitrary>], iteration_bounds = array<i64: 1, 2, 1>, scalar_prefetch = 0 : i64, scratch_operands = 1 : i64, tpu.core_type = #tpu.core_type<tc>, window_params = [{transform_indices = @transform_0, window_bounds = array<i64: 8, 256>}, {transform_indices = @transform_1, window_bounds = array<i64: 256, 256>}, {transform_indices = @transform_2, window_bounds = array<i64: 1, 256>}, {transform_indices = @transform_3, window_bounds = array<i64: 8, 256>}]} {
    %c0_i32 = arith.constant 0 : i32
    %0 = arith.cmpi eq, %arg2, %c0_i32 : i32
    %1 = arith.extui %0 : i1 to i32
    %c0_i32_0 = arith.constant 0 : i32
    %2 = arith.cmpi ne, %1, %c0_i32_0 : i32
    scf.if %2 {
      %cst_10 = arith.constant 0.000000e+00 : f32
      %12 = vector.broadcast %cst_10 : f32 to vector<8x256xf32>
      %c0_11 = arith.constant 0 : index
      %c0_12 = arith.constant 0 : index
      %13 = vector.load %arg7[%c0_11, %c0_12] : memref<8x256xf32, #tpu.memory_space<vmem>>, vector<8x256xf32>
      tpu.vector_store %arg7[%c0_11, %c0_12], %12 {strides = array<i32>} : memref<8x256xf32, #tpu.memory_space<vmem>>, vector<8x256xf32>,
    } else {
    }
    %c0 = arith.constant 0 : index
    %c0_1 = arith.constant 0 : index
    %3 = vector.load %arg7[%c0, %c0_1] : memref<8x256xf32, #tpu.memory_space<vmem>>, vector<8x256xf32>
    %c0_2 = arith.constant 0 : index
    %c0_3 = arith.constant 0 : index
    %4 = vector.load %arg3[%c0_2, %c0_3] : memref<8x256xbf16, #tpu.memory_space<vmem>>, vector<8x256xbf16>
    %c0_4 = arith.constant 0 : index
    %c0_5 = arith.constant 0 : index
    %5 = vector.load %arg4[%c0_4, %c0_5] : memref<256x256xbf16, #tpu.memory_space<vmem>>, vector<256x256xbf16>
    %cst = arith.constant dense<0.000000e+00> : vector<8x256xf32>
    %6 = tpu.matmul %4, %5, %cst {dimension_numbers = #tpu.dot_dimension_numbers<[1], [0], [0], [1], [0, 0, 1, 1], [], []>} : vector<8x256xbf16>, vector<256x256xbf16>, vector<8x256xf32> -> vector<8x256xf32>
    %7 = arith.addf %3, %6 : vector<8x256xf32>
    %c0_6 = arith.constant 0 : index
    %c0_7 = arith.constant 0 : index
    %8 = vector.load %arg7[%c0_6, %c0_7] : memref<8x256xf32, #tpu.memory_space<vmem>>, vector<8x256xf32>
    tpu.vector_store %arg7[%c0_6, %c0_7], %7 {strides = array<i32>} : memref<8x256xf32, #tpu.memory_space<vmem>>, vector<8x256xf32>,
    %c0_i32_8 = arith.constant 0 : i32
    %9 = arith.cmpi eq, %arg2, %c0_i32_8 : i32
    %10 = arith.extui %9 : i1 to i32
    %c0_i32_9 = arith.constant 0 : i32
    %11 = arith.cmpi ne, %10, %c0_i32_9 : i32
    scf.if %11 {
      %c0_10 = arith.constant 0 : index
      %c0_11 = arith.constant 0 : index
      %12 = vector.load %arg7[%c0_10, %c0_11] : memref<8x256xf32, #tpu.memory_space<vmem>>, vector<8x256xf32>
      %c0_12 = arith.constant 0 : index
      %c0_13 = arith.constant 0 : index
      %13 = vector.load %arg5[%c0_12, %c0_13] : memref<1x256xf32, #tpu.memory_space<vmem>>, vector<1x256xf32>
      %14 = vector.broadcast %13 : vector<1x256xf32> to vector<8x256xf32>
      %15 = arith.addf %12, %14 : vector<8x256xf32>
      %16 = arith.truncf %15 : vector<8x256xf32> to vector<8x256xbf16>
      %c0_14 = arith.constant 0 : index
      %c0_15 = arith.constant 0 : index
      %17 = vector.load %arg6[%c0_14, %c0_15] : memref<8x256xbf16, #tpu.memory_space<vmem>>, vector<8x256xbf16>
      tpu.vector_store %arg6[%c0_14, %c0_15], %16 {strides = array<i32>} : memref<8x256xbf16, #tpu.memory_space<vmem>>, vector<8x256xbf16>,
    } else {
    }
    return
  }
  func.func @transform_0(%arg0: i32, %arg1: i32, %arg2: i32) -> (i32, i32) {
    %c0_i32 = arith.constant 0 : i32
    return %arg0, %arg2 : i32, i32
  }
  func.func @transform_1(%arg0: i32, %arg1: i32, %arg2: i32) -> (i32, i32) {
    %c0_i32 = arith.constant 0 : i32
    return %arg2, %arg1 : i32, i32
  }
  func.func @transform_2(%arg0: i32, %arg1: i32, %arg2: i32) -> (i32, i32) {
    %c0_i32 = arith.constant 0 : i32
    %c0_i32_0 = arith.constant 0 : i32
    return %c0_i32, %arg1 : i32, i32
  }
  func.func @transform_3(%arg0: i32, %arg1: i32, %arg2: i32) -> (i32, i32) {
    %c0_i32 = arith.constant 0 : i32
    return %arg0, %arg1 : i32, i32
  }
}

module attributes {stable_mosaic.version = 11 : i64} {
  func.func @_matmul_kernel(%arg0: i32, %arg1: i32, %arg2: i32, %arg3: memref<8x512xbf16, #tpu.memory_space<vmem>>, %arg4: memref<512x256xbf16, #tpu.memory_space<vmem>>, %arg5: memref<1x256xf32, #tpu.memory_space<vmem>>, %arg6: memref<8x256xbf16, #tpu.memory_space<vmem>>, %arg7: memref<8x256xf32, #tpu.memory_space<vmem>>) attributes {dimension_semantics = [#tpu.dimension_semantics<parallel>, #tpu.dimension_semantics<parallel>, #tpu.dimension_semantics<arbitrary>], iteration_bounds = array<i64: 1, 1, 1>, scalar_prefetch = 0 : i64, scratch_operands = 1 : i64, tpu.core_type = #tpu.core_type<tc>, window_params = [{transform_indices = @transform_0, window_bounds = array<i64: 8, 512>}, {transform_indices = @transform_1, window_bounds = array<i64: 512, 256>}, {transform_indices = @transform_2, window_bounds = array<i64: 1, 256>}, {transform_indices = @transform_3, window_bounds = array<i64: 8, 256>}]} {
    %c0_i32 = arith.constant 0 : i32
    %0 = arith.cmpi eq, %arg2, %c0_i32 : i32
    %1 = arith.extui %0 : i1 to i32
    %c0_i32_0 = arith.constant 0 : i32
    %2 = arith.cmpi ne, %1, %c0_i32_0 : i32
    scf.if %2 {
      %cst_10 = arith.constant 0.000000e+00 : f32
      %12 = vector.broadcast %cst_10 : f32 to vector<8x256xf32>
      %c0_11 = arith.constant 0 : index
      %c0_12 = arith.constant 0 : index
      %13 = vector.load %arg7[%c0_11, %c0_12] : memref<8x256xf32, #tpu.memory_space<vmem>>, vector<8x256xf32>
      tpu.vector_store %arg7[%c0_11, %c0_12], %12 {strides = array<i32>} : memref<8x256xf32, #tpu.memory_space<vmem>>, vector<8x256xf32>,
    } else {
    }
    %c0 = arith.constant 0 : index
    %c0_1 = arith.constant 0 : index
    %3 = vector.load %arg7[%c0, %c0_1] : memref<8x256xf32, #tpu.memory_space<vmem>>, vector<8x256xf32>
    %c0_2 = arith.constant 0 : index
    %c0_3 = arith.constant 0 : index
    %4 = vector.load %arg3[%c0_2, %c0_3] : memref<8x512xbf16, #tpu.memory_space<vmem>>, vector<8x512xbf16>
    %c0_4 = arith.constant 0 : index
    %c0_5 = arith.constant 0 : index
    %5 = vector.load %arg4[%c0_4, %c0_5] : memref<512x256xbf16, #tpu.memory_space<vmem>>, vector<512x256xbf16>
    %cst = arith.constant dense<0.000000e+00> : vector<8x256xf32>
    %6 = tpu.matmul %4, %5, %cst {dimension_numbers = #tpu.dot_dimension_numbers<[1], [0], [0], [1], [0, 0, 1, 1], [], []>} : vector<8x512xbf16>, vector<512x256xbf16>, vector<8x256xf32> -> vector<8x256xf32>
    %7 = arith.addf %3, %6 : vector<8x256xf32>
    %c0_6 = arith.constant 0 : index
    %c0_7 = arith.constant 0 : index
    %8 = vector.load %arg7[%c0_6, %c0_7] : memref<8x256xf32, #tpu.memory_space<vmem>>, vector<8x256xf32>
    tpu.vector_store %arg7[%c0_6, %c0_7], %7 {strides = array<i32>} : memref<8x256xf32, #tpu.memory_space<vmem>>, vector<8x256xf32>,
    %c0_i32_8 = arith.constant 0 : i32
    %9 = arith.cmpi eq, %arg2, %c0_i32_8 : i32
    %10 = arith.extui %9 : i1 to i32
    %c0_i32_9 = arith.constant 0 : i32
    %11 = arith.cmpi ne, %10, %c0_i32_9 : i32
    scf.if %11 {
      %c0_10 = arith.constant 0 : index
      %c0_11 = arith.constant 0 : index
      %12 = vector.load %arg7[%c0_10, %c0_11] : memref<8x256xf32, #tpu.memory_space<vmem>>, vector<8x256xf32>
      %c0_12 = arith.constant 0 : index
      %c0_13 = arith.constant 0 : index
      %13 = vector.load %arg5[%c0_12, %c0_13] : memref<1x256xf32, #tpu.memory_space<vmem>>, vector<1x256xf32>
      %14 = vector.broadcast %13 : vector<1x256xf32> to vector<8x256xf32>
      %15 = arith.addf %12, %14 : vector<8x256xf32>
      %cst_14 = arith.constant 0.000000e+00 : f32
      %16 = vector.broadcast %cst_14 : f32 to vector<8x256xf32>
      %17 = arith.maximumf %15, %16 : vector<8x256xf32>
      %18 = arith.truncf %17 : vector<8x256xf32> to vector<8x256xbf16>
      %c0_15 = arith.constant 0 : index
      %c0_16 = arith.constant 0 : index
      %19 = vector.load %arg6[%c0_15, %c0_16] : memref<8x256xbf16, #tpu.memory_space<vmem>>, vector<8x256xbf16>
      tpu.vector_store %arg6[%c0_15, %c0_16], %18 {strides = array<i32>} : memref<8x256xbf16, #tpu.memory_space<vmem>>, vector<8x256xbf16>,
    } else {
    }
    return
  }
  func.func @transform_0(%arg0: i32, %arg1: i32, %arg2: i32) -> (i32, i32) {
    %c0_i32 = arith.constant 0 : i32
    return %arg0, %arg2 : i32, i32
  }
  func.func @transform_1(%arg0: i32, %arg1: i32, %arg2: i32) -> (i32, i32) {
    %c0_i32 = arith.constant 0 : i32
    return %arg2, %arg1 : i32, i32
  }
  func.func @transform_2(%arg0: i32, %arg1: i32, %arg2: i32) -> (i32, i32) {
    %c0_i32 = arith.constant 0 : i32
    %c0_i32_0 = arith.constant 0 : i32
    return %c0_i32, %arg1 : i32, i32
  }
  func.func @transform_3(%arg0: i32, %arg1: i32, %arg2: i32) -> (i32, i32) {
    %c0_i32 = arith.constant 0 : i32
    return %arg0, %arg1 : i32, i32
  }
}

</mosaic_0001>

<bundles_post_ra>
// kernel: _lambda_.26
= control target key start
LH: loop header
LB: loop body
LE: loop exit
PB: predicated region body
PF: predicated region fallthrough
CT: control target
= control target key end

     0   :  { %vm152_vm0 = vcmask 519168   ;;  %s370_s0 = inlined_call_operand.vmem [shape: bf16[32,64], index: 0, kind: input, shape index: {}]   ;;  %s371_s1 = inlined_call_operand.vmem [shape: bf16[32,64], index: 1, kind: input, shape index: {}]   ;;  %s372_s2 = inlined_call_operand.vmem [shape: bf16[32,64], index: 2, kind: input, shape index: {}]   ;;  %s373_s3 = inlined_call_operand.vmem [shape: bf16[32,64], index: 3, kind: input, shape index: {}]   ;;  %s374_s4 = inlined_call_operand.vmem [shape: bf16[32,64], index: 4, kind: input, shape index: {}]   ;;  %s375_s5 = inlined_call_operand.vmem [shape: bf16[32,64], index: 5, kind: input, shape index: {}]   ;;  %s376_s6 = inlined_call_operand.vmem [shape: bf16[32,64], index: 6, kind: input, shape index: {}]   ;;  %s377_s7 = inlined_call_operand.vmem [shape: bf16[32,64], index: 7, kind: input, shape index: {}]   ;;  %s378_s8 = inlined_call_operand.vmem [shape: bf16[32,64], index: 8, kind: input, shape index: {}]   ;;  %s379_s9 = inlined_call_operand.vmem [shape: bf16[32,64], index: 9, kind: output, shape index: {}]  }
   0x1   :  { %v170_v0 = vld [vmem:[%s370_s0] sm:$0xff]   ;;  %v241_v12 = vld [vmem:[%s370_s0 + $0x8] sm:$0xff]  }
   0x2   :  { %v178_v1 = vld [vmem:[%s371_s1] sm:$0xff]   ;;  %v171_v3 = vunpack.c.l.bf16 %v170_v0  ;;  %v172_v7 = vunpack.c.h.bf16 %v170_v0  ;;  %v242_v13 = vld [vmem:[%s371_s1 + $0x8] sm:$0xff]   ;;  %v175_v25 = vunpack.c.l.bf16 %v241_v12  ;;  %v176_v41 = vunpack.c.h.bf16 %v241_v12 }
   0x3   :  { %v186_v2 = vld [vmem:[%s372_s2] sm:$0xff]   ;;  %v179_v4 = vunpack.c.l.bf16 %v178_v1  ;;  %v180_v9 = vunpack.c.h.bf16 %v178_v1  ;;  %v243_v19 = vld [vmem:[%s372_s2 + $0x8] sm:$0xff]   ;;  %v183_v26 = vunpack.c.l.bf16 %v242_v13  ;;  %v184_v46 = vunpack.c.h.bf16 %v242_v13 }
   0x4   :  { %v187_v5 = vunpack.c.l.bf16 %v186_v2  ;;  %v194_v6 = vld [vmem:[%s373_s3] sm:$0xff]   ;;  %v188_v17 = vunpack.c.h.bf16 %v186_v2  ;;  %v244_v22 = vld [vmem:[%s373_s3 + $0x8] sm:$0xff]   ;;  %v191_v31 = vunpack.c.l.bf16 %v243_v19  ;;  %v192_v47 = vunpack.c.h.bf16 %v243_v19 }
   0x5   :  { %v202_v8 = vld [vmem:[%s374_s4] sm:$0xff]   ;;  %v48_v10 = vmax.f32 %v171_v3, %v179_v4  ;;  %v195_v11 = vunpack.c.l.bf16 %v194_v6  ;;  %v49_v16 = vmax.f32 %v172_v7, %v180_v9  ;;  %v196_v18 = vunpack.c.h.bf16 %v194_v6  ;;  %v245_v27 = vld [vmem:[%s374_s4 + $0x8] sm:$0xff]  }
   0x6   :  { %v210_v14 = vld [vmem:[%s375_s5] sm:$0xff]   ;;  %v203_v21 = vunpack.c.l.bf16 %v202_v8  ;;  %v204_v24 = vunpack.c.h.bf16 %v202_v8  ;;  %v50_v35 = vmax.f32 %v175_v25, %v183_v26  ;;  %v199_v36 = vunpack.c.l.bf16 %v244_v22  ;;  %v246_v37 = vld [vmem:[%s375_s5 + $0x8] sm:$0xff]  }
   0x7   :  { %v218_v15 = vld [vmem:[%s376_s6] sm:$0xff]   ;;  %v60_v20 = vmax.f32 %v48_v10, %v187_v5  ;;  %v61_v23 = vmax.f32 %v49_v16, %v188_v17  ;;  %v211_v29 = vunpack.c.l.bf16 %v210_v14  ;;  %v212_v34 = vunpack.c.h.bf16 %v210_v14  ;;  %v247_v45 = vld [vmem:[%s376_s6 + $0x8] sm:$0xff]  }
   0x8   :  { %v219_v30 = vunpack.c.l.bf16 %v218_v15  ;;  %v226_v32 = vld [vmem:[%s377_s7] sm:$0xff]   ;;  %v220_v39 = vunpack.c.h.bf16 %v218_v15  ;;  %v207_v40 = vunpack.c.l.bf16 %v245_v27  ;;  %v62_v44 = vmax.f32 %v50_v35, %v191_v31  ;;  %v248_v54 = vld [vmem:[%s377_s7 + $0x8] sm:$0xff]  }
   0x9   :  { %v72_v28 = vmax.f32 %v60_v20, %v195_v11  ;;  %v73_v33 = vmax.f32 %v61_v23, %v196_v18  ;;  %v234_v42 = vld [vmem:[%s378_s8] sm:$0xff]   ;;  %v227_v49 = vunpack.c.l.bf16 %v226_v32  ;;  %v228_v50 = vunpack.c.h.bf16 %v226_v32  ;;  %v249_v63 = vld [vmem:[%s378_s8 + $0x8] sm:$0xff]  }
   0xa   :  { %v215_v51 = vunpack.c.l.bf16 %v246_v37  ;;  %v74_v53 = vmax.f32 %v62_v44, %v199_v36  ;;  %v51_v55 = vmax.f32 %v176_v41, %v184_v46  ;;  %v200_v56 = vunpack.c.h.bf16 %v244_v22 }
   0xb   :  { %v84_v38 = vmax.f32 %v72_v28, %v203_v21  ;;  %v85_v43 = vmax.f32 %v73_v33, %v204_v24  ;;  %v235_v58 = vunpack.c.l.bf16 %v234_v42  ;;  %v236_v59 = vunpack.c.h.bf16 %v234_v42 }
   0xc   :  { %v223_v60 = vunpack.c.l.bf16 %v247_v45  ;;  %v86_v62 = vmax.f32 %v74_v53, %v207_v40  ;;  %v63_v0 = vmax.f32 %v51_v55, %v192_v47  ;;  %v208_v1 = vunpack.c.h.bf16 %v245_v27 }
   0xd   :  { %v96_v48 = vmax.f32 %v84_v38, %v211_v29  ;;  %v97_v52 = vmax.f32 %v85_v43, %v212_v34  ;;  %v231_v3 = vunpack.c.l.bf16 %v248_v54  ;;  %v216_v7 = vunpack.c.h.bf16 %v246_v37 }
   0xe   :  { %v98_v5 = vmax.f32 %v86_v62, %v215_v51  ;;  %v75_v6 = vmax.f32 %v63_v0, %v200_v56  ;;  %v239_v9 = vunpack.c.l.bf16 %v249_v63  ;;  %v224_v13 = vunpack.c.h.bf16 %v247_v45 }
   0xf   :  { %v108_v57 = vmax.f32 %v96_v48, %v219_v30  ;;  %v109_v61 = vmax.f32 %v97_v52, %v220_v39  ;;  %v232_v18 = vunpack.c.h.bf16 %v248_v54  ;;  %v240_v21 = vunpack.c.h.bf16 %v249_v63 }
  0x10   :  { %v110_v11 = vmax.f32 %v98_v5, %v223_v60  ;;  %v87_v12 = vmax.f32 %v75_v6, %v208_v1 }
  0x11   :  { %v120_v2 = vmax.f32 %v108_v57, %v227_v49  ;;  %v121_v4 = vmax.f32 %v109_v61, %v228_v50 }
  0x12   :  { %v122_v16 = vmax.f32 %v110_v11, %v231_v3  ;;  %v99_v17 = vmax.f32 %v87_v12, %v216_v7 }
  0x13   :  { %v132_v8 = vmax.f32 %v120_v2, %v235_v58  ;;  %v133_v10 = vmax.f32 %v121_v4, %v236_v59 }
  0x14   :  { %v134_v19 = vmax.f32 %v122_v16, %v239_v9  ;;  %v111_v20 = vmax.f32 %v99_v17, %v224_v13 }
  0x15   :  { %v165_v14 = vpack.c.bf16 %v132_v8, %v132_v8  ;;  %v166_v15 = vpack.c.bf16 %v133_v10, %v133_v10 }
  0x16   :  { %v167_v22 = vpack.c.bf16 %v134_v19, %v134_v19  ;;  %v123_v23 = vmax.f32 %v111_v20, %v232_v18 }
  0x17   :  { %153 = vst.msk [vmem:[%s379_s9] sm:$0xf] %vm152_vm0, %v165_v14  ;;  %154 = vst.msk [vmem:[%s379_s9 + $0x4] sm:$0xf] %vm152_vm0, %v166_v15 }
  0x18   :  { %155 = vst.msk [vmem:[%s379_s9 + $0x8] sm:$0xf] %vm152_vm0, %v167_v22  ;;  %v135_v24 = vmax.f32 %v123_v23, %v240_v21 }
  0x1a   :  { %v168_v25 = vpack.c.bf16 %v135_v24, %v135_v24 }
  0x1c   :  { %156 = vst.msk [vmem:[%s379_s9 + $0xc] sm:$0xf] %vm152_vm0, %v168_v25 }

// kernel: _lambda_.25
= control target key start
LH: loop header
LB: loop body
LE: loop exit
PB: predicated region body
PF: predicated region fallthrough
CT: control target
= control target key end

     0   :  { %v645_v0 = vmov 0   ;;  %vm19_vm0 = vcmask 523264   ;;  %v646_v3 = vmov 0.0   ;;  %vm216_vm1 = vcmask 154624   ;;  %s891_s1 = inlined_call_operand.vmem [shape: bf16[147,64], index: 1, kind: input, shape index: {}]   ;;  %s892_s0 = inlined_call_operand.vmem [shape: bf16[128,147], index: 0, kind: input, shape index: {}]   ;;  %s893_s2 = inlined_call_operand.vmem [shape: f32[1,64], index: 2, kind: input, shape index: {}]   ;;  %s894_s3 = inlined_call_operand.vmem [shape: bf16[128,64], index: 3, kind: output, shape index: {}]  }
   0x1   :  { %248 = vmatprep.subr.bf16.mxu0 %v645_v0  ;;  %588 = vmatprep.subr.bf16.mxu1 %v645_v0  ;;  %v611_v1 = vld [vmem:[%s891_s1] sm:$0xff]   ;;  %v612_v2 = vld [vmem:[%s891_s1 + $0x8] sm:$0xff]   ;;  %20 = vst.msk [vmem:[#allocation2] sm:$0xff] %vm19_vm0, %v646_v3  ;;  %21 = vst.msk [vmem:[#allocation2 + $0x8] sm:$0xff] %vm19_vm0, %v646_v3  ;;  %vm241_vm2 = vcmask 1040384   ;;  %vm242_vm3 = vcmask 1041408  }
   0x2   :  { %249 = vmatpush1.bf16.msra.mxu0 %v611_v1  ;;  %598 = vmatpush1.bf16.msra.mxu1 %v611_v1  ;;  %22 = vst.msk [vmem:[#allocation2 + $0x10] sm:$0xff] %vm19_vm0, %v646_v3  ;;  %23 = vst.msk [vmem:[#allocation2 + $0x18] sm:$0xff] %vm19_vm0, %v646_v3  ;;  %v613_v4 = vld [vmem:[%s891_s1 + $0x10] sm:$0xff]   ;;  %v614_v5 = vld [vmem:[%s891_s1 + $0x18] sm:$0xff]   ;;  %v647_v12 = vmov 65535   ;;  %vm500_vm4 = vcmask 519168  }
   0x3   :  { %250 = vmatprep.subr.bf16.mxu0 %v645_v0  ;;  %589 = vmatprep.subr.bf16.mxu1 %v645_v0  ;;  %24 = vst.msk [vmem:[#allocation2 + $0x20] sm:$0xff] %vm19_vm0, %v646_v3  ;;  %25 = vst.msk [vmem:[#allocation2 + $0x28] sm:$0xff] %vm19_vm0, %v646_v3  ;;  %v623_v6 = vld [vmem:[%s892_s0 + $0x4] ss:$8 sps:$4 sm:$0xff]   ;;  %v617_v10 = vld [vmem:[%s891_s1 + $0x30] sm:$0xff]   ;;  %v243_v13 = vsel %vm241_vm2, 4294967295, %v647_v12 }
   0x4   :  { %26 = vst.msk [vmem:[#allocation2 + $0x30] sm:$0xff] %vm19_vm0, %v646_v3  ;;  %27 = vst.msk [vmem:[#allocation2 + $0x38] sm:$0xff] %vm19_vm0, %v646_v3  ;;  %547 = vmatprep.mubr.msk.bf16.mxu0 %vm216_vm1, %v623_v6  ;;  %v626_v7 = vld [vmem:[%s892_s0 + $0x44] ss:$8 sps:$4 sm:$0xff]   ;;  %v618_v11 = vld [vmem:[%s891_s1 + $0x38] sm:$0xff]   ;;  %v244_v16 = vsel %vm242_vm3, %v243_v13, 0 }
   0x5   :  { %28 = vst.msk [vmem:[#allocation2 + $0x40] sm:$0xff] %vm19_vm0, %v646_v3  ;;  %29 = vst.msk [vmem:[#allocation2 + $0x48] sm:$0xff] %vm19_vm0, %v646_v3  ;;  %v615_v8 = vld [vmem:[%s891_s1 + $0x20] sm:$0xff]   ;;  %551 = vmatprep.mubr.msk.bf16.mxu1 %vm216_vm1, %v626_v7  ;;  %v616_v9 = vld [vmem:[%s891_s1 + $0x28] sm:$0xff]  }
   0x6   :  { %30 = vst.msk [vmem:[#allocation2 + $0x50] sm:$0xff] %vm19_vm0, %v646_v3  ;;  %31 = vst.msk [vmem:[#allocation2 + $0x58] sm:$0xff] %vm19_vm0, %v646_v3  ;;  %251 = vmatpush1.bf16.msra.mxu0 %v612_v2  ;;  %599 = vmatpush1.bf16.msra.mxu1 %v612_v2  ;;  %v619_v14 = vld [vmem:[%s891_s1 + $0x40] sm:$0xff]   ;;  %v620_v15 = vld [vmem:[%s891_s1 + $0x48] ss:$0 sps:$4 sm:$0x33]  }
   0x7   :  { %32 = vst.msk [vmem:[#allocation2 + $0x60] sm:$0xff] %vm19_vm0, %v646_v3  ;;  %33 = vst.msk [vmem:[#allocation2 + $0x68] sm:$0xff] %vm19_vm0, %v646_v3  ;;  %252 = vmatprep.subr.bf16.mxu0 %v645_v0  ;;  %590 = vmatprep.subr.bf16.mxu1 %v645_v0  ;;  %v246_v17 = vand.u32 %v620_v15, %v244_v16  ;;  %v621_v18 = vld [vmem:[%s892_s0] ss:$8 sps:$4 sm:$0xff]   ;;  %v627_v20 = vld [vmem:[%s892_s0 + $0x14] ss:$8 sps:$4 sm:$0xff]  }
   0x8   :  { %34 = vst.msk [vmem:[#allocation2 + $0x70] sm:$0xff] %vm19_vm0, %v646_v3  ;;  %35 = vst.msk [vmem:[#allocation2 + $0x78] sm:$0xff] %vm19_vm0, %v646_v3  ;;  %v624_v19 = vld [vmem:[%s892_s0 + $0x40] ss:$8 sps:$4 sm:$0xff]   ;;  %v629_v21 = vld [vmem:[%s892_s0 + $0x54] ss:$8 sps:$4 sm:$0xff]  }
   0x9   :  { %v631_v22 = vld [vmem:[%s892_s0 + $0x10] ss:$8 sps:$4 sm:$0xff]   ;;  %v633_v24 = vld [vmem:[%s892_s0 + $0x24] ss:$8 sps:$4 sm:$0xff]   ;;  %v637_v26 = vld [vmem:[%s892_s0 + $0x20] ss:$8 sps:$4 sm:$0xff]  }
   0xa   :  { %253 = vmatpush1.bf16.msra.mxu0 %v613_v4  ;;  %600 = vmatpush1.bf16.msra.mxu1 %v613_v4  ;;  %v632_v23 = vld [vmem:[%s892_s0 + $0x50] ss:$8 sps:$4 sm:$0xff]   ;;  %v635_v25 = vld [vmem:[%s892_s0 + $0x64] ss:$8 sps:$4 sm:$0xff]   ;;  %v638_v27 = vld [vmem:[%s892_s0 + $0x60] ss:$8 sps:$4 sm:$0xff]  }
   0xb   :  { %254 = vmatprep.subr.bf16.mxu0 %v645_v0  ;;  %591 = vmatprep.subr.bf16.mxu1 %v645_v0  ;;  %v639_v28 = vld [vmem:[%s892_s0 + $0x34] ss:$8 sps:$4 sm:$0xff]   ;;  %v643_v30 = vld [vmem:[%s892_s0 + $0x30] ss:$8 sps:$4 sm:$0xff]   ;;  %v36_v32 = vld [vmem:[#allocation2] sm:$0xff] }
   0xc   :  { %v641_v29 = vld [vmem:[%s892_s0 + $0x74] ss:$8 sps:$4 sm:$0xff]   ;;  %v644_v31 = vld [vmem:[%s892_s0 + $0x70] ss:$8 sps:$4 sm:$0xff]   ;;  %v44_v33 = vld [vmem:[#allocation2 + $0x40] sm:$0xff] }
   0xd   :  { %v37_v36 = vld [vmem:[#allocation2 + $0x8] sm:$0xff]  ;;  %v38_v48 = vld [vmem:[#allocation2 + $0x10] sm:$0xff]  ;;  %v797_v50 = vld [vmem:[%s893_s2] ss:$0 sm:$0xff] }
   0xe   :  { %255 = vmatpush1.bf16.msra.mxu0 %v614_v5  ;;  %601 = vmatpush1.bf16.msra.mxu1 %v614_v5  ;;  %v45_v37 = vld [vmem:[#allocation2 + $0x48] sm:$0xff]  ;;  %v46_v49 = vld [vmem:[#allocation2 + $0x50] sm:$0xff]  ;;  %v39_v53 = vld [vmem:[#allocation2 + $0x18] sm:$0xff] }
   0xf   :  { %256 = vmatprep.subr.bf16.mxu0 %v645_v0  ;;  %592 = vmatprep.subr.bf16.mxu1 %v645_v0  ;;  %v47_v54 = vld [vmem:[#allocation2 + $0x58] sm:$0xff]  ;;  %v48_v12 = vld [vmem:[#allocation2 + $0x60] sm:$0xff] }
  0x12   :  { %257 = vmatpush1.bf16.msra.mxu0 %v615_v8  ;;  %602 = vmatpush1.bf16.msra.mxu1 %v615_v8 }
  0x13   :  { %258 = vmatprep.subr.bf16.mxu0 %v645_v0  ;;  %593 = vmatprep.subr.bf16.mxu1 %v645_v0 }
  0x16   :  { %259 = vmatpush1.bf16.msra.mxu0 %v616_v9  ;;  %603 = vmatpush1.bf16.msra.mxu1 %v616_v9 }
  0x17   :  { %260 = vmatprep.subr.bf16.mxu0 %v645_v0  ;;  %594 = vmatprep.subr.bf16.mxu1 %v645_v0 }
  0x1a   :  { %261 = vmatpush1.bf16.msra.mxu0 %v617_v10  ;;  %604 = vmatpush1.bf16.msra.mxu1 %v617_v10 }
  0x1b   :  { %262 = vmatprep.subr.bf16.mxu0 %v645_v0  ;;  %595 = vmatprep.subr.bf16.mxu1 %v645_v0 }
  0x1e   :  { %263 = vmatpush1.bf16.msra.mxu0 %v618_v11  ;;  %605 = vmatpush1.bf16.msra.mxu1 %v618_v11  ;;  %v40_v11 = vld [vmem:[#allocation2 + $0x20] sm:$0xff] }
  0x1f   :  { %264 = vmatprep.subr.bf16.mxu0 %v645_v0  ;;  %596 = vmatprep.subr.bf16.mxu1 %v645_v0 }
  0x22   :  { %265 = vmatpush1.bf16.msra.mxu0 %v619_v14  ;;  %606 = vmatpush1.bf16.msra.mxu1 %v619_v14 }
  0x23   :  { %266 = vmatprep.subr.bf16.mxu0 %v645_v0  ;;  %597 = vmatprep.subr.bf16.mxu1 %v645_v0 }
  0x26   :  { %267 = vmatpush1.bf16.msra.mxu0 %v246_v17  ;;  %607 = vmatpush1.bf16.msra.mxu1 %v246_v17 }
  0x29   :  { %281 = vmatmul.mubr.bf16.vlgmr.msra.gmra.mrb[0].mxu0 %v621_v18  ;;  %313 = vmatmul.mubr.bf16.vlgmr.msra.gmra.mrb[0].mxu1 %v624_v19  ;;  %v41_v19 = vld [vmem:[#allocation2 + $0x28] sm:$0xff] }
  0x2a   :  { %548 = vmatprep.mubr.msk.bf16.mxu0 %vm216_vm1, %v627_v20  ;;  %552 = vmatprep.mubr.msk.bf16.mxu1 %vm216_vm1, %v629_v21  ;;  %v49_v20 = vld [vmem:[#allocation2 + $0x68] sm:$0xff] }
  0x31   :  { %289 = vmatmul.mubr.bf16.gmra.mrb[4].mxu0 %v631_v22  ;;  %321 = vmatmul.mubr.bf16.gmra.mrb[4].mxu1 %v632_v23 }
  0x32   :  { %549 = vmatprep.mubr.msk.bf16.mxu0 %vm216_vm1, %v633_v24  ;;  %553 = vmatprep.mubr.msk.bf16.mxu1 %vm216_vm1, %v635_v25 }
  0x39   :  { %297 = vmatmul.mubr.bf16.gmra.mrb[8].mxu0 %v637_v26  ;;  %329 = vmatmul.mubr.bf16.gmra.mrb[8].mxu1 %v638_v27 }
  0x3a   :  { %550 = vmatprep.mubr.msk.bf16.mxu0 %vm216_vm1, %v639_v28  ;;  %554 = vmatprep.mubr.msk.bf16.mxu1 %vm216_vm1, %v641_v29 }
  0x41   :  { %305 = vmatmul.mubr.bf16.gmra.mrb[12].mxu0 %v643_v30  ;;  %337 = vmatmul.mubr.bf16.gmra.mrb[12].mxu1 %v644_v31 }
  0xfc   :  { %v282_v34 = vpop.f32.mrb[0].mxu0  ;;  %v314_v35 = vpop.f32.mrb[0].mxu1 }
  0xfd   :  { %v345_v38 = vadd.f32 %v282_v34, %v36_v32  ;;  %v353_v39 = vadd.f32 %v314_v35, %v44_v33  ;;  %v284_v40 = vpop.f32.mrb[1].mxu0  ;;  %v316_v41 = vpop.f32.mrb[1].mxu1 }
  0xfe   :  { %v285_v42 = vpop.f32.mrb[2].mxu0  ;;  %v317_v43 = vpop.f32.mrb[2].mxu1 }
  0xff   :  { %362 = vst.msk [vmem:[#allocation2] sm:$0xff] %vm19_vm0, %v345_v38  ;;  %370 = vst.msk [vmem:[#allocation2 + $0x40] sm:$0xff] %vm19_vm0, %v353_v39  ;;  %v346_v44 = vadd.f32 %v285_v42, %v37_v36  ;;  %v354_v45 = vadd.f32 %v317_v43, %v45_v37  ;;  %v287_v46 = vpop.f32.mrb[3].mxu0  ;;  %v319_v47 = vpop.f32.mrb[3].mxu1  ;;  %v42_v43 = vld [vmem:[#allocation2 + $0x30] sm:$0xff] }
 0x101   :  { %363 = vst.msk [vmem:[#allocation2 + $0x8] sm:$0xff] %vm19_vm0, %v346_v44  ;;  %371 = vst.msk [vmem:[#allocation2 + $0x48] sm:$0xff] %vm19_vm0, %v354_v45  ;;  %v50_v44 = vld [vmem:[#allocation2 + $0x70] sm:$0xff] }
 0x104   :  { %v290_v51 = vpop.f32.mrb[4].mxu0  ;;  %v322_v52 = vpop.f32.mrb[4].mxu1 }
 0x105   :  { %v347_v55 = vadd.f32 %v290_v51, %v38_v48  ;;  %v355_v56 = vadd.f32 %v322_v52, %v46_v49  ;;  %v292_v57 = vpop.f32.mrb[5].mxu0  ;;  %v324_v58 = vpop.f32.mrb[5].mxu1  ;;  %v43_v52 = vld [vmem:[#allocation2 + $0x38] sm:$0xff] }
 0x106   :  { %v381_v59 = vld [vmem:[#allocation2] sm:$0xff]  ;;  %v293_v61 = vpop.f32.mrb[6].mxu0  ;;  %v325_v62 = vpop.f32.mrb[6].mxu1 }
 0x107   :  { %v389_v60 = vld [vmem:[#allocation2 + $0x40] sm:$0xff]  ;;  %v404_v63 = vadd.f32 %v797_v50, %v381_v59  ;;  %364 = vst.msk [vmem:[#allocation2 + $0x10] sm:$0xff] %vm19_vm0, %v347_v55  ;;  %372 = vst.msk [vmem:[#allocation2 + $0x50] sm:$0xff] %vm19_vm0, %v355_v56  ;;  %v348_v1 = vadd.f32 %v293_v61, %v39_v53  ;;  %v356_v2 = vadd.f32 %v325_v62, %v47_v54  ;;  %v295_v3 = vpop.f32.mrb[7].mxu0  ;;  %v327_v4 = vpop.f32.mrb[7].mxu1  ;;  %v51_v53 = vld [vmem:[#allocation2 + $0x78] sm:$0xff] }
 0x108   :  { %v412_v0 = vadd.f32 %v797_v50, %v389_v60  ;;  %v382_v5 = vld [vmem:[#allocation2 + $0x8] sm:$0xff] }
 0x109   :  { %v390_v6 = vld [vmem:[#allocation2 + $0x48] sm:$0xff]  ;;  %v420_v7 = vmax.f32 %v404_v63, 0.0  ;;  %v405_v9 = vadd.f32 %v797_v50, %v382_v5  ;;  %365 = vst.msk [vmem:[#allocation2 + $0x18] sm:$0xff] %vm19_vm0, %v348_v1  ;;  %373 = vst.msk [vmem:[#allocation2 + $0x58] sm:$0xff] %vm19_vm0, %v356_v2 }
 0x10a   :  { %v428_v8 = vmax.f32 %v412_v0, 0.0  ;;  %v413_v10 = vadd.f32 %v797_v50, %v390_v6 }
 0x10b   :  { %v572_v13 = vpack.c.bf16 %v420_v7, %v420_v7  ;;  %v421_v15 = vmax.f32 %v405_v9, 0.0 }
 0x10c   :  { %v580_v14 = vpack.c.bf16 %v428_v8, %v428_v8  ;;  %v429_v16 = vmax.f32 %v413_v10, 0.0  ;;  %v298_v17 = vpop.f32.mrb[8].mxu0  ;;  %v330_v18 = vpop.f32.mrb[8].mxu1 }
 0x10d   :  { %501 = vst.msk [vmem:[%s894_s3] sm:$0xf] %vm500_vm4, %v572_v13  ;;  %v573_v21 = vpack.c.bf16 %v421_v15, %v421_v15  ;;  %v349_v23 = vadd.f32 %v298_v17, %v40_v11  ;;  %v357_v24 = vadd.f32 %v330_v18, %v48_v12  ;;  %v300_v25 = vpop.f32.mrb[9].mxu0  ;;  %v332_v26 = vpop.f32.mrb[9].mxu1 }
 0x10e   :  { %509 = vst.msk [vmem:[%s894_s3 + $0x20] sm:$0xf] %vm500_vm4, %v580_v14  ;;  %v581_v22 = vpack.c.bf16 %v429_v16, %v429_v16  ;;  %v383_v27 = vld [vmem:[#allocation2 + $0x10] sm:$0xff]  ;;  %v301_v29 = vpop.f32.mrb[10].mxu0  ;;  %v333_v30 = vpop.f32.mrb[10].mxu1 }
 0x10f   :  { %v391_v28 = vld [vmem:[#allocation2 + $0x50] sm:$0xff]  ;;  %502 = vst.msk [vmem:[%s894_s3 + $0x4] sm:$0xf] %vm500_vm4, %v573_v21  ;;  %v406_v31 = vadd.f32 %v797_v50, %v383_v27  ;;  %v350_v33 = vadd.f32 %v301_v29, %v41_v19  ;;  %v358_v34 = vadd.f32 %v333_v30, %v49_v20  ;;  %v303_v35 = vpop.f32.mrb[11].mxu0  ;;  %v335_v36 = vpop.f32.mrb[11].mxu1 }
 0x110   :  { %510 = vst.msk [vmem:[%s894_s3 + $0x24] sm:$0xf] %vm500_vm4, %v581_v22  ;;  %v414_v32 = vadd.f32 %v797_v50, %v391_v28  ;;  %v384_v37 = vld [vmem:[#allocation2 + $0x18] sm:$0xff] }
 0x111   :  { %366 = vst.msk [vmem:[#allocation2 + $0x20] sm:$0xff] %vm19_vm0, %v349_v23  ;;  %374 = vst.msk [vmem:[#allocation2 + $0x60] sm:$0xff] %vm19_vm0, %v357_v24  ;;  %v392_v38 = vld [vmem:[#allocation2 + $0x58] sm:$0xff]  ;;  %v422_v39 = vmax.f32 %v406_v31, 0.0  ;;  %v407_v41 = vadd.f32 %v797_v50, %v384_v37 }
 0x112   :  { %v430_v40 = vmax.f32 %v414_v32, 0.0  ;;  %v415_v42 = vadd.f32 %v797_v50, %v392_v38  ;;  %367 = vst.msk [vmem:[#allocation2 + $0x28] sm:$0xff] %vm19_vm0, %v350_v33  ;;  %375 = vst.msk [vmem:[#allocation2 + $0x68] sm:$0xff] %vm19_vm0, %v358_v34 }
 0x113   :  { %v574_v45 = vpack.c.bf16 %v422_v39, %v422_v39  ;;  %v423_v47 = vmax.f32 %v407_v41, 0.0 }
 0x114   :  { %v582_v46 = vpack.c.bf16 %v430_v40, %v430_v40  ;;  %v431_v48 = vmax.f32 %v415_v42, 0.0  ;;  %v306_v49 = vpop.f32.mrb[12].mxu0  ;;  %v338_v51 = vpop.f32.mrb[12].mxu1 }
 0x115   :  { %503 = vst.msk [vmem:[%s894_s3 + $0x8] sm:$0xf] %vm500_vm4, %v574_v45  ;;  %v575_v54 = vpack.c.bf16 %v423_v47, %v423_v47  ;;  %v351_v56 = vadd.f32 %v306_v49, %v42_v43  ;;  %v359_v57 = vadd.f32 %v338_v51, %v50_v44  ;;  %v308_v58 = vpop.f32.mrb[13].mxu0  ;;  %v340_v59 = vpop.f32.mrb[13].mxu1 }
 0x116   :  { %511 = vst.msk [vmem:[%s894_s3 + $0x28] sm:$0xf] %vm500_vm4, %v582_v46  ;;  %v583_v55 = vpack.c.bf16 %v431_v48, %v431_v48  ;;  %v309_v62 = vpop.f32.mrb[14].mxu0  ;;  %v341_v63 = vpop.f32.mrb[14].mxu1 }
 0x117   :  { %504 = vst.msk [vmem:[%s894_s3 + $0xc] sm:$0xf] %vm500_vm4, %v575_v54  ;;  %v352_v2 = vadd.f32 %v309_v62, %v43_v52  ;;  %v360_v3 = vadd.f32 %v341_v63, %v51_v53  ;;  %v311_v4 = vpop.f32.mrb[15].mxu0  ;;  %v343_v5 = vpop.f32.mrb[15].mxu1 }
 0x118   :  { %v385_v60 = vld [vmem:[#allocation2 + $0x20] sm:$0xff]  ;;  %512 = vst.msk [vmem:[%s894_s3 + $0x2c] sm:$0xf] %vm500_vm4, %v583_v55 }
 0x119   :  { %v393_v61 = vld [vmem:[#allocation2 + $0x60] sm:$0xff]  ;;  %v408_v0 = vadd.f32 %v797_v50, %v385_v60  ;;  %368 = vst.msk [vmem:[#allocation2 + $0x30] sm:$0xff] %vm19_vm0, %v351_v56  ;;  %376 = vst.msk [vmem:[#allocation2 + $0x70] sm:$0xff] %vm19_vm0, %v359_v57  ;;  %v386_v6 = vld [vmem:[#allocation2 + $0x28] sm:$0xff] }
 0x11a   :  { %v416_v1 = vadd.f32 %v797_v50, %v393_v61  ;;  %v394_v7 = vld [vmem:[#allocation2 + $0x68] sm:$0xff]  ;;  %v409_v10 = vadd.f32 %v797_v50, %v386_v6  ;;  %369 = vst.msk [vmem:[#allocation2 + $0x38] sm:$0xff] %vm19_vm0, %v352_v2  ;;  %377 = vst.msk [vmem:[#allocation2 + $0x78] sm:$0xff] %vm19_vm0, %v360_v3 }
 0x11b   :  { %v424_v8 = vmax.f32 %v408_v0, 0.0  ;;  %v417_v11 = vadd.f32 %v797_v50, %v394_v7 }
 0x11c   :  { %v432_v9 = vmax.f32 %v416_v1, 0.0  ;;  %v425_v14 = vmax.f32 %v409_v10, 0.0 }
 0x11d   :  { %v576_v12 = vpack.c.bf16 %v424_v8, %v424_v8  ;;  %v433_v15 = vmax.f32 %v417_v11, 0.0 }
 0x11e   :  { %v584_v13 = vpack.c.bf16 %v432_v9, %v432_v9  ;;  %v577_v16 = vpack.c.bf16 %v425_v14, %v425_v14 }
 0x11f   :  { %505 = vst.msk [vmem:[%s894_s3 + $0x10] sm:$0xf] %vm500_vm4, %v576_v12  ;;  %v585_v17 = vpack.c.bf16 %v433_v15, %v433_v15 }
 0x120   :  { %513 = vst.msk [vmem:[%s894_s3 + $0x30] sm:$0xf] %vm500_vm4, %v584_v13  ;;  %v387_v18 = vld [vmem:[#allocation2 + $0x30] sm:$0xff]  ;;  %506 = vst.msk [vmem:[%s894_s3 + $0x14] sm:$0xf] %vm500_vm4, %v577_v16 }
 0x121   :  { %v395_v19 = vld [vmem:[#allocation2 + $0x70] sm:$0xff]  ;;  %514 = vst.msk [vmem:[%s894_s3 + $0x34] sm:$0xf] %vm500_vm4, %v585_v17  ;;  %v410_v20 = vadd.f32 %v797_v50, %v387_v18  ;;  %v388_v22 = vld [vmem:[#allocation2 + $0x38] sm:$0xff] }
 0x122   :  { %v418_v21 = vadd.f32 %v797_v50, %v395_v19  ;;  %v396_v23 = vld [vmem:[#allocation2 + $0x78] sm:$0xff]  ;;  %v411_v26 = vadd.f32 %v797_v50, %v388_v22 }
 0x123   :  { %v426_v24 = vmax.f32 %v410_v20, 0.0  ;;  %v419_v27 = vadd.f32 %v797_v50, %v396_v23 }
 0x124   :  { %v434_v25 = vmax.f32 %v418_v21, 0.0  ;;  %v427_v30 = vmax.f32 %v411_v26, 0.0 }
 0x125   :  { %v578_v28 = vpack.c.bf16 %v426_v24, %v426_v24  ;;  %v435_v31 = vmax.f32 %v419_v27, 0.0 }
 0x126   :  { %v586_v29 = vpack.c.bf16 %v434_v25, %v434_v25  ;;  %v579_v32 = vpack.c.bf16 %v427_v30, %v427_v30 }
 0x127   :  { %507 = vst.msk [vmem:[%s894_s3 + $0x18] sm:$0xf] %vm500_vm4, %v578_v28  ;;  %v587_v33 = vpack.c.bf16 %v435_v31, %v435_v31 }
 0x128   :  { %515 = vst.msk [vmem:[%s894_s3 + $0x38] sm:$0xf] %vm500_vm4, %v586_v29  ;;  %508 = vst.msk [vmem:[%s894_s3 + $0x1c] sm:$0xf] %vm500_vm4, %v579_v32 }
 0x129   :  { %516 = vst.msk [vmem:[%s894_s3 + $0x3c] sm:$0xf] %vm500_vm4, %v587_v33 }

// kernel: _lambda_.28
= control target key start
LH: loop header
LB: loop body
LE: loop exit
PB: predicated region body
PF: predicated region fallthrough
CT: control target
= control target key end

     0   :  { %vm73_vm0 = vcmask 523264   ;;  %s282_s1 = inlined_call_operand.vmem [shape: bf16[64,128], index: 1, kind: input, shape index: {}]   ;;  %s283_s0 = inlined_call_operand.vmem [shape: bf16[32,64], index: 0, kind: input, shape index: {}]   ;;  %s284_s2 = inlined_call_operand.vmem [shape: f32[1,128], index: 2, kind: input, shape index: {}]   ;;  %s285_s3 = inlined_call_operand.vmem [shape: bf16[32,128], index: 3, kind: output, shape index: {}]  }
   0x1   :  { %v229_v0 = vld [vmem:[%s282_s1] sm:$0xff]   ;;  %v230_v1 = vld [vmem:[%s282_s1 + $0x8] sm:$0xff]   ;;  %v231_v2 = vld [vmem:[%s282_s1 + $0x10] sm:$0xff]  }
   0x2   :  { %217 = vmatprep.subr.bf16.mxu0 %v229_v0  ;;  %v233_v3 = vld [vmem:[%s283_s0] sm:$0xff]   ;;  %v232_v4 = vld [vmem:[%s282_s1 + $0x18] sm:$0xff]   ;;  %v234_v5 = vld [vmem:[%s283_s0 + $0x8] sm:$0xff]  }
   0x3   :  { %218 = vmatpush3.bf16.msra.mxu0 %v229_v0  ;;  %225 = vmatprep.mubr.msk.bf16.mxu0 %vm73_vm0, %v233_v3  ;;  %v191_v6 = vld [vmem:[%s284_s2] ss:$0 sm:$0xff] }
   0x4   :  { %219 = vmatprep.subr.bf16.mxu0 %v230_v1 }
   0x7   :  { %220 = vmatpush3.bf16.msra.mxu0 %v230_v1 }
   0x8   :  { %221 = vmatprep.subr.bf16.mxu0 %v231_v2 }
   0xb   :  { %222 = vmatpush3.bf16.msra.mxu0 %v231_v2 }
   0xc   :  { %223 = vmatprep.subr.bf16.mxu0 %v232_v4 }
   0xf   :  { %224 = vmatpush3.bf16.msra.mxu0 %v232_v4 }
  0x12   :  { %226 = vmatmul.mubr.msk.bf16.vlgmr.msra.gmra.mrb[0].mxu0 %vm73_vm0, %v234_v5 }
  0xe5   :  { %v227_v7 = vpop.f32.mrb[0].mxu0 }
  0xe6   :  { %v153_v8 = vadd.f32 %v227_v7, %v191_v6  ;;  %v114_v9 = vpop.f32.mrb[1].mxu0 }
  0xe7   :  { %v151_v10 = vadd.f32 %v191_v6, %v114_v9  ;;  %v228_v11 = vpop.f32.mrb[2].mxu0 }
  0xe8   :  { %v154_v12 = vadd.f32 %v228_v11, %v191_v6  ;;  %v117_v13 = vpop.f32.mrb[3].mxu0  ;;  %v157_v15 = vmax.f32 %v153_v8, 0.0 }
  0xe9   :  { %v152_v14 = vadd.f32 %v191_v6, %v117_v13  ;;  %v155_v17 = vmax.f32 %v151_v10, 0.0 }
  0xea   :  { %v158_v16 = vmax.f32 %v154_v12, 0.0 }
  0xeb   :  { %v156_v18 = vmax.f32 %v152_v14, 0.0 }
  0xec   :  { %v208_v19 = vpack.c.bf16 %v158_v16, %v157_v15 }
  0xed   :  { %v203_v20 = vpack.c.bf16 %v156_v18, %v155_v17 }
  0xee   :  { %210 = vst [vmem:[%s285_s3 + $0x8] sm:$0xff] %v208_v19  }
  0xef   :  { %204 = vst [vmem:[%s285_s3] sm:$0xff] %v203_v20  }

// kernel: _lambda_.27
= control target key start
LH: loop header
LB: loop body
LE: loop exit
PB: predicated region body
PF: predicated region fallthrough
CT: control target
= control target key end

     0   :  { %v279_v1 = vmov 0   ;;  %vm97_vm0 = vcmask 523264   ;;  %v186_v11 = vlaneseq  ;;  %s345_s1 = inlined_call_operand.vmem [shape: bf16[64,256], index: 1, kind: input, shape index: {}]   ;;  %s346_s0 = inlined_call_operand.vmem [shape: bf16[32,64], index: 0, kind: input, shape index: {}]   ;;  %s347_s2 = inlined_call_operand.vmem [shape: f32[1,256], index: 2, kind: input, shape index: {}]   ;;  %s348_s3 = inlined_call_operand.vmem [shape: bf16[32,256], index: 3, kind: output, shape index: {}]  }
   0x1   :  { %v265_v0 = vld [vmem:[%s345_s1 + $0x4] ss:$8 sps:$4 sm:$0xff]   ;;  %136 = vmatprep.mubr.bf16.mxu0 %v279_v1  ;;  %146 = vmatprep.mubr.bf16.mxu1 %v279_v1  ;;  %v267_v2 = vld [vmem:[%s345_s1] ss:$8 sps:$4 sm:$0xff]   ;;  %v268_v3 = vld [vmem:[%s345_s1 + $0x14] ss:$8 sps:$4 sm:$0xff]  }
   0x2   :  { %104 = vmatprep.subr.bf16.mxu0 %v265_v0  ;;  %256 = vmatprep.subr.bf16.mxu1 %v265_v0  ;;  %v270_v4 = vld [vmem:[%s345_s1 + $0x10] ss:$8 sps:$4 sm:$0xff]   ;;  %v271_v5 = vld [vmem:[%s345_s1 + $0x24] ss:$8 sps:$4 sm:$0xff]   ;;  %v273_v6 = vld [vmem:[%s345_s1 + $0x20] ss:$8 sps:$4 sm:$0xff]  }
   0x3   :  { %105 = vmatpush1.bf16.msra.mxu0 %v267_v2  ;;  %260 = vmatpush1.bf16.msra.mxu1 %v267_v2  ;;  %v274_v7 = vld [vmem:[%s345_s1 + $0x34] ss:$8 sps:$4 sm:$0xff]   ;;  %v276_v8 = vld [vmem:[%s345_s1 + $0x30] ss:$8 sps:$4 sm:$0xff]   ;;  %v277_v9 = vld [vmem:[%s346_s0] sm:$0xff]   ;;  %v187_v12 = vshrl.u32 %v186_v11, 7 }
   0x4   :  { %106 = vmatprep.subr.bf16.mxu0 %v268_v3  ;;  %257 = vmatprep.subr.bf16.mxu1 %v268_v3  ;;  %v278_v10 = vld [vmem:[%s346_s0 + $0x8] sm:$0xff]   ;;  %v184_v14 = vld [vmem:[%s347_s2] sm:$0x3] }
   0x5   :  { %v188_v13 = vsub.s32 0, %v187_v12  ;;  %v192_v15 = vsub.s32 1, %v187_v12 }
   0x7   :  { %107 = vmatpush1.bf16.msra.mxu0 %v270_v4  ;;  %261 = vmatpush1.bf16.msra.mxu1 %v270_v4  ;;  %v189_v16 = vrot.slane %v184_v14, %v188_v13  ;;  %v193_v17 = vrot.slane %v184_v14, %v192_v15 }
   0x8   :  { %108 = vmatprep.subr.bf16.mxu0 %v271_v5  ;;  %258 = vmatprep.subr.bf16.mxu1 %v271_v5 }
   0xb   :  { %109 = vmatpush1.bf16.msra.mxu0 %v273_v6  ;;  %262 = vmatpush1.bf16.msra.mxu1 %v273_v6 }
   0xc   :  { %110 = vmatprep.subr.bf16.mxu0 %v274_v7  ;;  %259 = vmatprep.subr.bf16.mxu1 %v274_v7 }
   0xf   :  { %111 = vmatpush1.bf16.msra.mxu0 %v276_v8  ;;  %263 = vmatpush1.bf16.msra.mxu1 %v276_v8 }
  0x12   :  { %246 = vmatmul.mubr.msk.bf16.vlgmr.msra.gmra.mrb[0].mxu0 %vm97_vm0, %v277_v9  ;;  %247 = vmatmul.mubr.msk.bf16.vlgmr.msra.gmra.mrb[0].mxu1 %vm97_vm0, %v278_v10 }
  0xe5   :  { %v138_v18 = vpop.f32.mrb[0].mxu0  ;;  %v148_v19 = vpop.f32.mrb[0].mxu1 }
  0xe6   :  { %v196_v20 = vadd.f32 %v189_v16, %v138_v18  ;;  %v200_v21 = vadd.f32 %v189_v16, %v148_v19  ;;  %v140_v22 = vpop.f32.mrb[1].mxu0  ;;  %v150_v23 = vpop.f32.mrb[1].mxu1 }
  0xe7   :  { %v197_v24 = vadd.f32 %v193_v17, %v140_v22  ;;  %v201_v25 = vadd.f32 %v193_v17, %v150_v23  ;;  %v142_v26 = vpop.f32.mrb[2].mxu0  ;;  %v152_v27 = vpop.f32.mrb[2].mxu1 }
  0xe8   :  { %v198_v28 = vadd.f32 %v189_v16, %v142_v26  ;;  %v202_v29 = vadd.f32 %v189_v16, %v152_v27  ;;  %v144_v30 = vpop.f32.mrb[3].mxu0  ;;  %v154_v31 = vpop.f32.mrb[3].mxu1 }
  0xe9   :  { %v252_v32 = vpack.c.bf16 %v197_v24, %v196_v20  ;;  %v254_v33 = vpack.c.bf16 %v201_v25, %v200_v21  ;;  %v199_v34 = vadd.f32 %v193_v17, %v144_v30  ;;  %v203_v35 = vadd.f32 %v193_v17, %v154_v31 }
  0xeb   :  { %228 = vst [vmem:[%s348_s3] sm:$0xff] %v252_v32  ;;  %230 = vst [vmem:[%s348_s3 + $0x10] sm:$0xff] %v254_v33  ;;  %v253_v36 = vpack.c.bf16 %v199_v34, %v198_v28  ;;  %v255_v37 = vpack.c.bf16 %v203_v35, %v202_v29 }
  0xed   :  { %229 = vst [vmem:[%s348_s3 + $0x8] sm:$0xff] %v253_v36  ;;  %231 = vst [vmem:[%s348_s3 + $0x18] sm:$0xff] %v255_v37 }

// kernel: _lambda_.29
= control target key start
LH: loop header
LB: loop body
LE: loop exit
PB: predicated region body
PF: predicated region fallthrough
CT: control target
= control target key end

     0   :  { %s1071_s12 = smov 0   ;;  %s1073_s13 = smov 0   ;;  %s1181_s0 = inlined_call_operand.vmem [shape: bf16[32,1152], index: 0, kind: input, shape index: {}]   ;;  %s1182_s1 = inlined_call_operand.vmem [shape: bf16[1152,128], index: 1, kind: input, shape index: {}]   ;;  %s1183_s2 = inlined_call_operand.vmem [shape: f32[1,128], index: 2, kind: input, shape index: {}]   ;;  %s1184_s3 = inlined_call_operand.vmem [shape: bf16[32,128], index: 3, kind: output, shape index: {}]  }
   0x1   :  { %s1075_s14 = smov 0   ;;  %s1077_s15 = smov 0  }
   0x2   :  { %s1079_s16 = smov 0  }
   0x3 LB: > { %s25_s17 = sadd.s32 1, %s1044_s15  ;;  %p48_p1 = scmp.ne.s32.totalorder %s1036_s13, %s1032_s12  ;;  %s1048_s16 = sphi %s1079_s16, %s13_s16   ;;  %s1044_s15 = sphi %s1077_s15, %s1188_s15   ;;  %s1040_s14 = sphi %s1075_s14, %s1187_s14   ;;  %s1036_s13 = sphi %s1073_s13, %s1186_s13   ;;  %s1032_s12 = sphi %s1071_s12, %s1185_s12  }
   0x4   : > { %p26_p0 = scmp.ge.s32.totalorder %s25_s17, 3  ;;  %p49_p2 = scmp.eq.s32.totalorder %s1048_s16, 0 }
   0x5   : > { %s41_s19 = sadd.s32 1, %s1036_s13  ;;  %p808_p5 = scmp.ge.s32.totalorder %s1048_s16, 3 }
   0x6   : > { %s1190_s17 = smov (%p26_p0, %s25_s17), 0  ;;  %p50_p3 = por %p49_p2, %p48_p1 }
   0x7   : > { %s37_s18 = ssub.s32 %s1044_s15, %s1190_s17  ;;  %162 = sbr.rel (%p808_p5) target bundleno = 23 (0x17), region = 20 }
   0x8   : > { %p39_p4 = scmp.eq.s32.totalorder %s37_s18, 0 }
   0xa   : > { %s1106_s20 = scalar_select %p39_p4, %s1036_s13, %s41_s19  }
   0xe   : > { %165 = sbr.rel (!%p50_p3) target bundleno = 23 (0x17), region = 24  ;;  %s167_s21 = sand.u32 (%p50_p3), 1, %s1036_s13  }
   0xf   : > { %s861_s22 = smul.u32 (%p50_p3), 12, %s1044_s15 }
  0x10   : > { %s935_s23 = smul.u32 (%p50_p3), 48, %s167_s21 }
  0x11   : > { %s175_s26 = scalar_lea.vmem (%p50_p3), %s1181_s0, %s861_s22 }
  0x12   : > { %v190_v0 = vld [vmem:[%s175_s26] sm:$0xff] (%p50_p3)  ;;  %v194_v2 = vld [vmem:[%s175_s26 + $0x48] sm:$0xff] (%p50_p3)  ;;  %s169_s27 = scalar_lea.vmem (%p50_p3), [#allocation3], %s935_s23  ;;  %v814_v6 = vld [vmem:[%s175_s26 + $0x50] sm:$0xf] (%p50_p3) }
  0x13   : > { %v192_v1 = vld [vmem:[%s175_s26 + $0x24] sm:$0xff] (%p50_p3)  ;;  %191 = vst [vmem:[%s169_s27] sm:$0xff] (%p50_p3), %v190_v0  ;;  %195 = vst [vmem:[%s169_s27 + $0x18] sm:$0xff] (%p50_p3), %v194_v2  ;;  %v196_v3 = vld [vmem:[%s175_s26 + $0x6c] sm:$0xff] (%p50_p3) }
  0x14   : > { %193 = vst [vmem:[%s169_s27 + $0xc] sm:$0xff] (%p50_p3), %v192_v1  ;;  %v810_v4 = vld [vmem:[%s175_s26 + $0x8] sm:$0xf] (%p50_p3)  ;;  %v812_v5 = vld [vmem:[%s175_s26 + $0x2c] sm:$0xf] (%p50_p3)  ;;  %197 = vst [vmem:[%s169_s27 + $0x24] sm:$0xff] (%p50_p3), %v196_v3 }
  0x15   : > { %811 = vst [vmem:[%s169_s27 + $0x8] sm:$0xf] %v810_v4  ;;  %813 = vst [vmem:[%s169_s27 + $0x14] sm:$0xf] %v812_v5  ;;  %v816_v7 = vld [vmem:[%s175_s26 + $0x74] sm:$0xf] }
  0x16   : > { %815 = vst [vmem:[%s169_s27 + $0x20] sm:$0xf] %v814_v6  ;;  %817 = vst [vmem:[%s169_s27 + $0x2c] sm:$0xf] %v816_v7 }
  0x17 PF: > { %p818_p6 = scmp.ge.s32.totalorder %s1048_s16, 1  ;;  %p229_p7 = scmp.lt.s32.totalorder %s1048_s16, 4 }
  0x19   : > { %p230_p8 = pnand %p818_p6, %p229_p7 }
  0x1a   : > { %s236_s28 = sand.u32 (!%p230_p8), 1, %s1032_s12   ;;  %s275_s29 = smul.u32 (!%p230_p8), 48, %s1040_s14 }
  0x1b   : > { %233 = sbr.rel (%p230_p8) target bundleno = 318 (0x13e), region = 54  ;;  %p820_p10 = scmp.ne.s32.totalorder (!%p230_p8), %s1040_s14, 0 }
  0x1c   : > { %s936_s30 = smul.u32 (!%p230_p8), 48, %s236_s28  ;;  %p276_p9 = scmp.lt.s32.totalorder (!%p230_p8), %s275_s29, 143 }
  0x1e   : > { %s1123_s8 = scalar_lea.vmem (!%p230_p8), [#allocation3], %s936_s30 }
  0x22   : > { %s1192_s29 = smov (!%p276_p9, %s275_s29), 143  ;;  %300 = sbr.rel (%p820_p10) target bundleno = 41 (0x29), region = 62 }
  0x23   : > { %s819_s4 = sshll.u32 %s1192_s29, 2  ;;  %v1050_v8 = vmov (!%p820_p10), 0.0  }
  0x24   : > { %s1121_s7 = scalar_lea.vmem %s1182_s1, %s819_s4  ;;  %301 = vst [vmem:[#allocation2] sm:$0xff] (!%p820_p10), %v1050_v8  ;;  %302 = vst [vmem:[#allocation2 + $0x8] sm:$0xff] (!%p820_p10), %v1050_v8 }
  0x25   : > { %303 = vst [vmem:[#allocation2 + $0x10] sm:$0xff] (!%p820_p10), %v1050_v8  ;;  %304 = vst [vmem:[#allocation2 + $0x18] sm:$0xff] (!%p820_p10), %v1050_v8 }
  0x29 PF: > { %v978_v9 = vld [vmem:[%s1121_s7 + $0x40] sm:$0xff]   ;;  %v981_v12 = vld [vmem:[%s1121_s7 + $0x48] sm:$0xff]   ;;  %v984_v15 = vld [vmem:[%s1121_s7 + $0x50] sm:$0xff]   ;;  %p851_p11 = scmp.ne.s32.totalorder %s1040_s14, 2 }
  0x2a   : > { %v979_v10 = vld [vmem:[%s1121_s7] sm:$0xff]   ;;  %877 = vmatprep.subr.bf16.mxu0 %v978_v9  ;;  %v982_v13 = vld [vmem:[%s1121_s7 + $0x8] sm:$0xff]   ;;  %v985_v16 = vld [vmem:[%s1121_s7 + $0x10] sm:$0xff]  }
  0x2b   : > { %v980_v11 = vld [vmem:[%s1121_s7 + $0x80] sm:$0xff]   ;;  %878 = vmatpush3.bf16.msra.mxu0 %v979_v10  ;;  %v983_v14 = vld [vmem:[%s1121_s7 + $0x88] sm:$0xff]   ;;  %v986_v17 = vld [vmem:[%s1121_s7 + $0x90] sm:$0xff]  }
  0x2c   : > { %915 = vmatprep.subr.bf16.mxu1 %v980_v11  ;;  %879 = vmatprep.subr.bf16.mxu0 %v981_v12  ;;  %v987_v18 = vld [vmem:[%s1121_s7 + $0x58] sm:$0xff]   ;;  %v990_v21 = vld [vmem:[%s1121_s7 + $0x60] sm:$0xff]   ;;  %v993_v24 = vld [vmem:[%s1121_s7 + $0x68] sm:$0xff]  }
  0x2d   : > { %916 = vmatpush3.bf16.msra.mxu1 %v980_v11  ;;  %v988_v19 = vld [vmem:[%s1121_s7 + $0x18] sm:$0xff]   ;;  %v992_v22 = vld [vmem:[%s1121_s7 + $0xa0] sm:$0xff]   ;;  %v995_v25 = vld [vmem:[%s1121_s7 + $0xa8] sm:$0xff]  }
  0x2e   : > { %917 = vmatprep.subr.bf16.mxu1 %v983_v14  ;;  %v989_v20 = vld [vmem:[%s1121_s7 + $0x98] sm:$0xff]   ;;  %v991_v23 = vld [vmem:[%s1121_s7 + $0x20] sm:$0xff]   ;;  %v994_v26 = vld [vmem:[%s1121_s7 + $0x28] sm:$0xff]  }
  0x2f   : > { %880 = vmatpush3.bf16.msra.mxu0 %v982_v13  ;;  %v996_v27 = vld [vmem:[%s1121_s7 + $0x70] sm:$0xff]   ;;  %v999_v30 = vld [vmem:[%s1121_s7 + $0x78] sm:$0xff]   ;;  %v305_v45 = vld [vmem:[#allocation2] sm:$0xff] }
  0x30   : > { %881 = vmatprep.subr.bf16.mxu0 %v984_v15  ;;  %v997_v28 = vld [vmem:[%s1121_s7 + $0x30] sm:$0xff]   ;;  %v1001_v31 = vld [vmem:[%s1121_s7 + $0xb8] sm:$0xff]   ;;  %v306_v50 = vld [vmem:[#allocation2 + $0x8] sm:$0xff] }
  0x31   : > { %918 = vmatpush3.bf16.msra.mxu1 %v983_v14  ;;  %v998_v29 = vld [vmem:[%s1121_s7 + $0xb0] sm:$0xff]   ;;  %v1000_v34 = vld [vmem:[%s1121_s7 + $0x38] sm:$0xff]   ;;  %v852_v5 = vld [vmem:[%s1183_s2] ss:$0 sm:$0xff] (!%p851_p11) }
  0x32   : > { %919 = vmatprep.subr.bf16.mxu1 %v986_v17  ;;  %v1004_v32 = vld [vmem:[%s1123_s8 + $0x4] ss:$12 sps:$4 sm:$0xff]   ;;  %v1005_v33 = vld [vmem:[%s1123_s8 + $0x8] ss:$12 sps:$4 sm:$0xff]   ;;  %v1002_v35 = vld [vmem:[%s1123_s8] ss:$12 sps:$4 sm:$0xff]  }
  0x33   : > { %882 = vmatpush3.bf16.msra.mxu0 %v985_v16  ;;  %573 = vmatprep.mubr.bf16.mxu0 %v1004_v32  ;;  %v1007_v36 = vld [vmem:[%s1123_s8 + $0x1c] ss:$12 sps:$4 sm:$0xff]   ;;  %v1006_v37 = vld [vmem:[%s1123_s8 + $0x20] ss:$12 sps:$4 sm:$0xff]   ;;  %v1009_v38 = vld [vmem:[%s1123_s8 + $0x18] ss:$12 sps:$4 sm:$0xff]  }
  0x34   : > { %883 = vmatprep.subr.bf16.mxu0 %v987_v18  ;;  %931 = vmatprep.mubr.bf16.mxu1 %v1005_v33  ;;  %v307_v59 = vld [vmem:[#allocation2 + $0x10] sm:$0xff]  ;;  %v308_v63 = vld [vmem:[#allocation2 + $0x18] sm:$0xff] }
  0x35   : > { %920 = vmatpush3.bf16.msra.mxu1 %v986_v17 }
  0x36   : > { %921 = vmatprep.subr.bf16.mxu1 %v989_v20 }
  0x37   : > { %884 = vmatpush3.bf16.msra.mxu0 %v988_v19 }
  0x38   : > { %885 = vmatprep.subr.bf16.mxu0 %v990_v21 }
  0x39   : > { %922 = vmatpush3.bf16.msra.mxu1 %v989_v20 }
  0x3a   : > { %923 = vmatprep.subr.bf16.mxu1 %v992_v22 }
  0x3b   : > { %886 = vmatpush3.bf16.msra.mxu0 %v991_v23 }
  0x3c   : > { %887 = vmatprep.subr.bf16.mxu0 %v993_v24 }
  0x3d   : > { %924 = vmatpush3.bf16.msra.mxu1 %v992_v22 }
  0x3e   : > { %925 = vmatprep.subr.bf16.mxu1 %v995_v25 }
  0x3f   : > { %888 = vmatpush3.bf16.msra.mxu0 %v994_v26 }
  0x40   : > { %889 = vmatprep.subr.bf16.mxu0 %v996_v27 }
  0x41   : > { %926 = vmatpush3.bf16.msra.mxu1 %v995_v25 }
  0x42   : > { %927 = vmatprep.subr.bf16.mxu1 %v998_v29 }
  0x43   : > { %890 = vmatpush3.bf16.msra.mxu0 %v997_v28 }
  0x44   : > { %891 = vmatprep.subr.bf16.mxu0 %v999_v30 }
  0x45   : > { %928 = vmatpush3.bf16.msra.mxu1 %v998_v29 }
  0x46   : > { %929 = vmatprep.subr.bf16.mxu1 %v1001_v31 }
  0x47   : > { %892 = vmatpush3.bf16.msra.mxu0 %v1000_v34 }
  0x49   : > { %930 = vmatpush3.bf16.msra.mxu1 %v1001_v31 }
  0x4a   : > { %574 = vmatmul.mubr.bf16.vlgmr.msra.gmra.mrb[0].mxu0 %v1002_v35 }
  0x4b   : > { %581 = vmatprep.mubr.bf16.mxu0 %v1007_v36 }
  0x4c   : > { %932 = vmatmul.mubr.bf16.vlgmr.msra.gmra.mrb[0].mxu1 %v1006_v37 }
  0x52   : > { %582 = vmatmul.mubr.bf16.gmra.mrb[4].mxu0 %v1009_v38 }
 0x11d   : > { %v893_v39 = vpop.f32.mrb[0].mxu0 }
 0x11e   : > { %v894_v40 = vpop.f32.mrb[1].mxu0 }
 0x11f   : > { %v895_v41 = vadd.f32 %v894_v40, %v893_v39  ;;  %v896_v42 = vpop.f32.mrb[2].mxu0  ;;  %v933_v43 = vpop.f32.mrb[0].mxu1 }
 0x120   : > { %v897_v44 = vpop.f32.mrb[3].mxu0  ;;  %v624_v46 = vpop.f32.mrb[1].mxu1 }
 0x121   : > { %v898_v47 = vadd.f32 %v897_v44, %v896_v42  ;;  %v625_v48 = vadd.f32 %v895_v41, %v624_v46  ;;  %v934_v49 = vpop.f32.mrb[2].mxu1 }
 0x122   : > { %v627_v51 = vpop.f32.mrb[3].mxu1 }
 0x123   : > { %v639_v52 = vadd.f32 %v625_v48, %v305_v45  ;;  %v628_v53 = vadd.f32 %v898_v47, %v627_v51 }
 0x125   : > { %643 = vst [vmem:[#allocation2] sm:$0xff] %v639_v52  ;;  %v640_v54 = vadd.f32 %v628_v53, %v306_v50  ;;  %v899_v55 = vpop.f32.mrb[4].mxu0 }
 0x126   : > { %v900_v56 = vpop.f32.mrb[5].mxu0 }
 0x127   : > { %644 = vst [vmem:[#allocation2 + $0x8] sm:$0xff] %v640_v54  ;;  %v901_v57 = vadd.f32 %v900_v56, %v899_v55  ;;  %v902_v58 = vpop.f32.mrb[6].mxu0 }
 0x128   : > { %v903_v60 = vpop.f32.mrb[7].mxu0 }
 0x129   : > { %v633_v61 = vadd.f32 %v933_v43, %v901_v57  ;;  %v904_v62 = vadd.f32 %v903_v60, %v902_v58  ;;  %650 = sbr.rel (%p851_p11) target bundleno = 318 (0x13e), region = 66 }
 0x12b   : > { %v641_v0 = vadd.f32 %v633_v61, %v307_v59  ;;  %v636_v1 = vadd.f32 %v934_v49, %v904_v62 }
 0x12c   : > { %v651_v3 = vld [vmem:[#allocation2] sm:$0xff] (!%p851_p11) }
 0x12d   : > { %645 = vst [vmem:[#allocation2 + $0x10] sm:$0xff] %v641_v0  ;;  %v642_v2 = vadd.f32 %v636_v1, %v308_v63  ;;  %v662_v6 = vadd.f32 (!%p851_p11), %v852_v5, %v651_v3 }
 0x12e   : > { %v652_v4 = vld [vmem:[#allocation2 + $0x8] sm:$0xff] (!%p851_p11) }
 0x12f   : > { %646 = vst [vmem:[#allocation2 + $0x18] sm:$0xff] %v642_v2  ;;  %v663_v7 = vadd.f32 (!%p851_p11), %v852_v5, %v652_v4  ;;  %v666_v12 = vmax.f32 (!%p851_p11), %v662_v6, 0.0 }
 0x131   : > { %v667_v13 = vmax.f32 %v663_v7, 0.0 }
 0x133   : > { %v869_v16 = vpack.c.bf16 %v667_v13, %v666_v12 }
 0x134   : > { %v653_v8 = vld [vmem:[#allocation2 + $0x10] sm:$0xff] }
 0x135   : > { %v664_v10 = vadd.f32 %v852_v5, %v653_v8  ;;  %870 = vst [vmem:[%s1184_s3] sm:$0xff] %v869_v16  }
 0x136   : > { %v654_v9 = vld [vmem:[#allocation2 + $0x18] sm:$0xff] }
 0x137   : > { %v665_v11 = vadd.f32 %v852_v5, %v654_v9  ;;  %v668_v14 = vmax.f32 %v664_v10, 0.0 }
 0x139   : > { %v669_v15 = vmax.f32 %v665_v11, 0.0 }
 0x13b   : > { %v874_v17 = vpack.c.bf16 %v669_v15, %v668_v14 }
 0x13d   : > { %876 = vst [vmem:[%s1184_s3 + $0x8] sm:$0xff] %v874_v17  }
 0x13e PF: > { %s13_s16 = sadd.s32 1, %s1048_s16   ;;  %s1185_s12 = smov %s1036_s13 }
 0x13f   : > { %p10_p12 = scmp.ge.s32.totalorder %s13_s16, 5   ;;  %s1186_s13 = smov %s1106_s20 }
 0x140   : > { %s1187_s14 = smov %s1044_s15  ;;  %s1188_s15 = smov %s1190_s17 }
 0x141   :  { %12 = sbr.rel (!%p10_p12) target bundleno = 3 (0x3), region = 113 }

// kernel: _lambda_.31
= control target key start
LH: loop header
LB: loop body
LE: loop exit
PB: predicated region body
PF: predicated region fallthrough
CT: control target
= control target key end

     0   :  { %s477_s1 = inlined_call_operand.vmem [shape: bf16[256,128], index: 1, kind: input, shape index: {}]   ;;  %s478_s0 = inlined_call_operand.vmem [shape: bf16[32,256], index: 0, kind: input, shape index: {}]   ;;  %s479_s2 = inlined_call_operand.vmem [shape: f32[1,128], index: 2, kind: input, shape index: {}]   ;;  %s480_s3 = inlined_call_operand.vmem [shape: bf16[32,128], index: 3, kind: output, shape index: {}]  }
   0x1   :  { %v366_v0 = vld [vmem:[%s477_s1 + $0x40] sm:$0xff]   ;;  %v368_v2 = vld [vmem:[%s477_s1 + $0x48] sm:$0xff]   ;;  %v370_v4 = vld [vmem:[%s477_s1 + $0x50] sm:$0xff]  }
   0x2   :  { %v367_v1 = vld [vmem:[%s477_s1] sm:$0xff]   ;;  %322 = vmatprep.subr.bf16.mxu0 %v366_v0  ;;  %350 = vmatprep.subr.bf16.mxu1 %v366_v0  ;;  %v369_v3 = vld [vmem:[%s477_s1 + $0x8] sm:$0xff]   ;;  %v371_v5 = vld [vmem:[%s477_s1 + $0x10] sm:$0xff]  }
   0x3   :  { %323 = vmatpush3.bf16.msra.mxu0 %v367_v1  ;;  %358 = vmatpush3.bf16.msra.mxu1 %v367_v1  ;;  %v372_v6 = vld [vmem:[%s477_s1 + $0x58] sm:$0xff]   ;;  %v374_v8 = vld [vmem:[%s477_s1 + $0x60] sm:$0xff]   ;;  %v376_v10 = vld [vmem:[%s477_s1 + $0x68] sm:$0xff]  }
   0x4   :  { %324 = vmatprep.subr.bf16.mxu0 %v368_v2  ;;  %351 = vmatprep.subr.bf16.mxu1 %v368_v2  ;;  %v373_v7 = vld [vmem:[%s477_s1 + $0x18] sm:$0xff]   ;;  %v375_v9 = vld [vmem:[%s477_s1 + $0x20] sm:$0xff]   ;;  %v377_v13 = vld [vmem:[%s477_s1 + $0x28] sm:$0xff]  }
   0x5   :  { %v384_v11 = vld [vmem:[%s478_s0 + $0x4] ss:$8 sps:$4 sm:$0xff]   ;;  %v387_v12 = vld [vmem:[%s478_s0 + $0x14] ss:$8 sps:$4 sm:$0xff]   ;;  %v382_v18 = vld [vmem:[%s478_s0] ss:$8 sps:$4 sm:$0xff]  }
   0x6   :  { %v378_v14 = vld [vmem:[%s477_s1 + $0x70] sm:$0xff]   ;;  %211 = vmatprep.mubr.bf16.mxu0 %v384_v11  ;;  %219 = vmatprep.mubr.bf16.mxu1 %v387_v12  ;;  %v380_v16 = vld [vmem:[%s477_s1 + $0x78] sm:$0xff]   ;;  %v302_v23 = vld [vmem:[%s479_s2] ss:$0 sm:$0xff] }
   0x7   :  { %325 = vmatpush3.bf16.msra.mxu0 %v369_v3  ;;  %359 = vmatpush3.bf16.msra.mxu1 %v369_v3  ;;  %v379_v15 = vld [vmem:[%s477_s1 + $0x30] sm:$0xff]   ;;  %v381_v17 = vld [vmem:[%s477_s1 + $0x38] sm:$0xff]  }
   0x8   :  { %326 = vmatprep.subr.bf16.mxu0 %v370_v4  ;;  %352 = vmatprep.subr.bf16.mxu1 %v370_v4  ;;  %v385_v19 = vld [vmem:[%s478_s0 + $0x10] ss:$8 sps:$4 sm:$0xff]  }
   0xb   :  { %327 = vmatpush3.bf16.msra.mxu0 %v371_v5  ;;  %360 = vmatpush3.bf16.msra.mxu1 %v371_v5 }
   0xc   :  { %328 = vmatprep.subr.bf16.mxu0 %v372_v6  ;;  %353 = vmatprep.subr.bf16.mxu1 %v372_v6 }
   0xf   :  { %329 = vmatpush3.bf16.msra.mxu0 %v373_v7  ;;  %361 = vmatpush3.bf16.msra.mxu1 %v373_v7 }
  0x10   :  { %330 = vmatprep.subr.bf16.mxu0 %v374_v8  ;;  %354 = vmatprep.subr.bf16.mxu1 %v374_v8 }
  0x13   :  { %331 = vmatpush3.bf16.msra.mxu0 %v375_v9  ;;  %362 = vmatpush3.bf16.msra.mxu1 %v375_v9 }
  0x14   :  { %332 = vmatprep.subr.bf16.mxu0 %v376_v10  ;;  %355 = vmatprep.subr.bf16.mxu1 %v376_v10 }
  0x17   :  { %333 = vmatpush3.bf16.msra.mxu0 %v377_v13  ;;  %363 = vmatpush3.bf16.msra.mxu1 %v377_v13 }
  0x18   :  { %334 = vmatprep.subr.bf16.mxu0 %v378_v14  ;;  %356 = vmatprep.subr.bf16.mxu1 %v378_v14 }
  0x1b   :  { %335 = vmatpush3.bf16.msra.mxu0 %v379_v15  ;;  %364 = vmatpush3.bf16.msra.mxu1 %v379_v15 }
  0x1c   :  { %336 = vmatprep.subr.bf16.mxu0 %v380_v16  ;;  %357 = vmatprep.subr.bf16.mxu1 %v380_v16 }
  0x1f   :  { %337 = vmatpush3.bf16.msra.mxu0 %v381_v17  ;;  %365 = vmatpush3.bf16.msra.mxu1 %v381_v17 }
  0x22   :  { %212 = vmatmul.mubr.bf16.vlgmr.msra.gmra.mrb[0].mxu0 %v382_v18  ;;  %220 = vmatmul.mubr.bf16.vlgmr.msra.gmra.mrb[0].mxu1 %v385_v19 }
  0xf5   :  { %v338_v20 = vpop.f32.mrb[0].mxu0  ;;  %v344_v21 = vpop.f32.mrb[0].mxu1 }
  0xf6   :  { %v339_v22 = vpop.f32.mrb[1].mxu0  ;;  %v345_v24 = vpop.f32.mrb[1].mxu1 }
  0xf7   :  { %v340_v25 = vadd.f32 %v339_v22, %v338_v20  ;;  %v346_v26 = vadd.f32 %v345_v24, %v344_v21  ;;  %v341_v27 = vpop.f32.mrb[2].mxu0  ;;  %v347_v28 = vpop.f32.mrb[2].mxu1 }
  0xf8   :  { %v342_v29 = vpop.f32.mrb[3].mxu0  ;;  %v348_v30 = vpop.f32.mrb[3].mxu1 }
  0xf9   :  { %v250_v31 = vadd.f32 %v340_v25, %v302_v23  ;;  %v252_v32 = vadd.f32 %v346_v26, %v302_v23  ;;  %v343_v33 = vadd.f32 %v342_v29, %v341_v27  ;;  %v349_v34 = vadd.f32 %v348_v30, %v347_v28 }
  0xfb   :  { %v251_v35 = vadd.f32 %v343_v33, %v302_v23  ;;  %v253_v36 = vadd.f32 %v349_v34, %v302_v23  ;;  %v254_v37 = vmax.f32 %v250_v31, 0.0  ;;  %v256_v38 = vmax.f32 %v252_v32, 0.0 }
  0xfd   :  { %v255_v39 = vmax.f32 %v251_v35, 0.0  ;;  %v257_v40 = vmax.f32 %v253_v36, 0.0 }
  0xff   :  { %v314_v41 = vpack.c.bf16 %v255_v39, %v254_v37  ;;  %v319_v42 = vpack.c.bf16 %v257_v40, %v256_v38 }
 0x101   :  { %315 = vst [vmem:[%s480_s3] sm:$0xff] %v314_v41   ;;  %321 = vst [vmem:[%s480_s3 + $0x8] sm:$0xff] %v319_v42  }

// kernel: _lambda_.30
= control target key start
LH: loop header
LB: loop body
LE: loop exit
PB: predicated region body
PF: predicated region fallthrough
CT: control target
= control target key end

     0   :  { %v379_v1 = vmov 0   ;;  %v232_v19 = vlaneseq  ;;  %s486_s1 = inlined_call_operand.vmem [shape: bf16[128,256], index: 1, kind: input, shape index: {}]   ;;  %s487_s0 = inlined_call_operand.vmem [shape: bf16[32,128], index: 0, kind: input, shape index: {}]   ;;  %s488_s2 = inlined_call_operand.vmem [shape: f32[1,256], index: 2, kind: input, shape index: {}]   ;;  %s489_s3 = inlined_call_operand.vmem [shape: bf16[32,256], index: 3, kind: input, shape index: {}]   ;;  %s490_s4 = inlined_call_operand.vmem [shape: bf16[32,256], index: 4, kind: output, shape index: {}]  }
   0x1   :  { %v353_v0 = vld [vmem:[%s486_s1 + $0x4] ss:$8 sps:$4 sm:$0xff]   ;;  %182 = vmatprep.mubr.bf16.mxu0 %v379_v1  ;;  %192 = vmatprep.mubr.bf16.mxu1 %v379_v1  ;;  %v355_v2 = vld [vmem:[%s486_s1] ss:$8 sps:$4 sm:$0xff]   ;;  %v356_v3 = vld [vmem:[%s486_s1 + $0x14] ss:$8 sps:$4 sm:$0xff]  }
   0x2   :  { %150 = vmatprep.subr.bf16.mxu0 %v353_v0  ;;  %336 = vmatprep.subr.bf16.mxu1 %v353_v0  ;;  %v358_v4 = vld [vmem:[%s486_s1 + $0x10] ss:$8 sps:$4 sm:$0xff]   ;;  %v359_v5 = vld [vmem:[%s486_s1 + $0x24] ss:$8 sps:$4 sm:$0xff]   ;;  %v361_v6 = vld [vmem:[%s486_s1 + $0x20] ss:$8 sps:$4 sm:$0xff]  }
   0x3   :  { %151 = vmatpush1.bf16.msra.mxu0 %v355_v2  ;;  %344 = vmatpush1.bf16.msra.mxu1 %v355_v2  ;;  %v362_v7 = vld [vmem:[%s486_s1 + $0x34] ss:$8 sps:$4 sm:$0xff]   ;;  %v364_v8 = vld [vmem:[%s486_s1 + $0x30] ss:$8 sps:$4 sm:$0xff]   ;;  %v365_v9 = vld [vmem:[%s486_s1 + $0x44] ss:$8 sps:$4 sm:$0xff]  }
   0x4   :  { %152 = vmatprep.subr.bf16.mxu0 %v356_v3  ;;  %337 = vmatprep.subr.bf16.mxu1 %v356_v3  ;;  %v367_v10 = vld [vmem:[%s486_s1 + $0x40] ss:$8 sps:$4 sm:$0xff]   ;;  %v368_v11 = vld [vmem:[%s486_s1 + $0x54] ss:$8 sps:$4 sm:$0xff]   ;;  %v370_v12 = vld [vmem:[%s486_s1 + $0x50] ss:$8 sps:$4 sm:$0xff]  }
   0x5   :  { %v371_v13 = vld [vmem:[%s486_s1 + $0x64] ss:$8 sps:$4 sm:$0xff]   ;;  %v373_v14 = vld [vmem:[%s486_s1 + $0x60] ss:$8 sps:$4 sm:$0xff]   ;;  %v374_v15 = vld [vmem:[%s486_s1 + $0x74] ss:$8 sps:$4 sm:$0xff]  }
   0x6   :  { %v376_v16 = vld [vmem:[%s486_s1 + $0x70] ss:$8 sps:$4 sm:$0xff]   ;;  %v377_v17 = vld [vmem:[%s487_s0] sm:$0xff]   ;;  %v378_v18 = vld [vmem:[%s487_s0 + $0x8] sm:$0xff]   ;;  %v233_v20 = vshrl.u32 %v232_v19, 7 }
   0x7   :  { %153 = vmatpush1.bf16.msra.mxu0 %v358_v4  ;;  %345 = vmatpush1.bf16.msra.mxu1 %v358_v4  ;;  %v230_v22 = vld [vmem:[%s488_s2] sm:$0x3]  ;;  %v252_v25 = vld [vmem:[%s489_s3 + $0x10] sm:$0xff]  ;;  %v251_v28 = vld [vmem:[%s489_s3 + $0x8] sm:$0xff] }
   0x8   :  { %154 = vmatprep.subr.bf16.mxu0 %v359_v5  ;;  %338 = vmatprep.subr.bf16.mxu1 %v359_v5  ;;  %v234_v21 = vsub.s32 0, %v233_v20  ;;  %v238_v23 = vsub.s32 1, %v233_v20  ;;  %v250_v24 = vld [vmem:[%s489_s3] sm:$0xff]  ;;  %v253_v29 = vld [vmem:[%s489_s3 + $0x18] sm:$0xff]  ;;  %v258_v31 = vunpack.c.l.bf16 %v252_v25  ;;  %v259_v35 = vunpack.c.h.bf16 %v252_v25 }
   0x9   :  { %v254_v30 = vunpack.c.l.bf16 %v250_v24  ;;  %v255_v34 = vunpack.c.h.bf16 %v250_v24  ;;  %v256_v40 = vunpack.c.l.bf16 %v251_v28  ;;  %v260_v41 = vunpack.c.l.bf16 %v253_v29 }
   0xa   :  { %v235_v26 = vrot.slane %v230_v22, %v234_v21  ;;  %v239_v27 = vrot.slane %v230_v22, %v238_v23  ;;  %v257_v46 = vunpack.c.h.bf16 %v251_v28  ;;  %v261_v47 = vunpack.c.h.bf16 %v253_v29 }
   0xb   :  { %155 = vmatpush1.bf16.msra.mxu0 %v361_v6  ;;  %346 = vmatpush1.bf16.msra.mxu1 %v361_v6 }
   0xc   :  { %156 = vmatprep.subr.bf16.mxu0 %v362_v7  ;;  %339 = vmatprep.subr.bf16.mxu1 %v362_v7 }
   0xf   :  { %157 = vmatpush1.bf16.msra.mxu0 %v364_v8  ;;  %347 = vmatpush1.bf16.msra.mxu1 %v364_v8 }
  0x10   :  { %158 = vmatprep.subr.bf16.mxu0 %v365_v9  ;;  %340 = vmatprep.subr.bf16.mxu1 %v365_v9 }
  0x13   :  { %159 = vmatpush1.bf16.msra.mxu0 %v367_v10  ;;  %348 = vmatpush1.bf16.msra.mxu1 %v367_v10 }
  0x14   :  { %160 = vmatprep.subr.bf16.mxu0 %v368_v11  ;;  %341 = vmatprep.subr.bf16.mxu1 %v368_v11 }
  0x17   :  { %161 = vmatpush1.bf16.msra.mxu0 %v370_v12  ;;  %349 = vmatpush1.bf16.msra.mxu1 %v370_v12 }
  0x18   :  { %162 = vmatprep.subr.bf16.mxu0 %v371_v13  ;;  %342 = vmatprep.subr.bf16.mxu1 %v371_v13 }
  0x1b   :  { %163 = vmatpush1.bf16.msra.mxu0 %v373_v14  ;;  %350 = vmatpush1.bf16.msra.mxu1 %v373_v14 }
  0x1c   :  { %164 = vmatprep.subr.bf16.mxu0 %v374_v15  ;;  %343 = vmatprep.subr.bf16.mxu1 %v374_v15 }
  0x1f   :  { %165 = vmatpush1.bf16.msra.mxu0 %v376_v16  ;;  %351 = vmatpush1.bf16.msra.mxu1 %v376_v16 }
  0x22   :  { %183 = vmatmul.mubr.bf16.vlgmr.msra.gmra.mrb[0].mxu0 %v377_v17  ;;  %193 = vmatmul.mubr.bf16.vlgmr.msra.gmra.mrb[0].mxu1 %v378_v18 }
  0xf5   :  { %v184_v32 = vpop.f32.mrb[0].mxu0  ;;  %v194_v33 = vpop.f32.mrb[0].mxu1 }
  0xf6   :  { %v242_v36 = vadd.f32 %v235_v26, %v184_v32  ;;  %v246_v37 = vadd.f32 %v235_v26, %v194_v33  ;;  %v186_v38 = vpop.f32.mrb[1].mxu0  ;;  %v196_v39 = vpop.f32.mrb[1].mxu1 }
  0xf7   :  { %v243_v42 = vadd.f32 %v239_v27, %v186_v38  ;;  %v247_v43 = vadd.f32 %v239_v27, %v196_v39  ;;  %v188_v44 = vpop.f32.mrb[2].mxu0  ;;  %v198_v45 = vpop.f32.mrb[2].mxu1 }
  0xf8   :  { %v262_v48 = vadd.f32 %v254_v30, %v242_v36  ;;  %v266_v49 = vadd.f32 %v258_v31, %v246_v37  ;;  %v244_v50 = vadd.f32 %v235_v26, %v188_v44  ;;  %v248_v51 = vadd.f32 %v235_v26, %v198_v45  ;;  %v190_v52 = vpop.f32.mrb[3].mxu0  ;;  %v200_v53 = vpop.f32.mrb[3].mxu1 }
  0xf9   :  { %v263_v54 = vadd.f32 %v255_v34, %v243_v42  ;;  %v267_v55 = vadd.f32 %v259_v35, %v247_v43  ;;  %v245_v56 = vadd.f32 %v239_v27, %v190_v52  ;;  %v249_v57 = vadd.f32 %v239_v27, %v200_v53 }
  0xfa   :  { %v270_v58 = vmax.f32 %v262_v48, 0.0  ;;  %v274_v59 = vmax.f32 %v266_v49, 0.0  ;;  %v264_v60 = vadd.f32 %v256_v40, %v244_v50  ;;  %v268_v61 = vadd.f32 %v260_v41, %v248_v51 }
  0xfb   :  { %v271_v62 = vmax.f32 %v263_v54, 0.0  ;;  %v275_v63 = vmax.f32 %v267_v55, 0.0  ;;  %v265_v0 = vadd.f32 %v257_v46, %v245_v56  ;;  %v269_v1 = vadd.f32 %v261_v47, %v249_v57 }
  0xfc   :  { %v272_v2 = vmax.f32 %v264_v60, 0.0  ;;  %v276_v3 = vmax.f32 %v268_v61, 0.0 }
  0xfd   :  { %v332_v4 = vpack.c.bf16 %v271_v62, %v270_v58  ;;  %v334_v5 = vpack.c.bf16 %v275_v63, %v274_v59  ;;  %v273_v6 = vmax.f32 %v265_v0, 0.0  ;;  %v277_v7 = vmax.f32 %v269_v1, 0.0 }
  0xff   :  { %302 = vst [vmem:[%s490_s4] sm:$0xff] %v332_v4  ;;  %304 = vst [vmem:[%s490_s4 + $0x10] sm:$0xff] %v334_v5  ;;  %v333_v8 = vpack.c.bf16 %v273_v6, %v272_v2  ;;  %v335_v9 = vpack.c.bf16 %v277_v7, %v276_v3 }
 0x101   :  { %303 = vst [vmem:[%s490_s4 + $0x8] sm:$0xff] %v333_v8  ;;  %305 = vst [vmem:[%s490_s4 + $0x18] sm:$0xff] %v335_v9 }

// kernel: _lambda_.38
= control target key start
LH: loop header
LB: loop body
LE: loop exit
PB: predicated region body
PF: predicated region fallthrough
CT: control target
= control target key end

     0   :  { %v332_v36 = vlaneseq  ;;  %s663_s1 = inlined_call_operand.vmem [shape: bf16[256,256], index: 1, kind: input, shape index: {}]   ;;  %s664_s0 = inlined_call_operand.vmem [shape: bf16[32,256], index: 0, kind: input, shape index: {}]   ;;  %s665_s2 = inlined_call_operand.vmem [shape: f32[1,256], index: 2, kind: input, shape index: {}]   ;;  %s666_s3 = inlined_call_operand.vmem [shape: bf16[32,256], index: 3, kind: output, shape index: {}]  }
   0x1   :  { %v466_v0 = vld [vmem:[%s663_s1 + $0x4] ss:$8 sps:$4 sm:$0xff]   ;;  %v468_v1 = vld [vmem:[%s663_s1] ss:$8 sps:$4 sm:$0xff]   ;;  %v469_v2 = vld [vmem:[%s663_s1 + $0x14] ss:$8 sps:$4 sm:$0xff]  }
   0x2   :  { %250 = vmatprep.subr.bf16.mxu0 %v466_v0  ;;  %434 = vmatprep.subr.bf16.mxu1 %v466_v0  ;;  %v471_v3 = vld [vmem:[%s663_s1 + $0x10] ss:$8 sps:$4 sm:$0xff]   ;;  %v472_v4 = vld [vmem:[%s663_s1 + $0x24] ss:$8 sps:$4 sm:$0xff]   ;;  %v474_v5 = vld [vmem:[%s663_s1 + $0x20] ss:$8 sps:$4 sm:$0xff]  }
   0x3   :  { %251 = vmatpush1.bf16.msra.mxu0 %v468_v1  ;;  %450 = vmatpush1.bf16.msra.mxu1 %v468_v1  ;;  %v475_v6 = vld [vmem:[%s663_s1 + $0x34] ss:$8 sps:$4 sm:$0xff]   ;;  %v477_v7 = vld [vmem:[%s663_s1 + $0x30] ss:$8 sps:$4 sm:$0xff]   ;;  %v478_v8 = vld [vmem:[%s663_s1 + $0x44] ss:$8 sps:$4 sm:$0xff]  }
   0x4   :  { %252 = vmatprep.subr.bf16.mxu0 %v469_v2  ;;  %435 = vmatprep.subr.bf16.mxu1 %v469_v2  ;;  %v480_v9 = vld [vmem:[%s663_s1 + $0x40] ss:$8 sps:$4 sm:$0xff]   ;;  %v481_v10 = vld [vmem:[%s663_s1 + $0x54] ss:$8 sps:$4 sm:$0xff]   ;;  %v483_v11 = vld [vmem:[%s663_s1 + $0x50] ss:$8 sps:$4 sm:$0xff]  }
   0x5   :  { %v484_v12 = vld [vmem:[%s663_s1 + $0x64] ss:$8 sps:$4 sm:$0xff]   ;;  %v486_v14 = vld [vmem:[%s663_s1 + $0x60] ss:$8 sps:$4 sm:$0xff]   ;;  %v519_v15 = vld [vmem:[%s664_s0 + $0x14] ss:$8 sps:$4 sm:$0xff]  }
   0x6   :  { %v516_v13 = vld [vmem:[%s664_s0 + $0x4] ss:$8 sps:$4 sm:$0xff]   ;;  %v487_v16 = vld [vmem:[%s663_s1 + $0x74] ss:$8 sps:$4 sm:$0xff]   ;;  %292 = vmatprep.mubr.bf16.mxu1 %v519_v15  ;;  %v489_v17 = vld [vmem:[%s663_s1 + $0x70] ss:$8 sps:$4 sm:$0xff]  }
   0x7   :  { %253 = vmatpush1.bf16.msra.mxu0 %v471_v3  ;;  %451 = vmatpush1.bf16.msra.mxu1 %v471_v3  ;;  %v490_v18 = vld [vmem:[%s663_s1 + $0x84] ss:$8 sps:$4 sm:$0xff]   ;;  %v492_v19 = vld [vmem:[%s663_s1 + $0x80] ss:$8 sps:$4 sm:$0xff]   ;;  %v493_v20 = vld [vmem:[%s663_s1 + $0x94] ss:$8 sps:$4 sm:$0xff]  }
   0x8   :  { %254 = vmatprep.subr.bf16.mxu0 %v472_v4  ;;  %436 = vmatprep.subr.bf16.mxu1 %v472_v4  ;;  %v495_v21 = vld [vmem:[%s663_s1 + $0x90] ss:$8 sps:$4 sm:$0xff]   ;;  %v496_v22 = vld [vmem:[%s663_s1 + $0xa4] ss:$8 sps:$4 sm:$0xff]   ;;  %v498_v23 = vld [vmem:[%s663_s1 + $0xa0] ss:$8 sps:$4 sm:$0xff]  }
   0x9   :  { %282 = vmatprep.mubr.bf16.mxu0 %v516_v13  ;;  %v499_v24 = vld [vmem:[%s663_s1 + $0xb4] ss:$8 sps:$4 sm:$0xff]   ;;  %v501_v25 = vld [vmem:[%s663_s1 + $0xb0] ss:$8 sps:$4 sm:$0xff]   ;;  %v502_v26 = vld [vmem:[%s663_s1 + $0xc4] ss:$8 sps:$4 sm:$0xff]  }
   0xa   :  { %v504_v27 = vld [vmem:[%s663_s1 + $0xc0] ss:$8 sps:$4 sm:$0xff]   ;;  %v505_v28 = vld [vmem:[%s663_s1 + $0xd4] ss:$8 sps:$4 sm:$0xff]   ;;  %v507_v29 = vld [vmem:[%s663_s1 + $0xd0] ss:$8 sps:$4 sm:$0xff]  }
   0xb   :  { %255 = vmatpush1.bf16.msra.mxu0 %v474_v5  ;;  %452 = vmatpush1.bf16.msra.mxu1 %v474_v5  ;;  %v508_v30 = vld [vmem:[%s663_s1 + $0xe4] ss:$8 sps:$4 sm:$0xff]   ;;  %v510_v31 = vld [vmem:[%s663_s1 + $0xe0] ss:$8 sps:$4 sm:$0xff]   ;;  %v511_v32 = vld [vmem:[%s663_s1 + $0xf4] ss:$8 sps:$4 sm:$0xff]  }
   0xc   :  { %256 = vmatprep.subr.bf16.mxu0 %v475_v6  ;;  %437 = vmatprep.subr.bf16.mxu1 %v475_v6  ;;  %v513_v33 = vld [vmem:[%s663_s1 + $0xf0] ss:$8 sps:$4 sm:$0xff]   ;;  %v514_v34 = vld [vmem:[%s664_s0] ss:$8 sps:$4 sm:$0xff]   ;;  %v333_v37 = vshrl.u32 %v332_v36, 7 }
   0xd   :  { %v517_v35 = vld [vmem:[%s664_s0 + $0x10] ss:$8 sps:$4 sm:$0xff]   ;;  %v330_v39 = vld [vmem:[%s665_s2] sm:$0x3] }
   0xe   :  { %v334_v38 = vsub.s32 0, %v333_v37  ;;  %v338_v40 = vsub.s32 1, %v333_v37 }
   0xf   :  { %257 = vmatpush1.bf16.msra.mxu0 %v477_v7  ;;  %453 = vmatpush1.bf16.msra.mxu1 %v477_v7 }
  0x10   :  { %258 = vmatprep.subr.bf16.mxu0 %v478_v8  ;;  %438 = vmatprep.subr.bf16.mxu1 %v478_v8  ;;  %v335_v41 = vrot.slane %v330_v39, %v334_v38  ;;  %v339_v42 = vrot.slane %v330_v39, %v338_v40 }
  0x13   :  { %259 = vmatpush1.bf16.msra.mxu0 %v480_v9  ;;  %454 = vmatpush1.bf16.msra.mxu1 %v480_v9 }
  0x14   :  { %260 = vmatprep.subr.bf16.mxu0 %v481_v10  ;;  %439 = vmatprep.subr.bf16.mxu1 %v481_v10 }
  0x17   :  { %261 = vmatpush1.bf16.msra.mxu0 %v483_v11  ;;  %455 = vmatpush1.bf16.msra.mxu1 %v483_v11 }
  0x18   :  { %262 = vmatprep.subr.bf16.mxu0 %v484_v12  ;;  %440 = vmatprep.subr.bf16.mxu1 %v484_v12 }
  0x1b   :  { %263 = vmatpush1.bf16.msra.mxu0 %v486_v14  ;;  %456 = vmatpush1.bf16.msra.mxu1 %v486_v14 }
  0x1c   :  { %264 = vmatprep.subr.bf16.mxu0 %v487_v16  ;;  %441 = vmatprep.subr.bf16.mxu1 %v487_v16 }
  0x1f   :  { %265 = vmatpush1.bf16.msra.mxu0 %v489_v17  ;;  %457 = vmatpush1.bf16.msra.mxu1 %v489_v17 }
  0x20   :  { %266 = vmatprep.subr.bf16.mxu0 %v490_v18  ;;  %442 = vmatprep.subr.bf16.mxu1 %v490_v18 }
  0x23   :  { %267 = vmatpush1.bf16.msra.mxu0 %v492_v19  ;;  %458 = vmatpush1.bf16.msra.mxu1 %v492_v19 }
  0x24   :  { %268 = vmatprep.subr.bf16.mxu0 %v493_v20  ;;  %443 = vmatprep.subr.bf16.mxu1 %v493_v20 }
  0x27   :  { %269 = vmatpush1.bf16.msra.mxu0 %v495_v21  ;;  %459 = vmatpush1.bf16.msra.mxu1 %v495_v21 }
  0x28   :  { %270 = vmatprep.subr.bf16.mxu0 %v496_v22  ;;  %444 = vmatprep.subr.bf16.mxu1 %v496_v22 }
  0x2b   :  { %271 = vmatpush1.bf16.msra.mxu0 %v498_v23  ;;  %460 = vmatpush1.bf16.msra.mxu1 %v498_v23 }
  0x2c   :  { %272 = vmatprep.subr.bf16.mxu0 %v499_v24  ;;  %445 = vmatprep.subr.bf16.mxu1 %v499_v24 }
  0x2f   :  { %273 = vmatpush1.bf16.msra.mxu0 %v501_v25  ;;  %461 = vmatpush1.bf16.msra.mxu1 %v501_v25 }
  0x30   :  { %274 = vmatprep.subr.bf16.mxu0 %v502_v26  ;;  %446 = vmatprep.subr.bf16.mxu1 %v502_v26 }
  0x33   :  { %275 = vmatpush1.bf16.msra.mxu0 %v504_v27  ;;  %462 = vmatpush1.bf16.msra.mxu1 %v504_v27 }
  0x34   :  { %276 = vmatprep.subr.bf16.mxu0 %v505_v28  ;;  %447 = vmatprep.subr.bf16.mxu1 %v505_v28 }
  0x37   :  { %277 = vmatpush1.bf16.msra.mxu0 %v507_v29  ;;  %463 = vmatpush1.bf16.msra.mxu1 %v507_v29 }
  0x38   :  { %278 = vmatprep.subr.bf16.mxu0 %v508_v30  ;;  %448 = vmatprep.subr.bf16.mxu1 %v508_v30 }
  0x3b   :  { %279 = vmatpush1.bf16.msra.mxu0 %v510_v31  ;;  %464 = vmatpush1.bf16.msra.mxu1 %v510_v31 }
  0x3c   :  { %280 = vmatprep.subr.bf16.mxu0 %v511_v32  ;;  %449 = vmatprep.subr.bf16.mxu1 %v511_v32 }
  0x3f   :  { %281 = vmatpush1.bf16.msra.mxu0 %v513_v33  ;;  %465 = vmatpush1.bf16.msra.mxu1 %v513_v33 }
  0x42   :  { %283 = vmatmul.mubr.bf16.vlgmr.msra.gmra.mrb[0].mxu0 %v514_v34  ;;  %293 = vmatmul.mubr.bf16.vlgmr.msra.gmra.mrb[0].mxu1 %v517_v35 }
 0x115   :  { %v284_v43 = vpop.f32.mrb[0].mxu0  ;;  %v294_v44 = vpop.f32.mrb[0].mxu1 }
 0x116   :  { %v342_v45 = vadd.f32 %v335_v41, %v284_v43  ;;  %v346_v46 = vadd.f32 %v335_v41, %v294_v44  ;;  %v286_v47 = vpop.f32.mrb[1].mxu0  ;;  %v296_v48 = vpop.f32.mrb[1].mxu1 }
 0x117   :  { %v343_v49 = vadd.f32 %v339_v42, %v286_v47  ;;  %v347_v50 = vadd.f32 %v339_v42, %v296_v48  ;;  %v288_v51 = vpop.f32.mrb[2].mxu0  ;;  %v298_v52 = vpop.f32.mrb[2].mxu1 }
 0x118   :  { %v350_v53 = vmax.f32 %v342_v45, 0.0  ;;  %v354_v54 = vmax.f32 %v346_v46, 0.0  ;;  %v344_v55 = vadd.f32 %v335_v41, %v288_v51  ;;  %v348_v56 = vadd.f32 %v335_v41, %v298_v52  ;;  %v290_v57 = vpop.f32.mrb[3].mxu0  ;;  %v300_v58 = vpop.f32.mrb[3].mxu1 }
 0x119   :  { %v351_v59 = vmax.f32 %v343_v49, 0.0  ;;  %v355_v60 = vmax.f32 %v347_v50, 0.0  ;;  %v345_v61 = vadd.f32 %v339_v42, %v290_v57  ;;  %v349_v62 = vadd.f32 %v339_v42, %v300_v58 }
 0x11a   :  { %v352_v63 = vmax.f32 %v344_v55, 0.0  ;;  %v356_v0 = vmax.f32 %v348_v56, 0.0 }
 0x11b   :  { %v430_v1 = vpack.c.bf16 %v351_v59, %v350_v53  ;;  %v432_v2 = vpack.c.bf16 %v355_v60, %v354_v54  ;;  %v353_v3 = vmax.f32 %v345_v61, 0.0  ;;  %v357_v4 = vmax.f32 %v349_v62, 0.0 }
 0x11d   :  { %382 = vst [vmem:[%s666_s3] sm:$0xff] %v430_v1  ;;  %384 = vst [vmem:[%s666_s3 + $0x10] sm:$0xff] %v432_v2  ;;  %v431_v5 = vpack.c.bf16 %v353_v3, %v352_v63  ;;  %v433_v6 = vpack.c.bf16 %v357_v4, %v356_v0 }
 0x11f   :  { %383 = vst [vmem:[%s666_s3 + $0x8] sm:$0xff] %v431_v5  ;;  %385 = vst [vmem:[%s666_s3 + $0x18] sm:$0xff] %v433_v6 }

// kernel: _lambda_.39
= control target key start
LH: loop header
LB: loop body
LE: loop exit
PB: predicated region body
PF: predicated region fallthrough
CT: control target
= control target key end

     0   :  { %s1499_s12 = smov 0   ;;  %s1501_s13 = smov 0   ;;  %s1653_s0 = inlined_call_operand.vmem [shape: bf16[8,2304], index: 0, kind: input, shape index: {}]   ;;  %s1654_s1 = inlined_call_operand.vmem [shape: bf16[2304,256], index: 1, kind: input, shape index: {}]   ;;  %s1655_s2 = inlined_call_operand.vmem [shape: f32[1,256], index: 2, kind: input, shape index: {}]   ;;  %s1656_s3 = inlined_call_operand.vmem [shape: bf16[8,256], index: 3, kind: output, shape index: {}]  }
   0x1   :  { %s1503_s14 = smov 0  }
   0x2 LB: > { %s25_s15 = sadd.s32 1, %s1472_s13  ;;  %p1164_p0 = scmp.ge.s32.totalorder %s1476_s14, 1  ;;  %s1476_s14 = sphi %s1503_s14, %s13_s14   ;;  %s1472_s13 = sphi %s1501_s13, %s1658_s13   ;;  %s1468_s12 = sphi %s1499_s12, %s1657_s12  }
   0x3   : > { %p26_p1 = scmp.ge.s32.totalorder %s25_s15, 3  ;;  %p194_p2 = scmp.lt.s32.totalorder %s1476_s14, 4 }
   0x5   : > { %s1660_s15 = smov (%p26_p1, %s25_s15), 0  ;;  %p195_p3 = pnand %p1164_p0, %p194_p2 }
   0x6   : > { %s240_s16 = smul.u32 (!%p195_p3), 6, %s1468_s12  ;;  %p1168_p6 = scmp.ne.s32.totalorder (!%p195_p3), %s1468_s12, 0 }
   0x7   : > { %198 = sbr.rel (%p195_p3) target bundleno = 385 (0x181), region = 32 }
   0x8   : > { %s250_s17 = smul.u32 (!%p195_p3), 96, %s1468_s12  ;;  %p243_p4 = scmp.lt.s32.totalorder (!%p195_p3), %s240_s16, 17 }
   0xa   : > { %p252_p5 = scmp.lt.s32.totalorder (!%p195_p3), %s250_s17, 287 }
   0xe   : > { %s1662_s16 = smov (!%p243_p4, %s240_s16), 17  ;;  %s1664_s17 = smov (!%p252_p5, %s250_s17), 287 }
   0xf   : > { %s1165_s18 = sshll.u32 %s1662_s16, 2  ;;  %s1277_s22 = sshll.u32 %s1664_s17, 3  ;;  %v1478_v0 = vmov (!%p1168_p6), 0.0  }
  0x10   : > { %s1524_s21 = scalar_lea.vmem %s1653_s0, %s1165_s18  ;;  %s1529_s25 = scalar_lea.vmem %s1654_s1, %s1277_s22  ;;  %281 = vst [vmem:[#allocation2] sm:$0xff] (!%p1168_p6), %v1478_v0  ;;  %282 = vst [vmem:[#allocation2 + $0x8] sm:$0xff] (!%p1168_p6), %v1478_v0 }
  0x11   : > { %280 = sbr.rel (%p1168_p6) target bundleno = 24 (0x18), region = 36 }
  0x18 PF: > { %v1304_v1 = vld [vmem:[%s1529_s25 + $0x4] ss:$8 sps:$4 sm:$0xff]   ;;  %v1308_v3 = vld [vmem:[%s1529_s25] ss:$8 sps:$4 sm:$0xff]   ;;  %v1310_v5 = vld [vmem:[%s1529_s25 + $0x14] ss:$8 sps:$4 sm:$0xff]  }
  0x19   : > { %v1306_v2 = vld [vmem:[%s1529_s25 + $0x104] ss:$8 sps:$4 sm:$0xff]   ;;  %885 = vmatprep.subr.bf16.mxu0 %v1304_v1  ;;  %v1309_v4 = vld [vmem:[%s1529_s25 + $0x100] ss:$8 sps:$4 sm:$0xff]   ;;  %v1312_v6 = vld [vmem:[%s1529_s25 + $0x114] ss:$8 sps:$4 sm:$0xff]  }
  0x1a   : > { %926 = vmatprep.subr.bf16.mxu1 %v1306_v2  ;;  %886 = vmatpush1.bf16.msra.mxu0 %v1308_v3  ;;  %v1314_v7 = vld [vmem:[%s1529_s25 + $0x10] ss:$8 sps:$4 sm:$0xff]   ;;  %v1316_v9 = vld [vmem:[%s1529_s25 + $0x24] ss:$8 sps:$4 sm:$0xff]   ;;  %v1320_v11 = vld [vmem:[%s1529_s25 + $0x20] ss:$8 sps:$4 sm:$0xff]  }
  0x1b   : > { %927 = vmatpush1.bf16.msra.mxu1 %v1309_v4  ;;  %887 = vmatprep.subr.bf16.mxu0 %v1310_v5  ;;  %v1315_v8 = vld [vmem:[%s1529_s25 + $0x110] ss:$8 sps:$4 sm:$0xff]   ;;  %v1318_v10 = vld [vmem:[%s1529_s25 + $0x124] ss:$8 sps:$4 sm:$0xff]   ;;  %v1321_v12 = vld [vmem:[%s1529_s25 + $0x120] ss:$8 sps:$4 sm:$0xff]  }
  0x1c   : > { %928 = vmatprep.subr.bf16.mxu1 %v1312_v6  ;;  %v1322_v13 = vld [vmem:[%s1529_s25 + $0x34] ss:$8 sps:$4 sm:$0xff]   ;;  %v1326_v15 = vld [vmem:[%s1529_s25 + $0x30] ss:$8 sps:$4 sm:$0xff]   ;;  %v1328_v17 = vld [vmem:[%s1529_s25 + $0x44] ss:$8 sps:$4 sm:$0xff]  }
  0x1d   : > { %v1324_v14 = vld [vmem:[%s1529_s25 + $0x134] ss:$8 sps:$4 sm:$0xff]   ;;  %v1327_v16 = vld [vmem:[%s1529_s25 + $0x130] ss:$8 sps:$4 sm:$0xff]   ;;  %v1330_v18 = vld [vmem:[%s1529_s25 + $0x144] ss:$8 sps:$4 sm:$0xff]  }
  0x1e   : > { %888 = vmatpush1.bf16.msra.mxu0 %v1314_v7  ;;  %v1332_v19 = vld [vmem:[%s1529_s25 + $0x40] ss:$8 sps:$4 sm:$0xff]   ;;  %v1334_v21 = vld [vmem:[%s1529_s25 + $0x54] ss:$8 sps:$4 sm:$0xff]   ;;  %v1338_v23 = vld [vmem:[%s1529_s25 + $0x50] ss:$8 sps:$4 sm:$0xff]  }
  0x1f   : > { %929 = vmatpush1.bf16.msra.mxu1 %v1315_v8  ;;  %889 = vmatprep.subr.bf16.mxu0 %v1316_v9  ;;  %v1333_v20 = vld [vmem:[%s1529_s25 + $0x140] ss:$8 sps:$4 sm:$0xff]   ;;  %v1336_v22 = vld [vmem:[%s1529_s25 + $0x154] ss:$8 sps:$4 sm:$0xff]   ;;  %v1339_v24 = vld [vmem:[%s1529_s25 + $0x150] ss:$8 sps:$4 sm:$0xff]  }
  0x20   : > { %930 = vmatprep.subr.bf16.mxu1 %v1318_v10  ;;  %v1340_v25 = vld [vmem:[%s1529_s25 + $0x64] ss:$8 sps:$4 sm:$0xff]   ;;  %v1344_v27 = vld [vmem:[%s1529_s25 + $0x60] ss:$8 sps:$4 sm:$0xff]   ;;  %v1346_v29 = vld [vmem:[%s1529_s25 + $0x74] ss:$8 sps:$4 sm:$0xff]  }
  0x21   : > { %v1342_v26 = vld [vmem:[%s1529_s25 + $0x164] ss:$8 sps:$4 sm:$0xff]   ;;  %v1345_v28 = vld [vmem:[%s1529_s25 + $0x160] ss:$8 sps:$4 sm:$0xff]   ;;  %v1348_v30 = vld [vmem:[%s1529_s25 + $0x174] ss:$8 sps:$4 sm:$0xff]  }
  0x22   : > { %890 = vmatpush1.bf16.msra.mxu0 %v1320_v11  ;;  %v1350_v31 = vld [vmem:[%s1529_s25 + $0x70] ss:$8 sps:$4 sm:$0xff]   ;;  %v1352_v33 = vld [vmem:[%s1529_s25 + $0x84] ss:$8 sps:$4 sm:$0xff]   ;;  %v1356_v35 = vld [vmem:[%s1529_s25 + $0x80] ss:$8 sps:$4 sm:$0xff]  }
  0x23   : > { %931 = vmatpush1.bf16.msra.mxu1 %v1321_v12  ;;  %891 = vmatprep.subr.bf16.mxu0 %v1322_v13  ;;  %v1351_v32 = vld [vmem:[%s1529_s25 + $0x170] ss:$8 sps:$4 sm:$0xff]   ;;  %v1354_v34 = vld [vmem:[%s1529_s25 + $0x184] ss:$8 sps:$4 sm:$0xff]   ;;  %v1357_v36 = vld [vmem:[%s1529_s25 + $0x180] ss:$8 sps:$4 sm:$0xff]  }
  0x24   : > { %932 = vmatprep.subr.bf16.mxu1 %v1324_v14  ;;  %v1358_v37 = vld [vmem:[%s1529_s25 + $0x94] ss:$8 sps:$4 sm:$0xff]   ;;  %v1362_v39 = vld [vmem:[%s1529_s25 + $0x90] ss:$8 sps:$4 sm:$0xff]   ;;  %v1364_v41 = vld [vmem:[%s1529_s25 + $0xa4] ss:$8 sps:$4 sm:$0xff]  }
  0x25   : > { %v1360_v38 = vld [vmem:[%s1529_s25 + $0x194] ss:$8 sps:$4 sm:$0xff]   ;;  %v1363_v40 = vld [vmem:[%s1529_s25 + $0x190] ss:$8 sps:$4 sm:$0xff]   ;;  %v1366_v42 = vld [vmem:[%s1529_s25 + $0x1a4] ss:$8 sps:$4 sm:$0xff]  }
  0x26   : > { %892 = vmatpush1.bf16.msra.mxu0 %v1326_v15  ;;  %v1368_v43 = vld [vmem:[%s1529_s25 + $0xa0] ss:$8 sps:$4 sm:$0xff]   ;;  %v1370_v45 = vld [vmem:[%s1529_s25 + $0xb4] ss:$8 sps:$4 sm:$0xff]   ;;  %v1374_v50 = vld [vmem:[%s1529_s25 + $0xb0] ss:$8 sps:$4 sm:$0xff]  }
  0x27   : > { %933 = vmatpush1.bf16.msra.mxu1 %v1327_v16  ;;  %893 = vmatprep.subr.bf16.mxu0 %v1328_v17  ;;  %v1369_v44 = vld [vmem:[%s1529_s25 + $0x1a0] ss:$8 sps:$4 sm:$0xff]   ;;  %v1372_v46 = vld [vmem:[%s1529_s25 + $0x1b4] ss:$8 sps:$4 sm:$0xff]   ;;  %v1375_v51 = vld [vmem:[%s1529_s25 + $0x1b0] ss:$8 sps:$4 sm:$0xff]  }
  0x28   : > { %934 = vmatprep.subr.bf16.mxu1 %v1330_v18  ;;  %v285_v47 = vld [vmem:[%s1524_s21] sm:$0xff]  ;;  %v286_v49 = vld [vmem:[%s1524_s21 + $0x8] sm:$0xff]  ;;  %v1382_v57 = vld [vmem:[%s1529_s25 + $0xd4] ss:$8 sps:$4 sm:$0xff]   ;;  %p1271_p7 = scmp.ne.s32.totalorder %s1468_s12, 2 }
  0x29   : > { %v1170_v48 = vcombine.high %v285_v47, %v285_v47  ;;  %v1172_v52 = vcombine.high %v286_v49, %v286_v49  ;;  %v1376_v53 = vld [vmem:[%s1529_s25 + $0xc4] ss:$8 sps:$4 sm:$0xff]   ;;  %v1380_v55 = vld [vmem:[%s1529_s25 + $0xc0] ss:$8 sps:$4 sm:$0xff]   ;;  %v1384_v58 = vld [vmem:[%s1529_s25 + $0x1d4] ss:$8 sps:$4 sm:$0xff]   ;;  %v1169_v6 = vcombine.low %v285_v47, %v285_v47  ;;  %v1171_v7 = vcombine.low %v286_v49, %v286_v49 }
  0x2a   : > { %894 = vmatpush1.bf16.msra.mxu0 %v1332_v19  ;;  %v1378_v54 = vld [vmem:[%s1529_s25 + $0x1c4] ss:$8 sps:$4 sm:$0xff]   ;;  %v1381_v56 = vld [vmem:[%s1529_s25 + $0x1c0] ss:$8 sps:$4 sm:$0xff]   ;;  %v1386_v59 = vld [vmem:[%s1529_s25 + $0xd0] ss:$8 sps:$4 sm:$0xff]  }
  0x2b   : > { %935 = vmatpush1.bf16.msra.mxu1 %v1333_v20  ;;  %895 = vmatprep.subr.bf16.mxu0 %v1334_v21  ;;  %v1387_v60 = vld [vmem:[%s1529_s25 + $0x1d0] ss:$8 sps:$4 sm:$0xff]   ;;  %v1388_v61 = vld [vmem:[%s1529_s25 + $0xe4] ss:$8 sps:$4 sm:$0xff]   ;;  %v1392_v63 = vld [vmem:[%s1529_s25 + $0xe0] ss:$8 sps:$4 sm:$0xff]  }
  0x2c   : > { %936 = vmatprep.subr.bf16.mxu1 %v1336_v22  ;;  %917 = vmatprep.mubr.bf16.mxu0 %v1170_v48  ;;  %v1390_v62 = vld [vmem:[%s1529_s25 + $0x1e4] ss:$8 sps:$4 sm:$0xff]   ;;  %v1393_v0 = vld [vmem:[%s1529_s25 + $0x1e0] ss:$8 sps:$4 sm:$0xff]   ;;  %v1394_v1 = vld [vmem:[%s1529_s25 + $0xf4] ss:$8 sps:$4 sm:$0xff]  }
  0x2d   : > { %958 = vmatprep.mubr.bf16.mxu1 %v1172_v52  ;;  %v1396_v2 = vld [vmem:[%s1529_s25 + $0x1f4] ss:$8 sps:$4 sm:$0xff]   ;;  %v1398_v3 = vld [vmem:[%s1529_s25 + $0xf0] ss:$8 sps:$4 sm:$0xff]   ;;  %v1406_v5 = vld [vmem:[%s1529_s25 + $0x204] ss:$8 sps:$4 sm:$0xff]  }
  0x2e   : > { %896 = vmatpush1.bf16.msra.mxu0 %v1338_v23  ;;  %v1399_v4 = vld [vmem:[%s1529_s25 + $0x1f0] ss:$8 sps:$4 sm:$0xff]   ;;  %v1404_v8 = vld [vmem:[%s1529_s25 + $0x200] ss:$8 sps:$4 sm:$0xff]   ;;  %v1409_v10 = vld [vmem:[%s1529_s25 + $0x214] ss:$8 sps:$4 sm:$0xff]  }
  0x2f   : > { %937 = vmatpush1.bf16.msra.mxu1 %v1339_v24  ;;  %897 = vmatprep.subr.bf16.mxu0 %v1340_v25  ;;  %v1601_v9 = vld [vmem:[%s1524_s21 + $0x10] sm:$0xff]  ;;  %v1412_v13 = vld [vmem:[%s1529_s25 + $0x224] ss:$8 sps:$4 sm:$0xff]   ;;  %v1410_v14 = vld [vmem:[%s1529_s25 + $0x220] ss:$8 sps:$4 sm:$0xff]  }
  0x30   : > { %938 = vmatprep.subr.bf16.mxu1 %v1342_v26  ;;  %v1174_v11 = vcombine.high %v1601_v9, %v1601_v9  ;;  %v1407_v12 = vld [vmem:[%s1529_s25 + $0x210] ss:$8 sps:$4 sm:$0xff]   ;;  %v1415_v15 = vld [vmem:[%s1529_s25 + $0x234] ss:$8 sps:$4 sm:$0xff]   ;;  %v1418_v17 = vld [vmem:[%s1529_s25 + $0x244] ss:$8 sps:$4 sm:$0xff]  }
  0x31   : > { %v1413_v16 = vld [vmem:[%s1529_s25 + $0x230] ss:$8 sps:$4 sm:$0xff]   ;;  %v1416_v18 = vld [vmem:[%s1529_s25 + $0x240] ss:$8 sps:$4 sm:$0xff]   ;;  %v1421_v19 = vld [vmem:[%s1529_s25 + $0x254] ss:$8 sps:$4 sm:$0xff]  }
  0x32   : > { %898 = vmatpush1.bf16.msra.mxu0 %v1344_v27  ;;  %v1419_v20 = vld [vmem:[%s1529_s25 + $0x250] ss:$8 sps:$4 sm:$0xff]   ;;  %v1424_v21 = vld [vmem:[%s1529_s25 + $0x264] ss:$8 sps:$4 sm:$0xff]   ;;  %v1422_v22 = vld [vmem:[%s1529_s25 + $0x260] ss:$8 sps:$4 sm:$0xff]  }
  0x33   : > { %939 = vmatpush1.bf16.msra.mxu1 %v1345_v28  ;;  %899 = vmatprep.subr.bf16.mxu0 %v1346_v29  ;;  %v1427_v23 = vld [vmem:[%s1529_s25 + $0x274] ss:$8 sps:$4 sm:$0xff]   ;;  %v1425_v24 = vld [vmem:[%s1529_s25 + $0x270] ss:$8 sps:$4 sm:$0xff]   ;;  %v1430_v25 = vld [vmem:[%s1529_s25 + $0x284] ss:$8 sps:$4 sm:$0xff]  }
  0x34   : > { %940 = vmatprep.subr.bf16.mxu1 %v1348_v30  ;;  %v1428_v26 = vld [vmem:[%s1529_s25 + $0x280] ss:$8 sps:$4 sm:$0xff]   ;;  %v1433_v27 = vld [vmem:[%s1529_s25 + $0x294] ss:$8 sps:$4 sm:$0xff]   ;;  %v1431_v28 = vld [vmem:[%s1529_s25 + $0x290] ss:$8 sps:$4 sm:$0xff]  }
  0x35   : > { %v1436_v29 = vld [vmem:[%s1529_s25 + $0x2a4] ss:$8 sps:$4 sm:$0xff]   ;;  %v1434_v30 = vld [vmem:[%s1529_s25 + $0x2a0] ss:$8 sps:$4 sm:$0xff]  }
  0x36   : > { %900 = vmatpush1.bf16.msra.mxu0 %v1350_v31  ;;  %v1439_v31 = vld [vmem:[%s1529_s25 + $0x2b4] ss:$8 sps:$4 sm:$0xff]   ;;  %v283_v52 = vld [vmem:[#allocation2] sm:$0xff] }
  0x37   : > { %941 = vmatpush1.bf16.msra.mxu1 %v1351_v32  ;;  %901 = vmatprep.subr.bf16.mxu0 %v1352_v33  ;;  %v1437_v32 = vld [vmem:[%s1529_s25 + $0x2b0] ss:$8 sps:$4 sm:$0xff]   ;;  %v1442_v33 = vld [vmem:[%s1529_s25 + $0x2c4] ss:$8 sps:$4 sm:$0xff]  }
  0x38   : > { %942 = vmatprep.subr.bf16.mxu1 %v1354_v34  ;;  %v1440_v34 = vld [vmem:[%s1529_s25 + $0x2c0] ss:$8 sps:$4 sm:$0xff]  }
  0x3a   : > { %902 = vmatpush1.bf16.msra.mxu0 %v1356_v35  ;;  %v1445_v35 = vld [vmem:[%s1529_s25 + $0x2d4] ss:$8 sps:$4 sm:$0xff]  }
  0x3b   : > { %943 = vmatpush1.bf16.msra.mxu1 %v1357_v36  ;;  %903 = vmatprep.subr.bf16.mxu0 %v1358_v37  ;;  %v1443_v36 = vld [vmem:[%s1529_s25 + $0x2d0] ss:$8 sps:$4 sm:$0xff]   ;;  %v1448_v37 = vld [vmem:[%s1529_s25 + $0x2e4] ss:$8 sps:$4 sm:$0xff]  }
  0x3c   : > { %944 = vmatprep.subr.bf16.mxu1 %v1360_v38  ;;  %v1446_v38 = vld [vmem:[%s1529_s25 + $0x2e0] ss:$8 sps:$4 sm:$0xff]  }
  0x3e   : > { %904 = vmatpush1.bf16.msra.mxu0 %v1362_v39  ;;  %v1451_v39 = vld [vmem:[%s1529_s25 + $0x2f4] ss:$8 sps:$4 sm:$0xff]  }
  0x3f   : > { %945 = vmatpush1.bf16.msra.mxu1 %v1363_v40  ;;  %905 = vmatprep.subr.bf16.mxu0 %v1364_v41  ;;  %v1449_v40 = vld [vmem:[%s1529_s25 + $0x2f0] ss:$8 sps:$4 sm:$0xff]   ;;  %v1173_v41 = vcombine.low %v1601_v9, %v1601_v9 }
  0x40   : > { %946 = vmatprep.subr.bf16.mxu1 %v1366_v42 }
  0x42   : > { %906 = vmatpush1.bf16.msra.mxu0 %v1368_v43 }
  0x43   : > { %947 = vmatpush1.bf16.msra.mxu1 %v1369_v44  ;;  %907 = vmatprep.subr.bf16.mxu0 %v1370_v45 }
  0x44   : > { %948 = vmatprep.subr.bf16.mxu1 %v1372_v46 }
  0x46   : > { %908 = vmatpush1.bf16.msra.mxu0 %v1374_v50 }
  0x47   : > { %949 = vmatpush1.bf16.msra.mxu1 %v1375_v51  ;;  %909 = vmatprep.subr.bf16.mxu0 %v1376_v53 }
  0x48   : > { %950 = vmatprep.subr.bf16.mxu1 %v1378_v54 }
  0x4a   : > { %910 = vmatpush1.bf16.msra.mxu0 %v1380_v55  ;;  %v284_v55 = vld [vmem:[#allocation2 + $0x8] sm:$0xff] }
  0x4b   : > { %951 = vmatpush1.bf16.msra.mxu1 %v1381_v56  ;;  %911 = vmatprep.subr.bf16.mxu0 %v1382_v57 }
  0x4c   : > { %952 = vmatprep.subr.bf16.mxu1 %v1384_v58 }
  0x4e   : > { %912 = vmatpush1.bf16.msra.mxu0 %v1386_v59 }
  0x4f   : > { %953 = vmatpush1.bf16.msra.mxu1 %v1387_v60  ;;  %913 = vmatprep.subr.bf16.mxu0 %v1388_v61 }
  0x50   : > { %954 = vmatprep.subr.bf16.mxu1 %v1390_v62  ;;  %v1020_v62 = vlaneseq (!%p1271_p7) }
  0x52   : > { %914 = vmatpush1.bf16.msra.mxu0 %v1392_v63  ;;  %v1021_v63 = vshrl.u32 (!%p1271_p7), %v1020_v62, 7 }
  0x53   : > { %955 = vmatpush1.bf16.msra.mxu1 %v1393_v0  ;;  %915 = vmatprep.subr.bf16.mxu0 %v1394_v1  ;;  %v1018_v0 = vld [vmem:[%s1655_s2] sm:$0x3] (!%p1271_p7) }
  0x54   : > { %956 = vmatprep.subr.bf16.mxu1 %v1396_v2  ;;  %v1022_v1 = vsub.s32 (!%p1271_p7), 0, %v1021_v63  ;;  %v1026_v2 = vsub.s32 (!%p1271_p7), 1, %v1021_v63 }
  0x56   : > { %916 = vmatpush1.bf16.msra.mxu0 %v1398_v3 }
  0x57   : > { %957 = vmatpush1.bf16.msra.mxu1 %v1399_v4  ;;  %967 = vmatprep.subr.bf16.mxu0 %v1406_v5  ;;  %v1023_v5 = vrot.slane (!%p1271_p7), %v1018_v0, %v1022_v1 }
  0x59   : > { %918 = vmatmul.mubr.bf16.vlgmr.msra.gmra.mrb[0].mxu0 %v1169_v6  ;;  %v1027_v6 = vrot.slane (!%p1271_p7), %v1018_v0, %v1026_v2 }
  0x5a   : > { %959 = vmatmul.mubr.bf16.vlgmr.msra.gmra.mrb[0].mxu1 %v1171_v7  ;;  %968 = vmatpush1.bf16.msra.mxu0 %v1404_v8 }
  0x5b   : > { %999 = vmatprep.mubr.bf16.mxu0 %v1174_v11  ;;  %969 = vmatprep.subr.bf16.mxu0 %v1409_v10 }
  0x5e   : > { %970 = vmatpush1.bf16.msra.mxu0 %v1407_v12 }
  0x5f   : > { %971 = vmatprep.subr.bf16.mxu0 %v1412_v13 }
  0x62   : > { %972 = vmatpush1.bf16.msra.mxu0 %v1410_v14 }
  0x63   : > { %973 = vmatprep.subr.bf16.mxu0 %v1415_v15 }
  0x66   : > { %974 = vmatpush1.bf16.msra.mxu0 %v1413_v16 }
  0x67   : > { %975 = vmatprep.subr.bf16.mxu0 %v1418_v17 }
  0x6a   : > { %976 = vmatpush1.bf16.msra.mxu0 %v1416_v18 }
  0x6b   : > { %977 = vmatprep.subr.bf16.mxu0 %v1421_v19 }
  0x6e   : > { %978 = vmatpush1.bf16.msra.mxu0 %v1419_v20 }
  0x6f   : > { %979 = vmatprep.subr.bf16.mxu0 %v1424_v21 }
  0x72   : > { %980 = vmatpush1.bf16.msra.mxu0 %v1422_v22 }
  0x73   : > { %981 = vmatprep.subr.bf16.mxu0 %v1427_v23 }
  0x76   : > { %982 = vmatpush1.bf16.msra.mxu0 %v1425_v24 }
  0x77   : > { %983 = vmatprep.subr.bf16.mxu0 %v1430_v25 }
  0x7a   : > { %984 = vmatpush1.bf16.msra.mxu0 %v1428_v26 }
  0x7b   : > { %985 = vmatprep.subr.bf16.mxu0 %v1433_v27 }
  0x7e   : > { %986 = vmatpush1.bf16.msra.mxu0 %v1431_v28 }
  0x7f   : > { %987 = vmatprep.subr.bf16.mxu0 %v1436_v29 }
  0x82   : > { %988 = vmatpush1.bf16.msra.mxu0 %v1434_v30 }
  0x83   : > { %989 = vmatprep.subr.bf16.mxu0 %v1439_v31 }
  0x86   : > { %990 = vmatpush1.bf16.msra.mxu0 %v1437_v32 }
  0x87   : > { %991 = vmatprep.subr.bf16.mxu0 %v1442_v33 }
  0x8a   : > { %992 = vmatpush1.bf16.msra.mxu0 %v1440_v34 }
  0x8b   : > { %993 = vmatprep.subr.bf16.mxu0 %v1445_v35 }
  0x8e   : > { %994 = vmatpush1.bf16.msra.mxu0 %v1443_v36 }
  0x8f   : > { %995 = vmatprep.subr.bf16.mxu0 %v1448_v37 }
  0x92   : > { %996 = vmatpush1.bf16.msra.mxu0 %v1446_v38 }
  0x93   : > { %997 = vmatprep.subr.bf16.mxu0 %v1451_v39 }
  0x96   : > { %998 = vmatpush1.bf16.msra.mxu0 %v1449_v40 }
  0x99   : > { %1000 = vmatmul.mubr.bf16.vlgmr.msra.gmra.mrb[4].mxu0 %v1173_v41 }
 0x12c   : > { %v919_v42 = vpop.f32.mrb[0].mxu0 }
 0x12d   : > { %v960_v43 = vpop.f32.mrb[0].mxu1  ;;  %v921_v45 = vpop.f32.mrb[1].mxu0 }
 0x12e   : > { %v961_v44 = vadd.f32 %v960_v43, %v919_v42  ;;  %v962_v46 = vpop.f32.mrb[1].mxu1  ;;  %v923_v48 = vpop.f32.mrb[2].mxu0 }
 0x12f   : > { %v963_v47 = vadd.f32 %v962_v46, %v921_v45  ;;  %v964_v49 = vpop.f32.mrb[2].mxu1  ;;  %v924_v50 = vpop.f32.mrb[3].mxu0 }
 0x130   : > { %v965_v51 = vpop.f32.mrb[3].mxu1 }
 0x16c   : > { %v1001_v53 = vpop.f32.mrb[4].mxu0  ;;  %1015 = sbr.rel (%p1271_p7) target bundleno = 385 (0x181), region = 40 }
 0x16d   : > { %v1002_v54 = vadd.f32 %v1001_v53, %v961_v44  ;;  %v1003_v56 = vpop.f32.mrb[5].mxu0 }
 0x16e   : > { %v1004_v57 = vadd.f32 %v1003_v56, %v963_v47  ;;  %v1005_v58 = vpop.f32.mrb[6].mxu0 }
 0x16f   : > { %v1008_v59 = vadd.f32 %v1002_v54, %v283_v52  ;;  %v1006_v60 = vpop.f32.mrb[7].mxu0 }
 0x170   : > { %v1009_v61 = vadd.f32 %v1004_v57, %v284_v55 }
 0x171   : > { %1010 = vst [vmem:[#allocation2] sm:$0xff] %v1008_v59 }
 0x172   : > { %1011 = vst [vmem:[#allocation2 + $0x8] sm:$0xff] %v1009_v61 }
 0x178   : > { %v1016_v3 = vld [vmem:[#allocation2] sm:$0xff] }
 0x179   : > { %v1017_v4 = vld [vmem:[#allocation2 + $0x8] sm:$0xff]  ;;  %v1030_v7 = vadd.f32 %v1023_v5, %v1016_v3 }
 0x17a   : > { %v1031_v8 = vadd.f32 %v1027_v6, %v1017_v4 }
 0x17b   : > { %v1032_v9 = vmax.f32 %v1030_v7, 0.0 }
 0x17c   : > { %v1033_v10 = vmax.f32 %v1031_v8, 0.0 }
 0x17e   : > { %v1278_v11 = vpack.c.bf16 %v1033_v10, %v1032_v9 }
 0x180   : > { %1042 = vst [vmem:[%s1656_s3] sm:$0xff] %v1278_v11 }
 0x181 PF: > { %s13_s14 = sadd.s32 1, %s1476_s14   ;;  %s1657_s12 = smov %s1472_s13 }
 0x182   : > { %p10_p8 = scmp.ge.s32.totalorder %s13_s14, 5   ;;  %s1658_s13 = smov %s1660_s15 }
 0x184   :  { %12 = sbr.rel (!%p10_p8) target bundleno = 2 (0x2), region = 76 }

// kernel: _lambda_.40
= control target key start
LH: loop header
LB: loop body
LE: loop exit
PB: predicated region body
PF: predicated region fallthrough
CT: control target
= control target key end

     0   :  { %s1123_s15 = smov 0   ;;  %s1125_s16 = smov 0   ;;  %s1305_s0 = inlined_call_operand.vmem [shape: bf16[8,256], index: 0, kind: input, shape index: {}]   ;;  %s1306_s1 = inlined_call_operand.vmem [shape: bf16[256,512], index: 1, kind: input, shape index: {}]   ;;  %s1307_s2 = inlined_call_operand.vmem [shape: f32[1,512], index: 2, kind: input, shape index: {}]   ;;  %s1308_s3 = inlined_call_operand.vmem [shape: bf16[8,512], index: 3, kind: input, shape index: {}]   ;;  %s1309_s4 = inlined_call_operand.vmem [shape: bf16[8,512], index: 4, kind: output, shape index: {}]  }
   0x1   :  { %s1127_s17 = smov 0   ;;  %s1129_s18 = smov 0  }
   0x2   :  { %s1131_s19 = smov 0  }
   0x3 LB: > { %s29_s20 = sadd.s32 1, %s1092_s18  ;;  %p77_p1 = scmp.ne.s32.totalorder %s1084_s16, %s1080_s15  ;;  %s1096_s19 = sphi %s1131_s19, %s14_s19   ;;  %s1092_s18 = sphi %s1129_s18, %s1313_s18   ;;  %s1088_s17 = sphi %s1127_s17, %s1312_s17   ;;  %s1084_s16 = sphi %s1125_s16, %s1311_s16   ;;  %s1080_s15 = sphi %s1123_s15, %s1310_s15  }
   0x4   : > { %p31_p0 = scmp.ge.s32.totalorder %s29_s20, 2  ;;  %p78_p2 = scmp.eq.s32.totalorder %s1096_s19, 0 }
   0x5   : > { %s70_s22 = sadd.s32 1, %s1084_s16  ;;  %p918_p5 = scmp.ge.s32.totalorder %s1096_s19, 2 }
   0x6   : > { %s1315_s20 = smov (%p31_p0, %s29_s20), 0  ;;  %p79_p3 = por %p78_p2, %p77_p1 }
   0x7   : > { %s66_s21 = ssub.s32 %s1092_s18, %s1315_s20  ;;  %198 = sbr.rel (%p918_p5) target bundleno = 34 (0x22), region = 20 }
   0x8   : > { %p68_p4 = scmp.eq.s32.totalorder %s66_s21, 0 }
   0xa   : > { %s1158_s23 = scalar_select %p68_p4, %s1084_s16, %s70_s22  }
   0xe   : > { %201 = sbr.rel (!%p79_p3) target bundleno = 34 (0x22), region = 24  ;;  %s203_s24 = sand.u32 (%p79_p3), 1, %s1084_s16  }
   0xf   : > { %s966_s25 = sshll.u32 (%p79_p3), %s1092_s18, 3  ;;  %s919_s26 = sshll.u32 (%p79_p3), %s203_s24, 8 }
  0x10   : > { %s1166_s29 = scalar_lea.vmem (%p79_p3), %s1306_s1, %s966_s25  ;;  %s1171_s30 = scalar_lea.vmem (%p79_p3), [#allocation3], %s919_s26 }
  0x11   : > { %v301_v0 = vld [vmem:[%s1166_s29] sm:$0xff] (%p79_p3)  ;;  %v303_v1 = vld [vmem:[%s1166_s29 + $0x10] sm:$0xff] (%p79_p3) }
  0x12   : > { %v305_v2 = vld [vmem:[%s1166_s29 + $0x20] sm:$0xff] (%p79_p3)  ;;  %302 = vst [vmem:[%s1171_s30] sm:$0xff] (%p79_p3), %v301_v0  ;;  %304 = vst [vmem:[%s1171_s30 + $0x8] sm:$0xff] (%p79_p3), %v303_v1  ;;  %v307_v3 = vld [vmem:[%s1166_s29 + $0x30] sm:$0xff] (%p79_p3) }
  0x13   : > { %306 = vst [vmem:[%s1171_s30 + $0x10] sm:$0xff] (%p79_p3), %v305_v2  ;;  %v309_v4 = vld [vmem:[%s1166_s29 + $0x40] sm:$0xff] (%p79_p3)  ;;  %v311_v5 = vld [vmem:[%s1166_s29 + $0x50] sm:$0xff] (%p79_p3)  ;;  %308 = vst [vmem:[%s1171_s30 + $0x18] sm:$0xff] (%p79_p3), %v307_v3 }
  0x14   : > { %310 = vst [vmem:[%s1171_s30 + $0x20] sm:$0xff] (%p79_p3), %v309_v4  ;;  %312 = vst [vmem:[%s1171_s30 + $0x28] sm:$0xff] (%p79_p3), %v311_v5  ;;  %v313_v6 = vld [vmem:[%s1166_s29 + $0x60] sm:$0xff] (%p79_p3)  ;;  %v315_v7 = vld [vmem:[%s1166_s29 + $0x70] sm:$0xff] (%p79_p3) }
  0x15   : > { %v317_v8 = vld [vmem:[%s1166_s29 + $0x80] sm:$0xff]  ;;  %314 = vst [vmem:[%s1171_s30 + $0x30] sm:$0xff] %v313_v6  ;;  %316 = vst [vmem:[%s1171_s30 + $0x38] sm:$0xff] %v315_v7  ;;  %v319_v9 = vld [vmem:[%s1166_s29 + $0x90] sm:$0xff] }
  0x16   : > { %318 = vst [vmem:[%s1171_s30 + $0x40] sm:$0xff] %v317_v8  ;;  %v321_v10 = vld [vmem:[%s1166_s29 + $0xa0] sm:$0xff]  ;;  %v323_v11 = vld [vmem:[%s1166_s29 + $0xb0] sm:$0xff]  ;;  %320 = vst [vmem:[%s1171_s30 + $0x48] sm:$0xff] %v319_v9 }
  0x17   : > { %322 = vst [vmem:[%s1171_s30 + $0x50] sm:$0xff] %v321_v10  ;;  %324 = vst [vmem:[%s1171_s30 + $0x58] sm:$0xff] %v323_v11  ;;  %v325_v12 = vld [vmem:[%s1166_s29 + $0xc0] sm:$0xff]  ;;  %v327_v13 = vld [vmem:[%s1166_s29 + $0xd0] sm:$0xff] }
  0x18   : > { %v329_v14 = vld [vmem:[%s1166_s29 + $0xe0] sm:$0xff]  ;;  %326 = vst [vmem:[%s1171_s30 + $0x60] sm:$0xff] %v325_v12  ;;  %328 = vst [vmem:[%s1171_s30 + $0x68] sm:$0xff] %v327_v13  ;;  %v331_v15 = vld [vmem:[%s1166_s29 + $0xf0] sm:$0xff] }
  0x19   : > { %330 = vst [vmem:[%s1171_s30 + $0x70] sm:$0xff] %v329_v14  ;;  %v333_v16 = vld [vmem:[%s1166_s29 + $0x100] sm:$0xff]  ;;  %v335_v17 = vld [vmem:[%s1166_s29 + $0x110] sm:$0xff]  ;;  %332 = vst [vmem:[%s1171_s30 + $0x78] sm:$0xff] %v331_v15 }
  0x1a   : > { %334 = vst [vmem:[%s1171_s30 + $0x80] sm:$0xff] %v333_v16  ;;  %336 = vst [vmem:[%s1171_s30 + $0x88] sm:$0xff] %v335_v17  ;;  %v337_v18 = vld [vmem:[%s1166_s29 + $0x120] sm:$0xff]  ;;  %v339_v19 = vld [vmem:[%s1166_s29 + $0x130] sm:$0xff] }
  0x1b   : > { %v341_v20 = vld [vmem:[%s1166_s29 + $0x140] sm:$0xff]  ;;  %338 = vst [vmem:[%s1171_s30 + $0x90] sm:$0xff] %v337_v18  ;;  %340 = vst [vmem:[%s1171_s30 + $0x98] sm:$0xff] %v339_v19  ;;  %v343_v21 = vld [vmem:[%s1166_s29 + $0x150] sm:$0xff] }
  0x1c   : > { %342 = vst [vmem:[%s1171_s30 + $0xa0] sm:$0xff] %v341_v20  ;;  %v345_v22 = vld [vmem:[%s1166_s29 + $0x160] sm:$0xff]  ;;  %v347_v23 = vld [vmem:[%s1166_s29 + $0x170] sm:$0xff]  ;;  %344 = vst [vmem:[%s1171_s30 + $0xa8] sm:$0xff] %v343_v21 }
  0x1d   : > { %346 = vst [vmem:[%s1171_s30 + $0xb0] sm:$0xff] %v345_v22  ;;  %348 = vst [vmem:[%s1171_s30 + $0xb8] sm:$0xff] %v347_v23  ;;  %v349_v24 = vld [vmem:[%s1166_s29 + $0x180] sm:$0xff]  ;;  %v351_v25 = vld [vmem:[%s1166_s29 + $0x190] sm:$0xff] }
  0x1e   : > { %v353_v26 = vld [vmem:[%s1166_s29 + $0x1a0] sm:$0xff]  ;;  %350 = vst [vmem:[%s1171_s30 + $0xc0] sm:$0xff] %v349_v24  ;;  %352 = vst [vmem:[%s1171_s30 + $0xc8] sm:$0xff] %v351_v25  ;;  %v355_v27 = vld [vmem:[%s1166_s29 + $0x1b0] sm:$0xff] }
  0x1f   : > { %354 = vst [vmem:[%s1171_s30 + $0xd0] sm:$0xff] %v353_v26  ;;  %v357_v28 = vld [vmem:[%s1166_s29 + $0x1c0] sm:$0xff]  ;;  %v359_v29 = vld [vmem:[%s1166_s29 + $0x1d0] sm:$0xff]  ;;  %356 = vst [vmem:[%s1171_s30 + $0xd8] sm:$0xff] %v355_v27 }
  0x20   : > { %358 = vst [vmem:[%s1171_s30 + $0xe0] sm:$0xff] %v357_v28  ;;  %360 = vst [vmem:[%s1171_s30 + $0xe8] sm:$0xff] %v359_v29  ;;  %v361_v30 = vld [vmem:[%s1166_s29 + $0x1e0] sm:$0xff]  ;;  %v363_v31 = vld [vmem:[%s1166_s29 + $0x1f0] sm:$0xff] }
  0x21   : > { %362 = vst [vmem:[%s1171_s30 + $0xf0] sm:$0xff] %v361_v30  ;;  %364 = vst [vmem:[%s1171_s30 + $0xf8] sm:$0xff] %v363_v31 }
  0x22 PF: > { %p922_p6 = scmp.ge.s32.totalorder %s1096_s19, 1  ;;  %p390_p7 = scmp.lt.s32.totalorder %s1096_s19, 3 }
  0x24   : > { %p391_p8 = pnand %p922_p6, %p390_p7 }
  0x25   : > { %s397_s5 = sand.u32 (!%p391_p8), 1, %s1080_s15   ;;  %v1240_v32 = vld [vmem:[%s1305_s0] sm:$0xff] (!%p391_p8)  ;;  %s924_s10 = sshll.u32 (!%p391_p8), %s1088_s17, 1  ;;  %v745_v3 = vlaneseq (!%p391_p8) }
  0x26   : > { %394 = sbr.rel (%p391_p8) target bundleno = 327 (0x147), region = 70  ;;  %s923_s8 = sshll.u32 (!%p391_p8), %s397_s5, 8  ;;  %v930_v33 = vcombine.high (!%p391_p8), %v1240_v32, %v1240_v32  ;;  %v929_v2 = vcombine.low (!%p391_p8), %v1240_v32, %v1240_v32 }
  0x27   : > { %s1244_s9 = scalar_lea.vmem (!%p391_p8), [#allocation3], %s923_s8  ;;  %p461_p9 = scmp.lt.s32.totalorder (!%p391_p8), %s924_s10, 3  ;;  %v746_v4 = vshrl.u32 (!%p391_p8), %v745_v3, 7 }
  0x28   : > { %v1008_v34 = vld [vmem:[%s1244_s9 + $0x4] ss:$8 sps:$4 sm:$0xff] (!%p391_p8)   ;;  %725 = vmatprep.mubr.bf16.mxu0 (!%p391_p8), %v930_v33  ;;  %v1010_v35 = vld [vmem:[%s1244_s9] ss:$8 sps:$4 sm:$0xff] (!%p391_p8)   ;;  %v1011_v36 = vld [vmem:[%s1244_s9 + $0x14] ss:$8 sps:$4 sm:$0xff] (!%p391_p8)  }
  0x29   : > { %693 = vmatprep.subr.bf16.mxu0 (!%p391_p8), %v1008_v34  ;;  %v1013_v37 = vld [vmem:[%s1244_s9 + $0x10] ss:$8 sps:$4 sm:$0xff] (!%p391_p8)   ;;  %v1014_v38 = vld [vmem:[%s1244_s9 + $0x24] ss:$8 sps:$4 sm:$0xff] (!%p391_p8)   ;;  %v1016_v39 = vld [vmem:[%s1244_s9 + $0x20] ss:$8 sps:$4 sm:$0xff] (!%p391_p8)  }
  0x2a   : > { %694 = vmatpush1.bf16.msra.mxu0 (!%p391_p8), %v1010_v35  ;;  %v1017_v40 = vld [vmem:[%s1244_s9 + $0x34] ss:$8 sps:$4 sm:$0xff] (!%p391_p8)   ;;  %v1019_v41 = vld [vmem:[%s1244_s9 + $0x30] ss:$8 sps:$4 sm:$0xff] (!%p391_p8)   ;;  %v1020_v42 = vld [vmem:[%s1244_s9 + $0x44] ss:$8 sps:$4 sm:$0xff] (!%p391_p8)  }
  0x2b   : > { %695 = vmatprep.subr.bf16.mxu0 (!%p391_p8), %v1011_v36  ;;  %v1022_v43 = vld [vmem:[%s1244_s9 + $0x40] ss:$8 sps:$4 sm:$0xff] (!%p391_p8)   ;;  %v1023_v44 = vld [vmem:[%s1244_s9 + $0x54] ss:$8 sps:$4 sm:$0xff] (!%p391_p8)   ;;  %v1025_v45 = vld [vmem:[%s1244_s9 + $0x50] ss:$8 sps:$4 sm:$0xff] (!%p391_p8)  }
  0x2c   : > { %v1026_v46 = vld [vmem:[%s1244_s9 + $0x64] ss:$8 sps:$4 sm:$0xff] (!%p391_p8)   ;;  %v1028_v47 = vld [vmem:[%s1244_s9 + $0x60] ss:$8 sps:$4 sm:$0xff] (!%p391_p8)   ;;  %v1029_v48 = vld [vmem:[%s1244_s9 + $0x74] ss:$8 sps:$4 sm:$0xff] (!%p391_p8)  }
  0x2d   : > { %v1031_v49 = vld [vmem:[%s1244_s9 + $0x70] ss:$8 sps:$4 sm:$0xff]   ;;  %v1032_v50 = vld [vmem:[%s1244_s9 + $0x84] ss:$8 sps:$4 sm:$0xff]   ;;  %v1034_v51 = vld [vmem:[%s1244_s9 + $0x80] ss:$8 sps:$4 sm:$0xff]  }
  0x2e   : > { %696 = vmatpush1.bf16.msra.mxu0 %v1013_v37  ;;  %v1035_v52 = vld [vmem:[%s1244_s9 + $0x94] ss:$8 sps:$4 sm:$0xff]   ;;  %v1037_v53 = vld [vmem:[%s1244_s9 + $0x90] ss:$8 sps:$4 sm:$0xff]   ;;  %v1038_v54 = vld [vmem:[%s1244_s9 + $0xa4] ss:$8 sps:$4 sm:$0xff]  }
  0x2f   : > { %697 = vmatprep.subr.bf16.mxu0 %v1014_v38  ;;  %v1040_v55 = vld [vmem:[%s1244_s9 + $0xa0] ss:$8 sps:$4 sm:$0xff]   ;;  %v1041_v56 = vld [vmem:[%s1244_s9 + $0xb4] ss:$8 sps:$4 sm:$0xff]   ;;  %v1043_v57 = vld [vmem:[%s1244_s9 + $0xb0] ss:$8 sps:$4 sm:$0xff]  }
  0x30   : > { %v1044_v58 = vld [vmem:[%s1244_s9 + $0xc4] ss:$8 sps:$4 sm:$0xff]   ;;  %v1046_v59 = vld [vmem:[%s1244_s9 + $0xc0] ss:$8 sps:$4 sm:$0xff]   ;;  %v1047_v60 = vld [vmem:[%s1244_s9 + $0xd4] ss:$8 sps:$4 sm:$0xff]  }
  0x31   : > { %v1049_v61 = vld [vmem:[%s1244_s9 + $0xd0] ss:$8 sps:$4 sm:$0xff]   ;;  %v1050_v62 = vld [vmem:[%s1244_s9 + $0xe4] ss:$8 sps:$4 sm:$0xff]   ;;  %v1052_v63 = vld [vmem:[%s1244_s9 + $0xe0] ss:$8 sps:$4 sm:$0xff]  }
  0x32   : > { %698 = vmatpush1.bf16.msra.mxu0 %v1016_v39  ;;  %v1053_v0 = vld [vmem:[%s1244_s9 + $0xf4] ss:$8 sps:$4 sm:$0xff]   ;;  %v1055_v1 = vld [vmem:[%s1244_s9 + $0xf0] ss:$8 sps:$4 sm:$0xff]   ;;  %s1317_s10 = smov (!%p461_p9, %s924_s10), 3  ;;  %v747_v5 = vsub.s32 0, %v746_v4 }
  0x33   : > { %699 = vmatprep.subr.bf16.mxu0 %v1017_v40  ;;  %s926_s11 = sshll.u32 %s1317_s10, 2  ;;  %s463_s14 = scalar_lea.vmem %s1307_s2, %s1317_s10  ;;  %v751_v7 = vsub.s32 1, %v746_v4 }
  0x34   : > { %s473_s22 = scalar_lea.vmem %s1308_s3, %s926_s11  ;;  %v743_v6 = vld [vmem:[%s463_s14] sm:$0x3]  ;;  %s483_s25 = scalar_lea.vmem %s1309_s4, %s926_s11 }
  0x35   : > { %v757_v8 = vld [vmem:[%s473_s22] sm:$0xff]  ;;  %v748_v9 = vrot.slane %v743_v6, %v747_v5  ;;  %v752_v10 = vrot.slane %v743_v6, %v751_v7 }
  0x36   : > { %700 = vmatpush1.bf16.msra.mxu0 %v1019_v41  ;;  %v758_v11 = vunpack.c.l.bf16 %v757_v8  ;;  %v759_v13 = vunpack.c.h.bf16 %v757_v8 }
  0x37   : > { %701 = vmatprep.subr.bf16.mxu0 %v1020_v42 }
  0x3a   : > { %702 = vmatpush1.bf16.msra.mxu0 %v1022_v43 }
  0x3b   : > { %703 = vmatprep.subr.bf16.mxu0 %v1023_v44 }
  0x3e   : > { %704 = vmatpush1.bf16.msra.mxu0 %v1025_v45 }
  0x3f   : > { %705 = vmatprep.subr.bf16.mxu0 %v1026_v46 }
  0x42   : > { %706 = vmatpush1.bf16.msra.mxu0 %v1028_v47 }
  0x43   : > { %707 = vmatprep.subr.bf16.mxu0 %v1029_v48 }
  0x46   : > { %708 = vmatpush1.bf16.msra.mxu0 %v1031_v49 }
  0x47   : > { %709 = vmatprep.subr.bf16.mxu0 %v1032_v50 }
  0x4a   : > { %710 = vmatpush1.bf16.msra.mxu0 %v1034_v51 }
  0x4b   : > { %711 = vmatprep.subr.bf16.mxu0 %v1035_v52 }
  0x4e   : > { %712 = vmatpush1.bf16.msra.mxu0 %v1037_v53 }
  0x4f   : > { %713 = vmatprep.subr.bf16.mxu0 %v1038_v54 }
  0x52   : > { %714 = vmatpush1.bf16.msra.mxu0 %v1040_v55 }
  0x53   : > { %715 = vmatprep.subr.bf16.mxu0 %v1041_v56 }
  0x56   : > { %716 = vmatpush1.bf16.msra.mxu0 %v1043_v57 }
  0x57   : > { %717 = vmatprep.subr.bf16.mxu0 %v1044_v58 }
  0x5a   : > { %718 = vmatpush1.bf16.msra.mxu0 %v1046_v59 }
  0x5b   : > { %719 = vmatprep.subr.bf16.mxu0 %v1047_v60 }
  0x5e   : > { %720 = vmatpush1.bf16.msra.mxu0 %v1049_v61 }
  0x5f   : > { %721 = vmatprep.subr.bf16.mxu0 %v1050_v62 }
  0x62   : > { %722 = vmatpush1.bf16.msra.mxu0 %v1052_v63 }
  0x63   : > { %723 = vmatprep.subr.bf16.mxu0 %v1053_v0 }
  0x66   : > { %724 = vmatpush1.bf16.msra.mxu0 %v1055_v1 }
  0x69   : > { %726 = vmatmul.mubr.bf16.vlgmr.msra.gmra.mrb[0].mxu0 %v929_v2 }
 0x13c   : > { %v727_v12 = vpop.f32.mrb[0].mxu0 }
 0x13d   : > { %v755_v14 = vadd.f32 %v748_v9, %v727_v12  ;;  %v729_v15 = vpop.f32.mrb[1].mxu0 }
 0x13e   : > { %v756_v16 = vadd.f32 %v752_v10, %v729_v15  ;;  %v731_v17 = vpop.f32.mrb[2].mxu0 }
 0x13f   : > { %v760_v18 = vadd.f32 %v758_v11, %v755_v14  ;;  %v732_v19 = vpop.f32.mrb[3].mxu0 }
 0x140   : > { %v761_v20 = vadd.f32 %v759_v13, %v756_v16 }
 0x141   : > { %v762_v21 = vmax.f32 %v760_v18, 0.0 }
 0x142   : > { %v763_v22 = vmax.f32 %v761_v20, 0.0 }
 0x144   : > { %v967_v23 = vpack.c.bf16 %v763_v22, %v762_v21 }
 0x146   : > { %772 = vst [vmem:[%s483_s25] sm:$0xff] %v967_v23 }
 0x147 PF: > { %s14_s19 = sadd.s32 1, %s1096_s19   ;;  %s1310_s15 = smov %s1084_s16 }
 0x148   : > { %p11_p10 = scmp.ge.s32.totalorder %s14_s19, 4   ;;  %s1311_s16 = smov %s1158_s23 }
 0x149   : > { %s1312_s17 = smov %s1092_s18  ;;  %s1313_s18 = smov %s1315_s20 }
 0x14a   :  { %13 = sbr.rel (!%p11_p10) target bundleno = 3 (0x3), region = 126 }

// kernel: _lambda_.37
= control target key start
LH: loop header
LB: loop body
LE: loop exit
PB: predicated region body
PF: predicated region fallthrough
CT: control target
= control target key end

     0   :  { %s1028_s12 = smov 0   ;;  %s1030_s13 = smov 0   ;;  %s1207_s0 = inlined_call_operand.vmem [shape: bf16[8,256], index: 0, kind: input, shape index: {}]   ;;  %s1208_s1 = inlined_call_operand.vmem [shape: bf16[256,512], index: 1, kind: input, shape index: {}]   ;;  %s1209_s2 = inlined_call_operand.vmem [shape: f32[1,512], index: 2, kind: input, shape index: {}]   ;;  %s1210_s3 = inlined_call_operand.vmem [shape: bf16[8,512], index: 3, kind: output, shape index: {}]  }
   0x1   :  { %s1032_s14 = smov 0   ;;  %s1034_s15 = smov 0  }
   0x2   :  { %s1036_s16 = smov 0  }
   0x3 LB: > { %s28_s17 = sadd.s32 1, %s1002_s15  ;;  %p76_p1 = scmp.ne.s32.totalorder %s994_s13, %s990_s12  ;;  %s1006_s16 = sphi %s1036_s16, %s13_s16   ;;  %s1002_s15 = sphi %s1034_s15, %s1214_s15   ;;  %s998_s14 = sphi %s1032_s14, %s1213_s14   ;;  %s994_s13 = sphi %s1030_s13, %s1212_s13   ;;  %s990_s12 = sphi %s1028_s12, %s1211_s12  }
   0x4   : > { %p30_p0 = scmp.ge.s32.totalorder %s28_s17, 2  ;;  %p77_p2 = scmp.eq.s32.totalorder %s1006_s16, 0 }
   0x5   : > { %s69_s19 = sadd.s32 1, %s994_s13  ;;  %p830_p5 = scmp.ge.s32.totalorder %s1006_s16, 2 }
   0x6   : > { %s1216_s17 = smov (%p30_p0, %s28_s17), 0  ;;  %p78_p3 = por %p77_p2, %p76_p1 }
   0x7   : > { %s65_s18 = ssub.s32 %s1002_s15, %s1216_s17  ;;  %169 = sbr.rel (%p830_p5) target bundleno = 34 (0x22), region = 20 }
   0x8   : > { %p67_p4 = scmp.eq.s32.totalorder %s65_s18, 0 }
   0xa   : > { %s1063_s20 = scalar_select %p67_p4, %s994_s13, %s69_s19  }
   0xe   : > { %172 = sbr.rel (!%p78_p3) target bundleno = 34 (0x22), region = 24  ;;  %s174_s21 = sand.u32 (%p78_p3), 1, %s994_s13  }
   0xf   : > { %s876_s22 = sshll.u32 (%p78_p3), %s1002_s15, 3  ;;  %s831_s23 = sshll.u32 (%p78_p3), %s174_s21, 8 }
  0x10   : > { %s1071_s26 = scalar_lea.vmem (%p78_p3), %s1208_s1, %s876_s22  ;;  %s1076_s27 = scalar_lea.vmem (%p78_p3), [#allocation3], %s831_s23 }
  0x11   : > { %v272_v0 = vld [vmem:[%s1071_s26] sm:$0xff] (%p78_p3)  ;;  %v274_v1 = vld [vmem:[%s1071_s26 + $0x10] sm:$0xff] (%p78_p3) }
  0x12   : > { %v276_v2 = vld [vmem:[%s1071_s26 + $0x20] sm:$0xff] (%p78_p3)  ;;  %273 = vst [vmem:[%s1076_s27] sm:$0xff] (%p78_p3), %v272_v0  ;;  %275 = vst [vmem:[%s1076_s27 + $0x8] sm:$0xff] (%p78_p3), %v274_v1  ;;  %v278_v3 = vld [vmem:[%s1071_s26 + $0x30] sm:$0xff] (%p78_p3) }
  0x13   : > { %277 = vst [vmem:[%s1076_s27 + $0x10] sm:$0xff] (%p78_p3), %v276_v2  ;;  %v280_v4 = vld [vmem:[%s1071_s26 + $0x40] sm:$0xff] (%p78_p3)  ;;  %v282_v5 = vld [vmem:[%s1071_s26 + $0x50] sm:$0xff] (%p78_p3)  ;;  %279 = vst [vmem:[%s1076_s27 + $0x18] sm:$0xff] (%p78_p3), %v278_v3 }
  0x14   : > { %281 = vst [vmem:[%s1076_s27 + $0x20] sm:$0xff] (%p78_p3), %v280_v4  ;;  %283 = vst [vmem:[%s1076_s27 + $0x28] sm:$0xff] (%p78_p3), %v282_v5  ;;  %v284_v6 = vld [vmem:[%s1071_s26 + $0x60] sm:$0xff] (%p78_p3)  ;;  %v286_v7 = vld [vmem:[%s1071_s26 + $0x70] sm:$0xff] (%p78_p3) }
  0x15   : > { %v288_v8 = vld [vmem:[%s1071_s26 + $0x80] sm:$0xff]  ;;  %285 = vst [vmem:[%s1076_s27 + $0x30] sm:$0xff] %v284_v6  ;;  %287 = vst [vmem:[%s1076_s27 + $0x38] sm:$0xff] %v286_v7  ;;  %v290_v9 = vld [vmem:[%s1071_s26 + $0x90] sm:$0xff] }
  0x16   : > { %289 = vst [vmem:[%s1076_s27 + $0x40] sm:$0xff] %v288_v8  ;;  %v292_v10 = vld [vmem:[%s1071_s26 + $0xa0] sm:$0xff]  ;;  %v294_v11 = vld [vmem:[%s1071_s26 + $0xb0] sm:$0xff]  ;;  %291 = vst [vmem:[%s1076_s27 + $0x48] sm:$0xff] %v290_v9 }
  0x17   : > { %293 = vst [vmem:[%s1076_s27 + $0x50] sm:$0xff] %v292_v10  ;;  %295 = vst [vmem:[%s1076_s27 + $0x58] sm:$0xff] %v294_v11  ;;  %v296_v12 = vld [vmem:[%s1071_s26 + $0xc0] sm:$0xff]  ;;  %v298_v13 = vld [vmem:[%s1071_s26 + $0xd0] sm:$0xff] }
  0x18   : > { %v300_v14 = vld [vmem:[%s1071_s26 + $0xe0] sm:$0xff]  ;;  %297 = vst [vmem:[%s1076_s27 + $0x60] sm:$0xff] %v296_v12  ;;  %299 = vst [vmem:[%s1076_s27 + $0x68] sm:$0xff] %v298_v13  ;;  %v302_v15 = vld [vmem:[%s1071_s26 + $0xf0] sm:$0xff] }
  0x19   : > { %301 = vst [vmem:[%s1076_s27 + $0x70] sm:$0xff] %v300_v14  ;;  %v304_v16 = vld [vmem:[%s1071_s26 + $0x100] sm:$0xff]  ;;  %v306_v17 = vld [vmem:[%s1071_s26 + $0x110] sm:$0xff]  ;;  %303 = vst [vmem:[%s1076_s27 + $0x78] sm:$0xff] %v302_v15 }
  0x1a   : > { %305 = vst [vmem:[%s1076_s27 + $0x80] sm:$0xff] %v304_v16  ;;  %307 = vst [vmem:[%s1076_s27 + $0x88] sm:$0xff] %v306_v17  ;;  %v308_v18 = vld [vmem:[%s1071_s26 + $0x120] sm:$0xff]  ;;  %v310_v19 = vld [vmem:[%s1071_s26 + $0x130] sm:$0xff] }
  0x1b   : > { %v312_v20 = vld [vmem:[%s1071_s26 + $0x140] sm:$0xff]  ;;  %309 = vst [vmem:[%s1076_s27 + $0x90] sm:$0xff] %v308_v18  ;;  %311 = vst [vmem:[%s1076_s27 + $0x98] sm:$0xff] %v310_v19  ;;  %v314_v21 = vld [vmem:[%s1071_s26 + $0x150] sm:$0xff] }
  0x1c   : > { %313 = vst [vmem:[%s1076_s27 + $0xa0] sm:$0xff] %v312_v20  ;;  %v316_v22 = vld [vmem:[%s1071_s26 + $0x160] sm:$0xff]  ;;  %v318_v23 = vld [vmem:[%s1071_s26 + $0x170] sm:$0xff]  ;;  %315 = vst [vmem:[%s1076_s27 + $0xa8] sm:$0xff] %v314_v21 }
  0x1d   : > { %317 = vst [vmem:[%s1076_s27 + $0xb0] sm:$0xff] %v316_v22  ;;  %319 = vst [vmem:[%s1076_s27 + $0xb8] sm:$0xff] %v318_v23  ;;  %v320_v24 = vld [vmem:[%s1071_s26 + $0x180] sm:$0xff]  ;;  %v322_v25 = vld [vmem:[%s1071_s26 + $0x190] sm:$0xff] }
  0x1e   : > { %v324_v26 = vld [vmem:[%s1071_s26 + $0x1a0] sm:$0xff]  ;;  %321 = vst [vmem:[%s1076_s27 + $0xc0] sm:$0xff] %v320_v24  ;;  %323 = vst [vmem:[%s1076_s27 + $0xc8] sm:$0xff] %v322_v25  ;;  %v326_v27 = vld [vmem:[%s1071_s26 + $0x1b0] sm:$0xff] }
  0x1f   : > { %325 = vst [vmem:[%s1076_s27 + $0xd0] sm:$0xff] %v324_v26  ;;  %v328_v28 = vld [vmem:[%s1071_s26 + $0x1c0] sm:$0xff]  ;;  %v330_v29 = vld [vmem:[%s1071_s26 + $0x1d0] sm:$0xff]  ;;  %327 = vst [vmem:[%s1076_s27 + $0xd8] sm:$0xff] %v326_v27 }
  0x20   : > { %329 = vst [vmem:[%s1076_s27 + $0xe0] sm:$0xff] %v328_v28  ;;  %331 = vst [vmem:[%s1076_s27 + $0xe8] sm:$0xff] %v330_v29  ;;  %v332_v30 = vld [vmem:[%s1071_s26 + $0x1e0] sm:$0xff]  ;;  %v334_v31 = vld [vmem:[%s1071_s26 + $0x1f0] sm:$0xff] }
  0x21   : > { %333 = vst [vmem:[%s1076_s27 + $0xf0] sm:$0xff] %v332_v30  ;;  %335 = vst [vmem:[%s1076_s27 + $0xf8] sm:$0xff] %v334_v31 }
  0x22 PF: > { %p834_p6 = scmp.ge.s32.totalorder %s1006_s16, 1  ;;  %p348_p7 = scmp.lt.s32.totalorder %s1006_s16, 3 }
  0x24   : > { %p349_p8 = pnand %p834_p6, %p348_p7 }
  0x25   : > { %s355_s28 = sand.u32 (!%p349_p8), 1, %s990_s12   ;;  %v1145_v32 = vld [vmem:[%s1207_s0] sm:$0xff] (!%p349_p8)  ;;  %s836_s6 = sshll.u32 (!%p349_p8), %s998_s14, 1  ;;  %v682_v3 = vlaneseq (!%p349_p8) }
  0x26   : > { %352 = sbr.rel (%p349_p8) target bundleno = 323 (0x143), region = 66  ;;  %s835_s4 = sshll.u32 (!%p349_p8), %s355_s28, 8  ;;  %v840_v33 = vcombine.high (!%p349_p8), %v1145_v32, %v1145_v32  ;;  %v839_v2 = vcombine.low (!%p349_p8), %v1145_v32, %v1145_v32 }
  0x27   : > { %s1149_s5 = scalar_lea.vmem (!%p349_p8), [#allocation3], %s835_s4  ;;  %p408_p9 = scmp.lt.s32.totalorder (!%p349_p8), %s836_s6, 3  ;;  %v683_v4 = vshrl.u32 (!%p349_p8), %v682_v3, 7 }
  0x28   : > { %v918_v34 = vld [vmem:[%s1149_s5 + $0x4] ss:$8 sps:$4 sm:$0xff] (!%p349_p8)   ;;  %662 = vmatprep.mubr.bf16.mxu0 (!%p349_p8), %v840_v33  ;;  %v920_v35 = vld [vmem:[%s1149_s5] ss:$8 sps:$4 sm:$0xff] (!%p349_p8)   ;;  %v921_v36 = vld [vmem:[%s1149_s5 + $0x14] ss:$8 sps:$4 sm:$0xff] (!%p349_p8)  }
  0x29   : > { %630 = vmatprep.subr.bf16.mxu0 (!%p349_p8), %v918_v34  ;;  %v923_v37 = vld [vmem:[%s1149_s5 + $0x10] ss:$8 sps:$4 sm:$0xff] (!%p349_p8)   ;;  %v924_v38 = vld [vmem:[%s1149_s5 + $0x24] ss:$8 sps:$4 sm:$0xff] (!%p349_p8)   ;;  %v926_v39 = vld [vmem:[%s1149_s5 + $0x20] ss:$8 sps:$4 sm:$0xff] (!%p349_p8)  }
  0x2a   : > { %631 = vmatpush1.bf16.msra.mxu0 (!%p349_p8), %v920_v35  ;;  %v927_v40 = vld [vmem:[%s1149_s5 + $0x34] ss:$8 sps:$4 sm:$0xff] (!%p349_p8)   ;;  %v929_v41 = vld [vmem:[%s1149_s5 + $0x30] ss:$8 sps:$4 sm:$0xff] (!%p349_p8)   ;;  %v930_v42 = vld [vmem:[%s1149_s5 + $0x44] ss:$8 sps:$4 sm:$0xff] (!%p349_p8)  }
  0x2b   : > { %632 = vmatprep.subr.bf16.mxu0 (!%p349_p8), %v921_v36  ;;  %v932_v43 = vld [vmem:[%s1149_s5 + $0x40] ss:$8 sps:$4 sm:$0xff] (!%p349_p8)   ;;  %v933_v44 = vld [vmem:[%s1149_s5 + $0x54] ss:$8 sps:$4 sm:$0xff] (!%p349_p8)   ;;  %v935_v45 = vld [vmem:[%s1149_s5 + $0x50] ss:$8 sps:$4 sm:$0xff] (!%p349_p8)  }
  0x2c   : > { %v936_v46 = vld [vmem:[%s1149_s5 + $0x64] ss:$8 sps:$4 sm:$0xff] (!%p349_p8)   ;;  %v938_v47 = vld [vmem:[%s1149_s5 + $0x60] ss:$8 sps:$4 sm:$0xff] (!%p349_p8)   ;;  %v939_v48 = vld [vmem:[%s1149_s5 + $0x74] ss:$8 sps:$4 sm:$0xff] (!%p349_p8)  }
  0x2d   : > { %v941_v49 = vld [vmem:[%s1149_s5 + $0x70] ss:$8 sps:$4 sm:$0xff]   ;;  %v942_v50 = vld [vmem:[%s1149_s5 + $0x84] ss:$8 sps:$4 sm:$0xff]   ;;  %v944_v51 = vld [vmem:[%s1149_s5 + $0x80] ss:$8 sps:$4 sm:$0xff]  }
  0x2e   : > { %633 = vmatpush1.bf16.msra.mxu0 %v923_v37  ;;  %v945_v52 = vld [vmem:[%s1149_s5 + $0x94] ss:$8 sps:$4 sm:$0xff]   ;;  %v947_v53 = vld [vmem:[%s1149_s5 + $0x90] ss:$8 sps:$4 sm:$0xff]   ;;  %v948_v54 = vld [vmem:[%s1149_s5 + $0xa4] ss:$8 sps:$4 sm:$0xff]  }
  0x2f   : > { %634 = vmatprep.subr.bf16.mxu0 %v924_v38  ;;  %v950_v55 = vld [vmem:[%s1149_s5 + $0xa0] ss:$8 sps:$4 sm:$0xff]   ;;  %v951_v56 = vld [vmem:[%s1149_s5 + $0xb4] ss:$8 sps:$4 sm:$0xff]   ;;  %v953_v57 = vld [vmem:[%s1149_s5 + $0xb0] ss:$8 sps:$4 sm:$0xff]  }
  0x30   : > { %v954_v58 = vld [vmem:[%s1149_s5 + $0xc4] ss:$8 sps:$4 sm:$0xff]   ;;  %v956_v59 = vld [vmem:[%s1149_s5 + $0xc0] ss:$8 sps:$4 sm:$0xff]   ;;  %v957_v60 = vld [vmem:[%s1149_s5 + $0xd4] ss:$8 sps:$4 sm:$0xff]  }
  0x31   : > { %v959_v61 = vld [vmem:[%s1149_s5 + $0xd0] ss:$8 sps:$4 sm:$0xff]   ;;  %v960_v62 = vld [vmem:[%s1149_s5 + $0xe4] ss:$8 sps:$4 sm:$0xff]   ;;  %v962_v63 = vld [vmem:[%s1149_s5 + $0xe0] ss:$8 sps:$4 sm:$0xff]  }
  0x32   : > { %635 = vmatpush1.bf16.msra.mxu0 %v926_v39  ;;  %v963_v0 = vld [vmem:[%s1149_s5 + $0xf4] ss:$8 sps:$4 sm:$0xff]   ;;  %v965_v1 = vld [vmem:[%s1149_s5 + $0xf0] ss:$8 sps:$4 sm:$0xff]   ;;  %s1218_s6 = smov (!%p408_p9, %s836_s6), 3  ;;  %v684_v5 = vsub.s32 0, %v683_v4 }
  0x33   : > { %636 = vmatprep.subr.bf16.mxu0 %v927_v40  ;;  %s410_s9 = scalar_lea.vmem %s1209_s2, %s1218_s6  ;;  %v688_v7 = vsub.s32 1, %v683_v4  ;;  %s838_s10 = sshll.u32 %s1218_s6, 2 }
  0x34   : > { %v680_v6 = vld [vmem:[%s410_s9] sm:$0x3]  ;;  %s420_s14 = scalar_lea.vmem %s1210_s3, %s838_s10 }
  0x35   : > { %v685_v8 = vrot.slane %v680_v6, %v684_v5  ;;  %v689_v9 = vrot.slane %v680_v6, %v688_v7 }
  0x36   : > { %637 = vmatpush1.bf16.msra.mxu0 %v929_v41 }
  0x37   : > { %638 = vmatprep.subr.bf16.mxu0 %v930_v42 }
  0x3a   : > { %639 = vmatpush1.bf16.msra.mxu0 %v932_v43 }
  0x3b   : > { %640 = vmatprep.subr.bf16.mxu0 %v933_v44 }
  0x3e   : > { %641 = vmatpush1.bf16.msra.mxu0 %v935_v45 }
  0x3f   : > { %642 = vmatprep.subr.bf16.mxu0 %v936_v46 }
  0x42   : > { %643 = vmatpush1.bf16.msra.mxu0 %v938_v47 }
  0x43   : > { %644 = vmatprep.subr.bf16.mxu0 %v939_v48 }
  0x46   : > { %645 = vmatpush1.bf16.msra.mxu0 %v941_v49 }
  0x47   : > { %646 = vmatprep.subr.bf16.mxu0 %v942_v50 }
  0x4a   : > { %647 = vmatpush1.bf16.msra.mxu0 %v944_v51 }
  0x4b   : > { %648 = vmatprep.subr.bf16.mxu0 %v945_v52 }
  0x4e   : > { %649 = vmatpush1.bf16.msra.mxu0 %v947_v53 }
  0x4f   : > { %650 = vmatprep.subr.bf16.mxu0 %v948_v54 }
  0x52   : > { %651 = vmatpush1.bf16.msra.mxu0 %v950_v55 }
  0x53   : > { %652 = vmatprep.subr.bf16.mxu0 %v951_v56 }
  0x56   : > { %653 = vmatpush1.bf16.msra.mxu0 %v953_v57 }
  0x57   : > { %654 = vmatprep.subr.bf16.mxu0 %v954_v58 }
  0x5a   : > { %655 = vmatpush1.bf16.msra.mxu0 %v956_v59 }
  0x5b   : > { %656 = vmatprep.subr.bf16.mxu0 %v957_v60 }
  0x5e   : > { %657 = vmatpush1.bf16.msra.mxu0 %v959_v61 }
  0x5f   : > { %658 = vmatprep.subr.bf16.mxu0 %v960_v62 }
  0x62   : > { %659 = vmatpush1.bf16.msra.mxu0 %v962_v63 }
  0x63   : > { %660 = vmatprep.subr.bf16.mxu0 %v963_v0 }
  0x66   : > { %661 = vmatpush1.bf16.msra.mxu0 %v965_v1 }
  0x69   : > { %663 = vmatmul.mubr.bf16.vlgmr.msra.gmra.mrb[0].mxu0 %v839_v2 }
 0x13c   : > { %v664_v10 = vpop.f32.mrb[0].mxu0 }
 0x13d   : > { %v692_v11 = vadd.f32 %v685_v8, %v664_v10  ;;  %v666_v12 = vpop.f32.mrb[1].mxu0 }
 0x13e   : > { %v693_v13 = vadd.f32 %v689_v9, %v666_v12  ;;  %v668_v14 = vpop.f32.mrb[2].mxu0 }
 0x13f   : > { %v669_v15 = vpop.f32.mrb[3].mxu0 }
 0x140   : > { %v877_v16 = vpack.c.bf16 %v693_v13, %v692_v11 }
 0x142   : > { %702 = vst [vmem:[%s420_s14] sm:$0xff] %v877_v16 }
 0x143 PF: > { %s13_s16 = sadd.s32 1, %s1006_s16   ;;  %s1211_s12 = smov %s994_s13 }
 0x144   : > { %p10_p10 = scmp.ge.s32.totalorder %s13_s16, 4   ;;  %s1212_s13 = smov %s1063_s20 }
 0x145   : > { %s1213_s14 = smov %s1002_s15  ;;  %s1214_s15 = smov %s1216_s17 }
 0x146   :  { %12 = sbr.rel (!%p10_p10) target bundleno = 3 (0x3), region = 119 }

// kernel: _lambda_.41
= control target key start
LH: loop header
LB: loop body
LE: loop exit
PB: predicated region body
PF: predicated region fallthrough
CT: control target
= control target key end

     0   :  { %s936_s1 = inlined_call_operand.vmem [shape: bf16[512,256], index: 1, kind: input, shape index: {}]   ;;  %s937_s0 = inlined_call_operand.vmem [shape: bf16[8,512], index: 0, kind: input, shape index: {}]   ;;  %s938_s2 = inlined_call_operand.vmem [shape: f32[1,256], index: 2, kind: input, shape index: {}]   ;;  %s939_s3 = inlined_call_operand.vmem [shape: bf16[8,256], index: 3, kind: output, shape index: {}]  }
   0x1   :  { %v612_v0 = vld [vmem:[%s936_s1 + $0x4] ss:$8 sps:$4 sm:$0xff]   ;;  %v616_v2 = vld [vmem:[%s936_s1] ss:$8 sps:$4 sm:$0xff]   ;;  %v618_v4 = vld [vmem:[%s936_s1 + $0x14] ss:$8 sps:$4 sm:$0xff]  }
   0x2   :  { %v614_v1 = vld [vmem:[%s936_s1 + $0x104] ss:$8 sps:$4 sm:$0xff]   ;;  %422 = vmatprep.subr.bf16.mxu0 %v612_v0  ;;  %v617_v3 = vld [vmem:[%s936_s1 + $0x100] ss:$8 sps:$4 sm:$0xff]   ;;  %v620_v5 = vld [vmem:[%s936_s1 + $0x114] ss:$8 sps:$4 sm:$0xff]  }
   0x3   :  { %463 = vmatprep.subr.bf16.mxu1 %v614_v1  ;;  %423 = vmatpush1.bf16.msra.mxu0 %v616_v2  ;;  %v622_v6 = vld [vmem:[%s936_s1 + $0x10] ss:$8 sps:$4 sm:$0xff]   ;;  %v624_v8 = vld [vmem:[%s936_s1 + $0x24] ss:$8 sps:$4 sm:$0xff]   ;;  %v628_v10 = vld [vmem:[%s936_s1 + $0x20] ss:$8 sps:$4 sm:$0xff]  }
   0x4   :  { %464 = vmatpush1.bf16.msra.mxu1 %v617_v3  ;;  %424 = vmatprep.subr.bf16.mxu0 %v618_v4  ;;  %v623_v7 = vld [vmem:[%s936_s1 + $0x110] ss:$8 sps:$4 sm:$0xff]   ;;  %v626_v9 = vld [vmem:[%s936_s1 + $0x124] ss:$8 sps:$4 sm:$0xff]   ;;  %v629_v11 = vld [vmem:[%s936_s1 + $0x120] ss:$8 sps:$4 sm:$0xff]  }
   0x5   :  { %465 = vmatprep.subr.bf16.mxu1 %v620_v5  ;;  %v630_v12 = vld [vmem:[%s936_s1 + $0x34] ss:$8 sps:$4 sm:$0xff]   ;;  %v634_v14 = vld [vmem:[%s936_s1 + $0x30] ss:$8 sps:$4 sm:$0xff]   ;;  %v636_v16 = vld [vmem:[%s936_s1 + $0x44] ss:$8 sps:$4 sm:$0xff]  }
   0x6   :  { %v632_v13 = vld [vmem:[%s936_s1 + $0x134] ss:$8 sps:$4 sm:$0xff]   ;;  %v635_v15 = vld [vmem:[%s936_s1 + $0x130] ss:$8 sps:$4 sm:$0xff]   ;;  %v638_v17 = vld [vmem:[%s936_s1 + $0x144] ss:$8 sps:$4 sm:$0xff]  }
   0x7   :  { %425 = vmatpush1.bf16.msra.mxu0 %v622_v6  ;;  %v640_v18 = vld [vmem:[%s936_s1 + $0x40] ss:$8 sps:$4 sm:$0xff]   ;;  %v642_v20 = vld [vmem:[%s936_s1 + $0x54] ss:$8 sps:$4 sm:$0xff]   ;;  %v646_v22 = vld [vmem:[%s936_s1 + $0x50] ss:$8 sps:$4 sm:$0xff]   ;;  %v515_v6 = vlaneseq }
   0x8   :  { %466 = vmatpush1.bf16.msra.mxu1 %v623_v7  ;;  %426 = vmatprep.subr.bf16.mxu0 %v624_v8  ;;  %v641_v19 = vld [vmem:[%s936_s1 + $0x140] ss:$8 sps:$4 sm:$0xff]   ;;  %v644_v21 = vld [vmem:[%s936_s1 + $0x154] ss:$8 sps:$4 sm:$0xff]   ;;  %v647_v23 = vld [vmem:[%s936_s1 + $0x150] ss:$8 sps:$4 sm:$0xff]  }
   0x9   :  { %467 = vmatprep.subr.bf16.mxu1 %v626_v9  ;;  %v648_v24 = vld [vmem:[%s936_s1 + $0x64] ss:$8 sps:$4 sm:$0xff]   ;;  %v652_v26 = vld [vmem:[%s936_s1 + $0x60] ss:$8 sps:$4 sm:$0xff]   ;;  %v654_v28 = vld [vmem:[%s936_s1 + $0x74] ss:$8 sps:$4 sm:$0xff]  }
   0xa   :  { %v650_v25 = vld [vmem:[%s936_s1 + $0x164] ss:$8 sps:$4 sm:$0xff]   ;;  %v653_v27 = vld [vmem:[%s936_s1 + $0x160] ss:$8 sps:$4 sm:$0xff]   ;;  %v656_v29 = vld [vmem:[%s936_s1 + $0x174] ss:$8 sps:$4 sm:$0xff]  }
   0xb   :  { %427 = vmatpush1.bf16.msra.mxu0 %v628_v10  ;;  %v658_v30 = vld [vmem:[%s936_s1 + $0x70] ss:$8 sps:$4 sm:$0xff]   ;;  %v660_v32 = vld [vmem:[%s936_s1 + $0x84] ss:$8 sps:$4 sm:$0xff]   ;;  %v664_v34 = vld [vmem:[%s936_s1 + $0x80] ss:$8 sps:$4 sm:$0xff]  }
   0xc   :  { %468 = vmatpush1.bf16.msra.mxu1 %v629_v11  ;;  %428 = vmatprep.subr.bf16.mxu0 %v630_v12  ;;  %v659_v31 = vld [vmem:[%s936_s1 + $0x170] ss:$8 sps:$4 sm:$0xff]   ;;  %v662_v33 = vld [vmem:[%s936_s1 + $0x184] ss:$8 sps:$4 sm:$0xff]   ;;  %v665_v35 = vld [vmem:[%s936_s1 + $0x180] ss:$8 sps:$4 sm:$0xff]  }
   0xd   :  { %469 = vmatprep.subr.bf16.mxu1 %v632_v13  ;;  %v666_v36 = vld [vmem:[%s936_s1 + $0x94] ss:$8 sps:$4 sm:$0xff]   ;;  %v670_v38 = vld [vmem:[%s936_s1 + $0x90] ss:$8 sps:$4 sm:$0xff]   ;;  %v672_v40 = vld [vmem:[%s936_s1 + $0xa4] ss:$8 sps:$4 sm:$0xff]  }
   0xe   :  { %v668_v37 = vld [vmem:[%s936_s1 + $0x194] ss:$8 sps:$4 sm:$0xff]   ;;  %v671_v39 = vld [vmem:[%s936_s1 + $0x190] ss:$8 sps:$4 sm:$0xff]   ;;  %v674_v41 = vld [vmem:[%s936_s1 + $0x1a4] ss:$8 sps:$4 sm:$0xff]  }
   0xf   :  { %429 = vmatpush1.bf16.msra.mxu0 %v634_v14  ;;  %v676_v42 = vld [vmem:[%s936_s1 + $0xa0] ss:$8 sps:$4 sm:$0xff]   ;;  %v678_v44 = vld [vmem:[%s936_s1 + $0xb4] ss:$8 sps:$4 sm:$0xff]   ;;  %v682_v49 = vld [vmem:[%s936_s1 + $0xb0] ss:$8 sps:$4 sm:$0xff]  }
  0x10   :  { %470 = vmatpush1.bf16.msra.mxu1 %v635_v15  ;;  %430 = vmatprep.subr.bf16.mxu0 %v636_v16  ;;  %v677_v43 = vld [vmem:[%s936_s1 + $0x1a0] ss:$8 sps:$4 sm:$0xff]   ;;  %v680_v45 = vld [vmem:[%s936_s1 + $0x1b4] ss:$8 sps:$4 sm:$0xff]   ;;  %v683_v50 = vld [vmem:[%s936_s1 + $0x1b0] ss:$8 sps:$4 sm:$0xff]  }
  0x11   :  { %471 = vmatprep.subr.bf16.mxu1 %v638_v17  ;;  %v22_v46 = vld [vmem:[%s937_s0] sm:$0xff]  ;;  %v23_v48 = vld [vmem:[%s937_s0 + $0x8] sm:$0xff]  ;;  %v690_v56 = vld [vmem:[%s936_s1 + $0xd4] ss:$8 sps:$4 sm:$0xff]   ;;  %v516_v7 = vshrl.u32 %v515_v6, 7 }
  0x12   :  { %v543_v47 = vcombine.high %v22_v46, %v22_v46  ;;  %v545_v51 = vcombine.high %v23_v48, %v23_v48  ;;  %v684_v52 = vld [vmem:[%s936_s1 + $0xc4] ss:$8 sps:$4 sm:$0xff]   ;;  %v688_v54 = vld [vmem:[%s936_s1 + $0xc0] ss:$8 sps:$4 sm:$0xff]   ;;  %v692_v57 = vld [vmem:[%s936_s1 + $0x1d4] ss:$8 sps:$4 sm:$0xff]   ;;  %v542_v4 = vcombine.low %v22_v46, %v22_v46  ;;  %v544_v5 = vcombine.low %v23_v48, %v23_v48 }
  0x13   :  { %431 = vmatpush1.bf16.msra.mxu0 %v640_v18  ;;  %v686_v53 = vld [vmem:[%s936_s1 + $0x1c4] ss:$8 sps:$4 sm:$0xff]   ;;  %v689_v55 = vld [vmem:[%s936_s1 + $0x1c0] ss:$8 sps:$4 sm:$0xff]   ;;  %v694_v58 = vld [vmem:[%s936_s1 + $0xd0] ss:$8 sps:$4 sm:$0xff]  }
  0x14   :  { %472 = vmatpush1.bf16.msra.mxu1 %v641_v19  ;;  %432 = vmatprep.subr.bf16.mxu0 %v642_v20  ;;  %v695_v59 = vld [vmem:[%s936_s1 + $0x1d0] ss:$8 sps:$4 sm:$0xff]   ;;  %v696_v60 = vld [vmem:[%s936_s1 + $0xe4] ss:$8 sps:$4 sm:$0xff]   ;;  %v700_v62 = vld [vmem:[%s936_s1 + $0xe0] ss:$8 sps:$4 sm:$0xff]  }
  0x15   :  { %473 = vmatprep.subr.bf16.mxu1 %v644_v21  ;;  %454 = vmatprep.mubr.bf16.mxu0 %v543_v47  ;;  %v698_v61 = vld [vmem:[%s936_s1 + $0x1e4] ss:$8 sps:$4 sm:$0xff]   ;;  %v701_v63 = vld [vmem:[%s936_s1 + $0x1e0] ss:$8 sps:$4 sm:$0xff]   ;;  %v702_v0 = vld [vmem:[%s936_s1 + $0xf4] ss:$8 sps:$4 sm:$0xff]  }
  0x16   :  { %495 = vmatprep.mubr.bf16.mxu1 %v545_v51  ;;  %v704_v1 = vld [vmem:[%s936_s1 + $0x1f4] ss:$8 sps:$4 sm:$0xff]   ;;  %v706_v2 = vld [vmem:[%s936_s1 + $0xf0] ss:$8 sps:$4 sm:$0xff]   ;;  %v517_v8 = vsub.s32 0, %v516_v7  ;;  %v521_v10 = vsub.s32 1, %v516_v7 }
  0x17   :  { %433 = vmatpush1.bf16.msra.mxu0 %v646_v22  ;;  %v707_v3 = vld [vmem:[%s936_s1 + $0x1f0] ss:$8 sps:$4 sm:$0xff]   ;;  %v513_v9 = vld [vmem:[%s938_s2] sm:$0x3] }
  0x18   :  { %474 = vmatpush1.bf16.msra.mxu1 %v647_v23  ;;  %434 = vmatprep.subr.bf16.mxu0 %v648_v24  ;;  %v518_v11 = vrot.slane %v513_v9, %v517_v8  ;;  %v522_v14 = vrot.slane %v513_v9, %v521_v10 }
  0x19   :  { %475 = vmatprep.subr.bf16.mxu1 %v650_v25 }
  0x1b   :  { %435 = vmatpush1.bf16.msra.mxu0 %v652_v26 }
  0x1c   :  { %476 = vmatpush1.bf16.msra.mxu1 %v653_v27  ;;  %436 = vmatprep.subr.bf16.mxu0 %v654_v28 }
  0x1d   :  { %477 = vmatprep.subr.bf16.mxu1 %v656_v29 }
  0x1f   :  { %437 = vmatpush1.bf16.msra.mxu0 %v658_v30 }
  0x20   :  { %478 = vmatpush1.bf16.msra.mxu1 %v659_v31  ;;  %438 = vmatprep.subr.bf16.mxu0 %v660_v32 }
  0x21   :  { %479 = vmatprep.subr.bf16.mxu1 %v662_v33 }
  0x23   :  { %439 = vmatpush1.bf16.msra.mxu0 %v664_v34 }
  0x24   :  { %480 = vmatpush1.bf16.msra.mxu1 %v665_v35  ;;  %440 = vmatprep.subr.bf16.mxu0 %v666_v36 }
  0x25   :  { %481 = vmatprep.subr.bf16.mxu1 %v668_v37 }
  0x27   :  { %441 = vmatpush1.bf16.msra.mxu0 %v670_v38 }
  0x28   :  { %482 = vmatpush1.bf16.msra.mxu1 %v671_v39  ;;  %442 = vmatprep.subr.bf16.mxu0 %v672_v40 }
  0x29   :  { %483 = vmatprep.subr.bf16.mxu1 %v674_v41 }
  0x2b   :  { %443 = vmatpush1.bf16.msra.mxu0 %v676_v42 }
  0x2c   :  { %484 = vmatpush1.bf16.msra.mxu1 %v677_v43  ;;  %444 = vmatprep.subr.bf16.mxu0 %v678_v44 }
  0x2d   :  { %485 = vmatprep.subr.bf16.mxu1 %v680_v45 }
  0x2f   :  { %445 = vmatpush1.bf16.msra.mxu0 %v682_v49 }
  0x30   :  { %486 = vmatpush1.bf16.msra.mxu1 %v683_v50  ;;  %446 = vmatprep.subr.bf16.mxu0 %v684_v52 }
  0x31   :  { %487 = vmatprep.subr.bf16.mxu1 %v686_v53 }
  0x33   :  { %447 = vmatpush1.bf16.msra.mxu0 %v688_v54 }
  0x34   :  { %488 = vmatpush1.bf16.msra.mxu1 %v689_v55  ;;  %448 = vmatprep.subr.bf16.mxu0 %v690_v56 }
  0x35   :  { %489 = vmatprep.subr.bf16.mxu1 %v692_v57 }
  0x37   :  { %449 = vmatpush1.bf16.msra.mxu0 %v694_v58 }
  0x38   :  { %490 = vmatpush1.bf16.msra.mxu1 %v695_v59  ;;  %450 = vmatprep.subr.bf16.mxu0 %v696_v60 }
  0x39   :  { %491 = vmatprep.subr.bf16.mxu1 %v698_v61 }
  0x3b   :  { %451 = vmatpush1.bf16.msra.mxu0 %v700_v62 }
  0x3c   :  { %492 = vmatpush1.bf16.msra.mxu1 %v701_v63  ;;  %452 = vmatprep.subr.bf16.mxu0 %v702_v0 }
  0x3d   :  { %493 = vmatprep.subr.bf16.mxu1 %v704_v1 }
  0x3f   :  { %453 = vmatpush1.bf16.msra.mxu0 %v706_v2 }
  0x40   :  { %494 = vmatpush1.bf16.msra.mxu1 %v707_v3 }
  0x42   :  { %455 = vmatmul.mubr.bf16.vlgmr.msra.gmra.mrb[0].mxu0 %v542_v4 }
  0x43   :  { %496 = vmatmul.mubr.bf16.vlgmr.msra.gmra.mrb[0].mxu1 %v544_v5 }
 0x115   :  { %v456_v12 = vpop.f32.mrb[0].mxu0 }
 0x116   :  { %v497_v13 = vpop.f32.mrb[0].mxu1  ;;  %v458_v16 = vpop.f32.mrb[1].mxu0 }
 0x117   :  { %v498_v15 = vadd.f32 %v497_v13, %v456_v12  ;;  %v499_v17 = vpop.f32.mrb[1].mxu1  ;;  %v460_v19 = vpop.f32.mrb[2].mxu0 }
 0x118   :  { %v500_v18 = vadd.f32 %v499_v17, %v458_v16  ;;  %v501_v20 = vpop.f32.mrb[2].mxu1  ;;  %v461_v22 = vpop.f32.mrb[3].mxu0 }
 0x119   :  { %v525_v21 = vadd.f32 %v518_v11, %v498_v15  ;;  %v502_v23 = vpop.f32.mrb[3].mxu1 }
 0x11a   :  { %v526_v24 = vadd.f32 %v522_v14, %v500_v18 }
 0x11b   :  { %v527_v25 = vmax.f32 %v525_v21, 0.0 }
 0x11c   :  { %v528_v26 = vmax.f32 %v526_v24, 0.0 }
 0x11e   :  { %v611_v27 = vpack.c.bf16 %v528_v26, %v527_v25 }
 0x120   :  { %537 = vst [vmem:[%s939_s3] sm:$0xff] %v611_v27 }

</bundles_post_ra>
